<compile_context>
chip_gen: v5e
topology: v5e:2x2
jax: 0.10.0
libtpu: 0.0.40
codegen_flags: <defaults>
</compile_context>

<pallas_src>
import functools
import math

import jax
import jax.numpy as jnp
from jax.experimental import pallas as pl
from jax.experimental.pallas import tpu as pltpu


# ---------------------------------------------------------------------------
# Fused kernel
# ---------------------------------------------------------------------------
def _fused_conv_seq_kernel(x_ref, w1_ref, w2_ref, w3_ref,
                           p1_ref, p2_ref, p3_ref, o_ref, *,
                           seq_len, act_dtype):
    """Fused 3x(Conv1d k=3 pad=1 + bias + ReLU + BN(eval)) + mean-pool.

    x_ref:   (TB, L, Cin)        batch tile, channels-last
    wN_ref:  (3, Cin_N, Cout_N)  bf16 weights, tap k=0/1/2 <-> input l-1/l/l+1
    pN_ref:  (3, Cout_N)         f32 rows = [conv bias, BN scale, BN shift]
    o_ref:   (TB, Cout_3)        pooled output
    """
    L = seq_len
    TB, _, c_in = x_ref.shape
    n = TB * L  # rows folded into the matmul M dimension

    # Boundary masks, computed once (JAX does not CSE broadcasts).  They keep
    # the shifts from leaking across folded batch boundaries and implement the
    # conv's zero padding at l=0 / l=L-1.
    pos = jax.lax.broadcasted_iota(jnp.int32, (n, 1), 0) % L
    is_first = pos == 0
    is_last = pos == L - 1

    def shift_prev(t):  # t[l-1] at row l, zero at l == 0
        return jnp.where(is_first, 0.0, pltpu.roll(t, shift=1, axis=0))

    def shift_next(t):  # t[l+1] at row l, zero at l == L-1
        return jnp.where(is_last, 0.0, pltpu.roll(t, shift=n - 1, axis=0))

    def conv_in(h, w_ref):
        # Input-side shifts (Cin <= Cout): three accumulated per-tap matmuls,
        # f32 accumulator, bf16 MXU operands.
        y = jnp.dot(shift_prev(h).astype(jnp.bfloat16), w_ref[0],
                    preferred_element_type=jnp.float32)
        y += jnp.dot(h.astype(jnp.bfloat16), w_ref[1],
                     preferred_element_type=jnp.float32)
        y += jnp.dot(shift_next(h).astype(jnp.bfloat16), w_ref[2],
                     preferred_element_type=jnp.float32)
        return y

    def bias_relu_bn(y, p_ref):
        p = p_ref[...]
        y = jnp.maximum(y + p[0:1, :], 0.0)                 # conv bias + ReLU
        return (y * p[1:2, :] + p[2:3, :]).astype(act_dtype)  # BN (eval)

    h = x_ref[...].reshape(n, c_in).astype(act_dtype)
    h = bias_relu_bn(conv_in(h, w1_ref), p1_ref)            # (n, 256)
    h = bias_relu_bn(conv_in(h, w2_ref), p2_ref)            # (n, 512)

    # Layer 3 (512 -> Cout): matmul the un-shifted input and shift/mask the
    # narrow (n, Cout) partial products instead of the wide (n, 512) input.
    hb = h.astype(jnp.bfloat16)
    t_prev = jnp.dot(hb, w3_ref[0], preferred_element_type=jnp.float32)
    t_mid = jnp.dot(hb, w3_ref[1], preferred_element_type=jnp.float32)
    t_next = jnp.dot(hb, w3_ref[2], preferred_element_type=jnp.float32)
    y3 = shift_prev(t_prev) + t_mid + shift_next(t_next)

    p3 = p3_ref[...]
    y3 = jnp.maximum(y3 + p3[0:1, :], 0.0)                   # bias + ReLU (f32)
    c_out = y3.shape[-1]
    # AdaptiveAvgPool1d(1): sum over L, then fold BN scale and the 1/L factor
    # into a single per-channel multiply on the pooled (TB, Cout) result.
    pooled = jnp.sum(y3.reshape(TB, L, c_out), axis=1)
    o_ref[...] = (pooled * (p3[1:2, :] * (1.0 / L)) + p3[2:3, :]).astype(o_ref.dtype)


# ---------------------------------------------------------------------------
# Tiling / VMEM heuristics
# ---------------------------------------------------------------------------
_TARGET_ROWS = 2048          # folded matmul M target (multiple of 256 MXU rows)
_MIN_ROWS_PER_STEP = 256     # don't split below this just to get 2 grid steps
_SCRATCH_BYTES_PER_ROW = 8 * 1024  # conservative live-temporary estimate / row
                                   # (layer-2 peak ~4.6 KB/row + compiler slack)


def _pick_vmem_limit():
    try:
        cap = int(pltpu.get_tpu_info().vmem_capacity_bytes)
    except Exception:
        cap = 64 << 20  # assume the smallest per-core VMEM (v7x)
    # ~25% headroom for compiler-internal scratch; never ask for more than 100MB.
    return min(int(cap * 0.75), 100 << 20)


def _largest_divisor_leq(b, cap):
    cap = max(1, min(cap, b))
    for d in range(cap, 0, -1):
        if b % d == 0:
            return d
    return 1


def _pick_batch_tile(batch, seq_len, vmem_limit_bytes, weight_bytes):
    # Scratch budget = VMEM limit minus (double-buffered) weights minus slack.
    scratch_budget = max(vmem_limit_bytes - 2 * weight_bytes - (4 << 20), 1 << 20)
    rows_by_vmem = max(scratch_budget // _SCRATCH_BYTES_PER_ROW, seq_len)
    cap = max(min(rows_by_vmem, _TARGET_ROWS) // seq_len, 1)
    tile = _largest_divisor_leq(batch, cap)
    # Prefer >= 2 grid steps on the "parallel" axis (v7x has 2 TensorCores) as
    # long as each step still folds >= _MIN_ROWS_PER_STEP rows into the MXU.
    if batch // tile == 1 and batch >= 2:
        half = _largest_divisor_leq(batch, batch // 2)
        if half * seq_len >= _MIN_ROWS_PER_STEP:
            tile = half
    return tile


# ---------------------------------------------------------------------------
# Wrapper
# ---------------------------------------------------------------------------
def conv_sequence_model(x, kernel_params, *, batch_tile=None):
    """x: (B, L, C_in) channels-last (as passed to ConvSequenceModel.forward).

    kernel_params: 3 tuples (w bf16 (3, Cin, Cout), p f32 (3, Cout)).
    Returns (B, C_out) f32, matching model(x) in eval mode.
    """
    B, L, c_in = x.shape
    (w1, p1), (w2, p2), (w3, p3) = kernel_params
    c_out = w3.shape[-1]

    vmem_limit = _pick_vmem_limit()
    weight_bytes = sum(int(a.size) * a.dtype.itemsize
                       for a in (w1, w2, w3, p1, p2, p3))
    if batch_tile is None:
        batch_tile = _pick_batch_tile(B, L, vmem_limit, weight_bytes)
    if B % batch_tile:
        raise ValueError(f"batch {B} must be divisible by batch_tile {batch_tile}")

    def build(act_dtype, single_buffer):
        kernel = functools.partial(_fused_conv_seq_kernel,
                                   seq_len=L, act_dtype=act_dtype)

        def const_spec(arr):
            ndim = arr.ndim
            idx = lambda b, _n=ndim: (0,) * _n
            if single_buffer:
                # Grid-invariant operand: one buffer is enough, saves VMEM.
                return pl.BlockSpec(arr.shape, idx, pipeline_mode=pl.Buffered(1))
            return pl.BlockSpec(arr.shape, idx)

        return pl.pallas_call(
            kernel,
            out_shape=jax.ShapeDtypeStruct((B, c_out), jnp.float32),
            grid_spec=pltpu.PrefetchScalarGridSpec(
                num_scalar_prefetch=0,
                grid=(B // batch_tile,),
                in_specs=[
                    pl.BlockSpec((batch_tile, L, c_in), lambda b: (b, 0, 0)),
                    const_spec(w1), const_spec(w2), const_spec(w3),
                    const_spec(p1), const_spec(p2), const_spec(p3),
                ],
                out_specs=pl.BlockSpec((batch_tile, c_out), lambda b: (b, 0)),
            ),
            compiler_params=pltpu.CompilerParams(
                dimension_semantics=("parallel",),
                vmem_limit_bytes=vmem_limit,
            ),
        )

    args = (x, w1, w2, w3, p1, p2, p3)
    try:
        # Fast path: bf16 activations through the shifts, single-buffered weights.
        return build(jnp.bfloat16, True)(*args)
    except Exception:
        # Portability fallback for Mosaic builds that reject bf16 sublane
        # rotates or pl.Buffered(1): f32 shifts + default double-buffering.
        # Numerics are identical (matmul operands are bf16 either way).
        return build(jnp.float32, False)(*args)


# ---------------------------------------------------------------------------
# Parameter prep (PyTorch layout -> kernel layout) and pure-JAX reference
# ---------------------------------------------------------------------------
def fold_layer_params(w, b, gamma, beta, mean, var, *, eps=1e-5):
    """Fold PyTorch Conv1d weights + eval-mode BatchNorm1d into kernel operands.

    w: (Cout, Cin, K) torch Conv1d weight, b: (Cout,) conv bias,
    gamma/beta/mean/var: (Cout,) BN affine params + running stats.
    Returns (w bf16 (K, Cin, Cout) tap-major, p f32 (3, Cout)).
    """
    c_out, c_in, k = w.shape
    w_taps = jnp.transpose(w, (2, 1, 0))               # (K, Cin, Cout); k=0 ~ l-1
    scale = gamma / jnp.sqrt(var + eps)
    shift = beta - mean * scale
    p = jnp.stack([b, scale, shift], axis=0)           # (3, Cout)
    return w_taps.astype(jnp.bfloat16), p.astype(jnp.float32)


def conv_sequence_model_ref(x, torch_params, *, eps=1e-5):
    """Pure-JAX f32 mirror of ConvSequenceModel.forward (eval mode)."""
    h = jnp.transpose(x, (0, 2, 1))                    # x.permute(0, 2, 1)
    for w, b, gamma, beta, mean, var in torch_params:
        h = jax.lax.conv_general_dilated(
            h, w, window_strides=(1,), padding=((1, 1),),
            dimension_numbers=("NCH", "OIH", "NCH"))
        h = h + b[None, :, None]
        h = jnp.maximum(h, 0.0)                        # ReLU
        h = ((h - mean[None, :, None])
             * (gamma / jnp.sqrt(var + eps))[None, :, None]
             + beta[None, :, None])                    # BatchNorm1d (eval)
        # Dropout(0.1): identity in eval mode.
    return jnp.mean(h, axis=-1)                        # adaptive_pool + squeeze


def init_torch_conv1d_params(key, c_in, c_out, k=3):
    """PyTorch Conv1d default init: U(-1/sqrt(Cin*K), 1/sqrt(Cin*K))."""
    kw, kb = jax.random.split(key)
    bound = 1.0 / math.sqrt(c_in * k)
    w = jax.random.uniform(kw, (c_out, c_in, k), jnp.float32, -bound, bound)
    b = jax.random.uniform(kb, (c_out,), jnp.float32, -bound, bound)
    return w, b


def init_bn_params(key, c):
    """Non-trivial eval-mode BN params (fresh torch defaults would be 1/0/0/1)."""
    kg, kb, km, kv = jax.random.split(key, 4)
    gamma = jax.random.uniform(kg, (c,), jnp.float32, 0.5, 1.5)
    beta = 0.1 * jax.random.normal(kb, (c,), jnp.float32)
    mean = 0.1 * jax.random.normal(km, (c,), jnp.float32)
    var = jax.random.uniform(kv, (c,), jnp.float32, 0.5, 1.5)
    return gamma, beta, mean, var


if __name__ == "__main__":
    B, L = 2, 16
    input_channels, output_channels = 4, 32
    widths = (input_channels, 256, 512, output_channels)

    key = jax.random.PRNGKey(0)
    kx, *pkeys = jax.random.split(key, 1 + 2 * 3)

    x = jax.random.normal(kx, (B, L, input_channels), jnp.float32)

    torch_params = []
    for i in range(3):
        w, b = init_torch_conv1d_params(pkeys[2 * i], widths[i], widths[i + 1])
        gamma, beta, mean, var = init_bn_params(pkeys[2 * i + 1], widths[i + 1])
        torch_params.append((w, b, gamma, beta, mean, var))

    kernel_params = tuple(fold_layer_params(*p) for p in torch_params)

    out = jax.block_until_ready(conv_sequence_model(x, kernel_params))
    assert out.shape == (B, output_channels), out.shape
    assert bool(jnp.all(jnp.isfinite(out)))

    ref = conv_sequence_model_ref(x, torch_params)
    max_err = float(jnp.max(jnp.abs(out - ref)))
    assert jnp.allclose(out, ref, rtol=2e-2, atol=2e-2), f"max abs err {max_err}"
    print("KERNEL_OK")
</pallas_src>

<mosaic_0001>
module attributes {stable_mosaic.version = 11 : i64} {
  func.func @_fused_conv_seq_kernel(%arg0: i32, %arg1: memref<2x16x4xf32, #tpu.memory_space<vmem>>, %arg2: memref<3x4x256xbf16, #tpu.memory_space<vmem>>, %arg3: memref<3x256x512xbf16, #tpu.memory_space<vmem>>, %arg4: memref<3x512x32xbf16, #tpu.memory_space<vmem>>, %arg5: memref<3x256xf32, #tpu.memory_space<vmem>>, %arg6: memref<3x512xf32, #tpu.memory_space<vmem>>, %arg7: memref<3x32xf32, #tpu.memory_space<vmem>>, %arg8: memref<2x32xf32, #tpu.memory_space<vmem>>) attributes {dimension_semantics = [#tpu.dimension_semantics<parallel>], iteration_bounds = array<i64: 1>, scalar_prefetch = 0 : i64, scratch_operands = 0 : i64, tpu.core_type = #tpu.core_type<tc>, window_params = [{transform_indices = @transform_0, window_bounds = array<i64: 2, 16, 4>}, {pipeline_mode = #tpu.pipeline_mode<synchronous>, transform_indices = @transform_1, window_bounds = array<i64: 3, 4, 256>}, {pipeline_mode = #tpu.pipeline_mode<synchronous>, transform_indices = @transform_2, window_bounds = array<i64: 3, 256, 512>}, {pipeline_mode = #tpu.pipeline_mode<synchronous>, transform_indices = @transform_3, window_bounds = array<i64: 3, 512, 32>}, {pipeline_mode = #tpu.pipeline_mode<synchronous>, transform_indices = @transform_4, window_bounds = array<i64: 3, 256>}, {pipeline_mode = #tpu.pipeline_mode<synchronous>, transform_indices = @transform_5, window_bounds = array<i64: 3, 512>}, {pipeline_mode = #tpu.pipeline_mode<synchronous>, transform_indices = @transform_6, window_bounds = array<i64: 3, 32>}, {transform_indices = @transform_7, window_bounds = array<i64: 2, 32>}]} {
    %0 = tpu.iota {dimensions = array<i32: 0>} : vector<32x1xi32>
    %c16_i32 = arith.constant 16 : i32
    %c0_i32 = arith.constant 0 : i32
    %1 = arith.cmpi eq, %c16_i32, %c0_i32 : i32
    %c1_i32 = arith.constant 1 : i32
    %2 = arith.select %1, %c1_i32, %c16_i32 : i32
    %3 = vector.broadcast %2 : i32 to vector<32x1xi32>
    %4 = arith.remsi %0, %3 : vector<32x1xi32>
    %c0_i32_0 = arith.constant 0 : i32
    %5 = vector.broadcast %c0_i32_0 : i32 to vector<32x1xi32>
    %6 = arith.cmpi ne, %4, %5 : vector<32x1xi32>
    %c0_i32_1 = arith.constant 0 : i32
    %7 = vector.broadcast %c0_i32_1 : i32 to vector<32x1xi32>
    %8 = arith.cmpi slt, %4, %7 : vector<32x1xi32>
    %c0_i32_2 = arith.constant 0 : i32
    %9 = arith.cmpi slt, %2, %c0_i32_2 : i32
    %10 = vector.broadcast %9 : i1 to vector<32x1xi1>
    %11 = vector.broadcast %10 : vector<32x1xi1> to vector<32x1xi1>
    %12 = arith.xori %8, %11 : vector<32x1xi1>
    %13 = arith.andi %12, %6 : vector<32x1xi1>
    %14 = vector.broadcast %2 : i32 to vector<32x1xi32>
    %15 = arith.addi %4, %14 : vector<32x1xi32>
    %16 = arith.select %13, %15, %4 : vector<32x1xi1>, vector<32x1xi32>
    %c0_i32_3 = arith.constant 0 : i32
    %17 = vector.broadcast %c0_i32_3 : i32 to vector<32x1xi32>
    %18 = arith.cmpi eq, %16, %17 : vector<32x1xi32>
    %c15_i32 = arith.constant 15 : i32
    %19 = vector.broadcast %c15_i32 : i32 to vector<32x1xi32>
    %20 = arith.cmpi eq, %16, %19 : vector<32x1xi32>
    %c0 = arith.constant 0 : index
    %c0_4 = arith.constant 0 : index
    %c0_5 = arith.constant 0 : index
    %21 = vector.load %arg1[%c0, %c0_4, %c0_5] : memref<2x16x4xf32, #tpu.memory_space<vmem>>, vector<2x16x4xf32>
    %22 = vector.shape_cast %21 : vector<2x16x4xf32> to vector<32x4xf32>
    %23 = arith.truncf %22 : vector<32x4xf32> to vector<32x4xbf16>
    %c1_i32_6 = arith.constant 1 : i32
    %24 = tpu.dynamic_rotate %23 by %c1_i32_6 dim 0 : vector<32x4xbf16>, i32 -> vector<32x4xbf16>
    %cst = arith.constant 0.000000e+00 : f32
    %25 = arith.truncf %cst : f32 to bf16
    %26 = vector.shape_cast %18 : vector<32x1xi1> to vector<32x1xi1>
    %27 = vector.broadcast %26 : vector<32x1xi1> to vector<32x4xi1>
    %28 = vector.broadcast %25 : bf16 to vector<32x4xbf16>
    %29 = arith.select %27, %28, %24 : vector<32x4xi1>, vector<32x4xbf16>
    %c0_7 = arith.constant 0 : index
    %c0_8 = arith.constant 0 : index
    %c0_9 = arith.constant 0 : index
    %30 = vector.load %arg2[%c0_7, %c0_8, %c0_9] : memref<3x4x256xbf16, #tpu.memory_space<vmem>>, vector<1x4x256xbf16>
    %31 = vector.shape_cast %30 : vector<1x4x256xbf16> to vector<4x256xbf16>
    %cst_10 = arith.constant dense<0.000000e+00> : vector<32x256xf32>
    %32 = tpu.matmul %29, %31, %cst_10 {dimension_numbers = #tpu.dot_dimension_numbers<[1], [0], [0], [1], [0, 0, 1, 1], [], []>} : vector<32x4xbf16>, vector<4x256xbf16>, vector<32x256xf32> -> vector<32x256xf32>
    %c1 = arith.constant 1 : index
    %c0_11 = arith.constant 0 : index
    %c0_12 = arith.constant 0 : index
    %33 = vector.load %arg2[%c1, %c0_11, %c0_12] : memref<3x4x256xbf16, #tpu.memory_space<vmem>>, vector<1x4x256xbf16>
    %34 = vector.shape_cast %33 : vector<1x4x256xbf16> to vector<4x256xbf16>
    %cst_13 = arith.constant dense<0.000000e+00> : vector<32x256xf32>
    %35 = tpu.matmul %23, %34, %cst_13 {dimension_numbers = #tpu.dot_dimension_numbers<[1], [0], [0], [1], [0, 0, 1, 1], [], []>} : vector<32x4xbf16>, vector<4x256xbf16>, vector<32x256xf32> -> vector<32x256xf32>
    %36 = arith.addf %32, %35 : vector<32x256xf32>
    %c31_i32 = arith.constant 31 : i32
    %37 = tpu.dynamic_rotate %23 by %c31_i32 dim 0 : vector<32x4xbf16>, i32 -> vector<32x4xbf16>
    %cst_14 = arith.constant 0.000000e+00 : f32
    %38 = arith.truncf %cst_14 : f32 to bf16
    %39 = vector.shape_cast %20 : vector<32x1xi1> to vector<32x1xi1>
    %40 = vector.broadcast %39 : vector<32x1xi1> to vector<32x4xi1>
    %41 = vector.broadcast %38 : bf16 to vector<32x4xbf16>
    %42 = arith.select %40, %41, %37 : vector<32x4xi1>, vector<32x4xbf16>
    %c2 = arith.constant 2 : index
    %c0_15 = arith.constant 0 : index
    %c0_16 = arith.constant 0 : index
    %43 = vector.load %arg2[%c2, %c0_15, %c0_16] : memref<3x4x256xbf16, #tpu.memory_space<vmem>>, vector<1x4x256xbf16>
    %44 = vector.shape_cast %43 : vector<1x4x256xbf16> to vector<4x256xbf16>
    %cst_17 = arith.constant dense<0.000000e+00> : vector<32x256xf32>
    %45 = tpu.matmul %42, %44, %cst_17 {dimension_numbers = #tpu.dot_dimension_numbers<[1], [0], [0], [1], [0, 0, 1, 1], [], []>} : vector<32x4xbf16>, vector<4x256xbf16>, vector<32x256xf32> -> vector<32x256xf32>
    %46 = arith.addf %36, %45 : vector<32x256xf32>
    %c0_18 = arith.constant 0 : index
    %c0_19 = arith.constant 0 : index
    %47 = vector.load %arg5[%c0_18, %c0_19] : memref<3x256xf32, #tpu.memory_space<vmem>>, vector<3x256xf32>
    %48 = vector.extract_strided_slice %47 {offsets = [0, 0], sizes = [1, 256], strides = [1, 1]} : vector<3x256xf32> to vector<1x256xf32>
    %49 = vector.broadcast %48 : vector<1x256xf32> to vector<32x256xf32>
    %50 = arith.addf %46, %49 : vector<32x256xf32>
    %cst_20 = arith.constant 0.000000e+00 : f32
    %51 = vector.broadcast %cst_20 : f32 to vector<32x256xf32>
    %52 = arith.maximumf %50, %51 : vector<32x256xf32>
    %53 = vector.extract_strided_slice %47 {offsets = [1, 0], sizes = [1, 256], strides = [1, 1]} : vector<3x256xf32> to vector<1x256xf32>
    %54 = vector.broadcast %53 : vector<1x256xf32> to vector<32x256xf32>
    %55 = arith.mulf %52, %54 : vector<32x256xf32>
    %56 = vector.extract_strided_slice %47 {offsets = [2, 0], sizes = [1, 256], strides = [1, 1]} : vector<3x256xf32> to vector<1x256xf32>
    %57 = vector.broadcast %56 : vector<1x256xf32> to vector<32x256xf32>
    %58 = arith.addf %55, %57 : vector<32x256xf32>
    %59 = arith.truncf %58 : vector<32x256xf32> to vector<32x256xbf16>
    %c1_i32_21 = arith.constant 1 : i32
    %60 = tpu.dynamic_rotate %59 by %c1_i32_21 dim 0 : vector<32x256xbf16>, i32 -> vector<32x256xbf16>
    %cst_22 = arith.constant 0.000000e+00 : f32
    %61 = arith.truncf %cst_22 : f32 to bf16
    %62 = vector.shape_cast %18 : vector<32x1xi1> to vector<32x1xi1>
    %63 = vector.broadcast %62 : vector<32x1xi1> to vector<32x256xi1>
    %64 = vector.broadcast %61 : bf16 to vector<32x256xbf16>
    %65 = arith.select %63, %64, %60 : vector<32x256xi1>, vector<32x256xbf16>
    %c0_23 = arith.constant 0 : index
    %c0_24 = arith.constant 0 : index
    %c0_25 = arith.constant 0 : index
    %66 = vector.load %arg3[%c0_23, %c0_24, %c0_25] : memref<3x256x512xbf16, #tpu.memory_space<vmem>>, vector<1x256x512xbf16>
    %67 = vector.shape_cast %66 : vector<1x256x512xbf16> to vector<256x512xbf16>
    %cst_26 = arith.constant dense<0.000000e+00> : vector<32x512xf32>
    %68 = tpu.matmul %65, %67, %cst_26 {dimension_numbers = #tpu.dot_dimension_numbers<[1], [0], [0], [1], [0, 0, 1, 1], [], []>} : vector<32x256xbf16>, vector<256x512xbf16>, vector<32x512xf32> -> vector<32x512xf32>
    %c1_27 = arith.constant 1 : index
    %c0_28 = arith.constant 0 : index
    %c0_29 = arith.constant 0 : index
    %69 = vector.load %arg3[%c1_27, %c0_28, %c0_29] : memref<3x256x512xbf16, #tpu.memory_space<vmem>>, vector<1x256x512xbf16>
    %70 = vector.shape_cast %69 : vector<1x256x512xbf16> to vector<256x512xbf16>
    %cst_30 = arith.constant dense<0.000000e+00> : vector<32x512xf32>
    %71 = tpu.matmul %59, %70, %cst_30 {dimension_numbers = #tpu.dot_dimension_numbers<[1], [0], [0], [1], [0, 0, 1, 1], [], []>} : vector<32x256xbf16>, vector<256x512xbf16>, vector<32x512xf32> -> vector<32x512xf32>
    %72 = arith.addf %68, %71 : vector<32x512xf32>
    %c31_i32_31 = arith.constant 31 : i32
    %73 = tpu.dynamic_rotate %59 by %c31_i32_31 dim 0 : vector<32x256xbf16>, i32 -> vector<32x256xbf16>
    %cst_32 = arith.constant 0.000000e+00 : f32
    %74 = arith.truncf %cst_32 : f32 to bf16
    %75 = vector.shape_cast %20 : vector<32x1xi1> to vector<32x1xi1>
    %76 = vector.broadcast %75 : vector<32x1xi1> to vector<32x256xi1>
    %77 = vector.broadcast %74 : bf16 to vector<32x256xbf16>
    %78 = arith.select %76, %77, %73 : vector<32x256xi1>, vector<32x256xbf16>
    %c2_33 = arith.constant 2 : index
    %c0_34 = arith.constant 0 : index
    %c0_35 = arith.constant 0 : index
    %79 = vector.load %arg3[%c2_33, %c0_34, %c0_35] : memref<3x256x512xbf16, #tpu.memory_space<vmem>>, vector<1x256x512xbf16>
    %80 = vector.shape_cast %79 : vector<1x256x512xbf16> to vector<256x512xbf16>
    %cst_36 = arith.constant dense<0.000000e+00> : vector<32x512xf32>
    %81 = tpu.matmul %78, %80, %cst_36 {dimension_numbers = #tpu.dot_dimension_numbers<[1], [0], [0], [1], [0, 0, 1, 1], [], []>} : vector<32x256xbf16>, vector<256x512xbf16>, vector<32x512xf32> -> vector<32x512xf32>
    %82 = arith.addf %72, %81 : vector<32x512xf32>
    %c0_37 = arith.constant 0 : index
    %c0_38 = arith.constant 0 : index
    %83 = vector.load %arg6[%c0_37, %c0_38] : memref<3x512xf32, #tpu.memory_space<vmem>>, vector<3x512xf32>
    %84 = vector.extract_strided_slice %83 {offsets = [0, 0], sizes = [1, 512], strides = [1, 1]} : vector<3x512xf32> to vector<1x512xf32>
    %85 = vector.broadcast %84 : vector<1x512xf32> to vector<32x512xf32>
    %86 = arith.addf %82, %85 : vector<32x512xf32>
    %cst_39 = arith.constant 0.000000e+00 : f32
    %87 = vector.broadcast %cst_39 : f32 to vector<32x512xf32>
    %88 = arith.maximumf %86, %87 : vector<32x512xf32>
    %89 = vector.extract_strided_slice %83 {offsets = [1, 0], sizes = [1, 512], strides = [1, 1]} : vector<3x512xf32> to vector<1x512xf32>
    %90 = vector.broadcast %89 : vector<1x512xf32> to vector<32x512xf32>
    %91 = arith.mulf %88, %90 : vector<32x512xf32>
    %92 = vector.extract_strided_slice %83 {offsets = [2, 0], sizes = [1, 512], strides = [1, 1]} : vector<3x512xf32> to vector<1x512xf32>
    %93 = vector.broadcast %92 : vector<1x512xf32> to vector<32x512xf32>
    %94 = arith.addf %91, %93 : vector<32x512xf32>
    %95 = arith.truncf %94 : vector<32x512xf32> to vector<32x512xbf16>
    %c0_40 = arith.constant 0 : index
    %c0_41 = arith.constant 0 : index
    %c0_42 = arith.constant 0 : index
    %96 = vector.load %arg4[%c0_40, %c0_41, %c0_42] : memref<3x512x32xbf16, #tpu.memory_space<vmem>>, vector<1x512x32xbf16>
    %97 = vector.shape_cast %96 : vector<1x512x32xbf16> to vector<512x32xbf16>
    %cst_43 = arith.constant dense<0.000000e+00> : vector<32x32xf32>
    %98 = tpu.matmul %95, %97, %cst_43 {dimension_numbers = #tpu.dot_dimension_numbers<[1], [0], [0], [1], [0, 0, 1, 1], [], []>} : vector<32x512xbf16>, vector<512x32xbf16>, vector<32x32xf32> -> vector<32x32xf32>
    %c1_44 = arith.constant 1 : index
    %c0_45 = arith.constant 0 : index
    %c0_46 = arith.constant 0 : index
    %99 = vector.load %arg4[%c1_44, %c0_45, %c0_46] : memref<3x512x32xbf16, #tpu.memory_space<vmem>>, vector<1x512x32xbf16>
    %100 = vector.shape_cast %99 : vector<1x512x32xbf16> to vector<512x32xbf16>
    %cst_47 = arith.constant dense<0.000000e+00> : vector<32x32xf32>
    %101 = tpu.matmul %95, %100, %cst_47 {dimension_numbers = #tpu.dot_dimension_numbers<[1], [0], [0], [1], [0, 0, 1, 1], [], []>} : vector<32x512xbf16>, vector<512x32xbf16>, vector<32x32xf32> -> vector<32x32xf32>
    %c2_48 = arith.constant 2 : index
    %c0_49 = arith.constant 0 : index
    %c0_50 = arith.constant 0 : index
    %102 = vector.load %arg4[%c2_48, %c0_49, %c0_50] : memref<3x512x32xbf16, #tpu.memory_space<vmem>>, vector<1x512x32xbf16>
    %103 = vector.shape_cast %102 : vector<1x512x32xbf16> to vector<512x32xbf16>
    %cst_51 = arith.constant dense<0.000000e+00> : vector<32x32xf32>
    %104 = tpu.matmul %95, %103, %cst_51 {dimension_numbers = #tpu.dot_dimension_numbers<[1], [0], [0], [1], [0, 0, 1, 1], [], []>} : vector<32x512xbf16>, vector<512x32xbf16>, vector<32x32xf32> -> vector<32x32xf32>
    %c1_i32_52 = arith.constant 1 : i32
    %105 = tpu.dynamic_rotate %98 by %c1_i32_52 dim 0 : vector<32x32xf32>, i32 -> vector<32x32xf32>
    %cst_53 = arith.constant 0.000000e+00 : f32
    %106 = vector.shape_cast %18 : vector<32x1xi1> to vector<32x1xi1>
    %107 = vector.broadcast %106 : vector<32x1xi1> to vector<32x32xi1>
    %108 = vector.broadcast %cst_53 : f32 to vector<32x32xf32>
    %109 = arith.select %107, %108, %105 : vector<32x32xi1>, vector<32x32xf32>
    %110 = arith.addf %109, %101 : vector<32x32xf32>
    %c31_i32_54 = arith.constant 31 : i32
    %111 = tpu.dynamic_rotate %104 by %c31_i32_54 dim 0 : vector<32x32xf32>, i32 -> vector<32x32xf32>
    %cst_55 = arith.constant 0.000000e+00 : f32
    %112 = vector.shape_cast %20 : vector<32x1xi1> to vector<32x1xi1>
    %113 = vector.broadcast %112 : vector<32x1xi1> to vector<32x32xi1>
    %114 = vector.broadcast %cst_55 : f32 to vector<32x32xf32>
    %115 = arith.select %113, %114, %111 : vector<32x32xi1>, vector<32x32xf32>
    %116 = arith.addf %110, %115 : vector<32x32xf32>
    %c0_56 = arith.constant 0 : index
    %c0_57 = arith.constant 0 : index
    %117 = vector.load %arg7[%c0_56, %c0_57] : memref<3x32xf32, #tpu.memory_space<vmem>>, vector<3x32xf32>
    %118 = vector.extract_strided_slice %117 {offsets = [0, 0], sizes = [1, 32], strides = [1, 1]} : vector<3x32xf32> to vector<1x32xf32>
    %119 = vector.broadcast %118 : vector<1x32xf32> to vector<32x32xf32>
    %120 = arith.addf %116, %119 : vector<32x32xf32>
    %cst_58 = arith.constant 0.000000e+00 : f32
    %121 = vector.broadcast %cst_58 : f32 to vector<32x32xf32>
    %122 = arith.maximumf %120, %121 : vector<32x32xf32>
    %123 = vector.shape_cast %122 : vector<32x32xf32> to vector<2x16x32xf32>
    %cst_59 = arith.constant dense<0.000000e+00> : vector<2x32xf32>
    %124 = vector.multi_reduction <add>, %123, %cst_59 [1] : vector<2x16x32xf32> to vector<2x32xf32>
    %125 = vector.extract_strided_slice %117 {offsets = [1, 0], sizes = [1, 32], strides = [1, 1]} : vector<3x32xf32> to vector<1x32xf32>
    %cst_60 = arith.constant 6.250000e-02 : f32
    %126 = vector.broadcast %cst_60 : f32 to vector<1x32xf32>
    %127 = arith.mulf %125, %126 : vector<1x32xf32>
    %128 = vector.broadcast %127 : vector<1x32xf32> to vector<2x32xf32>
    %129 = arith.mulf %124, %128 : vector<2x32xf32>
    %130 = vector.extract_strided_slice %117 {offsets = [2, 0], sizes = [1, 32], strides = [1, 1]} : vector<3x32xf32> to vector<1x32xf32>
    %131 = vector.broadcast %130 : vector<1x32xf32> to vector<2x32xf32>
    %132 = arith.addf %129, %131 : vector<2x32xf32>
    %c0_61 = arith.constant 0 : index
    %c0_62 = arith.constant 0 : index
    %133 = vector.load %arg8[%c0_61, %c0_62] : memref<2x32xf32, #tpu.memory_space<vmem>>, vector<2x32xf32>
    tpu.vector_store %arg8[%c0_61, %c0_62], %132 {strides = array<i32>} : memref<2x32xf32, #tpu.memory_space<vmem>>, vector<2x32xf32>,
    return
  }
  func.func @transform_0(%arg0: i32) -> (i32, i32, i32) {
    %c0_i32 = arith.constant 0 : i32
    %c0_i32_0 = arith.constant 0 : i32
    %c0_i32_1 = arith.constant 0 : i32
    return %arg0, %c0_i32, %c0_i32_0 : i32, i32, i32
  }
  func.func @transform_1(%arg0: i32) -> (i32, i32, i32) {
    %c0_i32 = arith.constant 0 : i32
    %c0_i32_0 = arith.constant 0 : i32
    %c0_i32_1 = arith.constant 0 : i32
    %c0_i32_2 = arith.constant 0 : i32
    return %c0_i32, %c0_i32_0, %c0_i32_1 : i32, i32, i32
  }
  func.func @transform_2(%arg0: i32) -> (i32, i32, i32) {
    %c0_i32 = arith.constant 0 : i32
    %c0_i32_0 = arith.constant 0 : i32
    %c0_i32_1 = arith.constant 0 : i32
    %c0_i32_2 = arith.constant 0 : i32
    return %c0_i32, %c0_i32_0, %c0_i32_1 : i32, i32, i32
  }
  func.func @transform_3(%arg0: i32) -> (i32, i32, i32) {
    %c0_i32 = arith.constant 0 : i32
    %c0_i32_0 = arith.constant 0 : i32
    %c0_i32_1 = arith.constant 0 : i32
    %c0_i32_2 = arith.constant 0 : i32
    return %c0_i32, %c0_i32_0, %c0_i32_1 : i32, i32, i32
  }
  func.func @transform_4(%arg0: i32) -> (i32, i32) {
    %c0_i32 = arith.constant 0 : i32
    %c0_i32_0 = arith.constant 0 : i32
    %c0_i32_1 = arith.constant 0 : i32
    return %c0_i32, %c0_i32_0 : i32, i32
  }
  func.func @transform_5(%arg0: i32) -> (i32, i32) {
    %c0_i32 = arith.constant 0 : i32
    %c0_i32_0 = arith.constant 0 : i32
    %c0_i32_1 = arith.constant 0 : i32
    return %c0_i32, %c0_i32_0 : i32, i32
  }
  func.func @transform_6(%arg0: i32) -> (i32, i32) {
    %c0_i32 = arith.constant 0 : i32
    %c0_i32_0 = arith.constant 0 : i32
    %c0_i32_1 = arith.constant 0 : i32
    return %c0_i32, %c0_i32_0 : i32, i32
  }
  func.func @transform_7(%arg0: i32) -> (i32, i32) {
    %c0_i32 = arith.constant 0 : i32
    %c0_i32_0 = arith.constant 0 : i32
    return %arg0, %c0_i32 : i32, i32
  }
}

module attributes {stable_mosaic.version = 11 : i64} {
  func.func @_fused_conv_seq_kernel(%arg0: i32, %arg1: memref<2x16x4xf32, #tpu.memory_space<vmem>>, %arg2: memref<3x4x256xbf16, #tpu.memory_space<vmem>>, %arg3: memref<3x256x512xbf16, #tpu.memory_space<vmem>>, %arg4: memref<3x512x32xbf16, #tpu.memory_space<vmem>>, %arg5: memref<3x256xf32, #tpu.memory_space<vmem>>, %arg6: memref<3x512xf32, #tpu.memory_space<vmem>>, %arg7: memref<3x32xf32, #tpu.memory_space<vmem>>, %arg8: memref<2x32xf32, #tpu.memory_space<vmem>>) attributes {dimension_semantics = [#tpu.dimension_semantics<parallel>], iteration_bounds = array<i64: 1>, scalar_prefetch = 0 : i64, scratch_operands = 0 : i64, tpu.core_type = #tpu.core_type<tc>, window_params = [{transform_indices = @transform_0, window_bounds = array<i64: 2, 16, 4>}, {pipeline_mode = #tpu.pipeline_mode<synchronous>, transform_indices = @transform_1, window_bounds = array<i64: 3, 4, 256>}, {pipeline_mode = #tpu.pipeline_mode<synchronous>, transform_indices = @transform_2, window_bounds = array<i64: 3, 256, 512>}, {pipeline_mode = #tpu.pipeline_mode<synchronous>, transform_indices = @transform_3, window_bounds = array<i64: 3, 512, 32>}, {pipeline_mode = #tpu.pipeline_mode<synchronous>, transform_indices = @transform_4, window_bounds = array<i64: 3, 256>}, {pipeline_mode = #tpu.pipeline_mode<synchronous>, transform_indices = @transform_5, window_bounds = array<i64: 3, 512>}, {pipeline_mode = #tpu.pipeline_mode<synchronous>, transform_indices = @transform_6, window_bounds = array<i64: 3, 32>}, {transform_indices = @transform_7, window_bounds = array<i64: 2, 32>}]} {
    %0 = tpu.iota {dimensions = array<i32: 0>} : vector<32x1xi32>
    %c16_i32 = arith.constant 16 : i32
    %c0_i32 = arith.constant 0 : i32
    %1 = arith.cmpi eq, %c16_i32, %c0_i32 : i32
    %c1_i32 = arith.constant 1 : i32
    %2 = arith.select %1, %c1_i32, %c16_i32 : i32
    %3 = vector.broadcast %2 : i32 to vector<32x1xi32>
    %4 = arith.remsi %0, %3 : vector<32x1xi32>
    %c0_i32_0 = arith.constant 0 : i32
    %5 = vector.broadcast %c0_i32_0 : i32 to vector<32x1xi32>
    %6 = arith.cmpi ne, %4, %5 : vector<32x1xi32>
    %c0_i32_1 = arith.constant 0 : i32
    %7 = vector.broadcast %c0_i32_1 : i32 to vector<32x1xi32>
    %8 = arith.cmpi slt, %4, %7 : vector<32x1xi32>
    %c0_i32_2 = arith.constant 0 : i32
    %9 = arith.cmpi slt, %2, %c0_i32_2 : i32
    %10 = vector.broadcast %9 : i1 to vector<32x1xi1>
    %11 = vector.broadcast %10 : vector<32x1xi1> to vector<32x1xi1>
    %12 = arith.xori %8, %11 : vector<32x1xi1>
    %13 = arith.andi %12, %6 : vector<32x1xi1>
    %14 = vector.broadcast %2 : i32 to vector<32x1xi32>
    %15 = arith.addi %4, %14 : vector<32x1xi32>
    %16 = arith.select %13, %15, %4 : vector<32x1xi1>, vector<32x1xi32>
    %c0_i32_3 = arith.constant 0 : i32
    %17 = vector.broadcast %c0_i32_3 : i32 to vector<32x1xi32>
    %18 = arith.cmpi eq, %16, %17 : vector<32x1xi32>
    %c15_i32 = arith.constant 15 : i32
    %19 = vector.broadcast %c15_i32 : i32 to vector<32x1xi32>
    %20 = arith.cmpi eq, %16, %19 : vector<32x1xi32>
    %c0 = arith.constant 0 : index
    %c0_4 = arith.constant 0 : index
    %c0_5 = arith.constant 0 : index
    %21 = vector.load %arg1[%c0, %c0_4, %c0_5] : memref<2x16x4xf32, #tpu.memory_space<vmem>>, vector<2x16x4xf32>
    %22 = vector.shape_cast %21 : vector<2x16x4xf32> to vector<32x4xf32>
    %c1_i32_6 = arith.constant 1 : i32
    %23 = tpu.dynamic_rotate %22 by %c1_i32_6 dim 0 : vector<32x4xf32>, i32 -> vector<32x4xf32>
    %cst = arith.constant 0.000000e+00 : f32
    %24 = vector.shape_cast %18 : vector<32x1xi1> to vector<32x1xi1>
    %25 = vector.broadcast %24 : vector<32x1xi1> to vector<32x4xi1>
    %26 = vector.broadcast %cst : f32 to vector<32x4xf32>
    %27 = arith.select %25, %26, %23 : vector<32x4xi1>, vector<32x4xf32>
    %28 = arith.truncf %27 : vector<32x4xf32> to vector<32x4xbf16>
    %c0_7 = arith.constant 0 : index
    %c0_8 = arith.constant 0 : index
    %c0_9 = arith.constant 0 : index
    %29 = vector.load %arg2[%c0_7, %c0_8, %c0_9] : memref<3x4x256xbf16, #tpu.memory_space<vmem>>, vector<1x4x256xbf16>
    %30 = vector.shape_cast %29 : vector<1x4x256xbf16> to vector<4x256xbf16>
    %cst_10 = arith.constant dense<0.000000e+00> : vector<32x256xf32>
    %31 = tpu.matmul %28, %30, %cst_10 {dimension_numbers = #tpu.dot_dimension_numbers<[1], [0], [0], [1], [0, 0, 1, 1], [], []>} : vector<32x4xbf16>, vector<4x256xbf16>, vector<32x256xf32> -> vector<32x256xf32>
    %32 = arith.truncf %22 : vector<32x4xf32> to vector<32x4xbf16>
    %c1 = arith.constant 1 : index
    %c0_11 = arith.constant 0 : index
    %c0_12 = arith.constant 0 : index
    %33 = vector.load %arg2[%c1, %c0_11, %c0_12] : memref<3x4x256xbf16, #tpu.memory_space<vmem>>, vector<1x4x256xbf16>
    %34 = vector.shape_cast %33 : vector<1x4x256xbf16> to vector<4x256xbf16>
    %cst_13 = arith.constant dense<0.000000e+00> : vector<32x256xf32>
    %35 = tpu.matmul %32, %34, %cst_13 {dimension_numbers = #tpu.dot_dimension_numbers<[1], [0], [0], [1], [0, 0, 1, 1], [], []>} : vector<32x4xbf16>, vector<4x256xbf16>, vector<32x256xf32> -> vector<32x256xf32>
    %36 = arith.addf %31, %35 : vector<32x256xf32>
    %c31_i32 = arith.constant 31 : i32
    %37 = tpu.dynamic_rotate %22 by %c31_i32 dim 0 : vector<32x4xf32>, i32 -> vector<32x4xf32>
    %cst_14 = arith.constant 0.000000e+00 : f32
    %38 = vector.shape_cast %20 : vector<32x1xi1> to vector<32x1xi1>
    %39 = vector.broadcast %38 : vector<32x1xi1> to vector<32x4xi1>
    %40 = vector.broadcast %cst_14 : f32 to vector<32x4xf32>
    %41 = arith.select %39, %40, %37 : vector<32x4xi1>, vector<32x4xf32>
    %42 = arith.truncf %41 : vector<32x4xf32> to vector<32x4xbf16>
    %c2 = arith.constant 2 : index
    %c0_15 = arith.constant 0 : index
    %c0_16 = arith.constant 0 : index
    %43 = vector.load %arg2[%c2, %c0_15, %c0_16] : memref<3x4x256xbf16, #tpu.memory_space<vmem>>, vector<1x4x256xbf16>
    %44 = vector.shape_cast %43 : vector<1x4x256xbf16> to vector<4x256xbf16>
    %cst_17 = arith.constant dense<0.000000e+00> : vector<32x256xf32>
    %45 = tpu.matmul %42, %44, %cst_17 {dimension_numbers = #tpu.dot_dimension_numbers<[1], [0], [0], [1], [0, 0, 1, 1], [], []>} : vector<32x4xbf16>, vector<4x256xbf16>, vector<32x256xf32> -> vector<32x256xf32>
    %46 = arith.addf %36, %45 : vector<32x256xf32>
    %c0_18 = arith.constant 0 : index
    %c0_19 = arith.constant 0 : index
    %47 = vector.load %arg5[%c0_18, %c0_19] : memref<3x256xf32, #tpu.memory_space<vmem>>, vector<3x256xf32>
    %48 = vector.extract_strided_slice %47 {offsets = [0, 0], sizes = [1, 256], strides = [1, 1]} : vector<3x256xf32> to vector<1x256xf32>
    %49 = vector.broadcast %48 : vector<1x256xf32> to vector<32x256xf32>
    %50 = arith.addf %46, %49 : vector<32x256xf32>
    %cst_20 = arith.constant 0.000000e+00 : f32
    %51 = vector.broadcast %cst_20 : f32 to vector<32x256xf32>
    %52 = arith.maximumf %50, %51 : vector<32x256xf32>
    %53 = vector.extract_strided_slice %47 {offsets = [1, 0], sizes = [1, 256], strides = [1, 1]} : vector<3x256xf32> to vector<1x256xf32>
    %54 = vector.broadcast %53 : vector<1x256xf32> to vector<32x256xf32>
    %55 = arith.mulf %52, %54 : vector<32x256xf32>
    %56 = vector.extract_strided_slice %47 {offsets = [2, 0], sizes = [1, 256], strides = [1, 1]} : vector<3x256xf32> to vector<1x256xf32>
    %57 = vector.broadcast %56 : vector<1x256xf32> to vector<32x256xf32>
    %58 = arith.addf %55, %57 : vector<32x256xf32>
    %c1_i32_21 = arith.constant 1 : i32
    %59 = tpu.dynamic_rotate %58 by %c1_i32_21 dim 0 : vector<32x256xf32>, i32 -> vector<32x256xf32>
    %cst_22 = arith.constant 0.000000e+00 : f32
    %60 = vector.shape_cast %18 : vector<32x1xi1> to vector<32x1xi1>
    %61 = vector.broadcast %60 : vector<32x1xi1> to vector<32x256xi1>
    %62 = vector.broadcast %cst_22 : f32 to vector<32x256xf32>
    %63 = arith.select %61, %62, %59 : vector<32x256xi1>, vector<32x256xf32>
    %64 = arith.truncf %63 : vector<32x256xf32> to vector<32x256xbf16>
    %c0_23 = arith.constant 0 : index
    %c0_24 = arith.constant 0 : index
    %c0_25 = arith.constant 0 : index
    %65 = vector.load %arg3[%c0_23, %c0_24, %c0_25] : memref<3x256x512xbf16, #tpu.memory_space<vmem>>, vector<1x256x512xbf16>
    %66 = vector.shape_cast %65 : vector<1x256x512xbf16> to vector<256x512xbf16>
    %cst_26 = arith.constant dense<0.000000e+00> : vector<32x512xf32>
    %67 = tpu.matmul %64, %66, %cst_26 {dimension_numbers = #tpu.dot_dimension_numbers<[1], [0], [0], [1], [0, 0, 1, 1], [], []>} : vector<32x256xbf16>, vector<256x512xbf16>, vector<32x512xf32> -> vector<32x512xf32>
    %68 = arith.truncf %58 : vector<32x256xf32> to vector<32x256xbf16>
    %c1_27 = arith.constant 1 : index
    %c0_28 = arith.constant 0 : index
    %c0_29 = arith.constant 0 : index
    %69 = vector.load %arg3[%c1_27, %c0_28, %c0_29] : memref<3x256x512xbf16, #tpu.memory_space<vmem>>, vector<1x256x512xbf16>
    %70 = vector.shape_cast %69 : vector<1x256x512xbf16> to vector<256x512xbf16>
    %cst_30 = arith.constant dense<0.000000e+00> : vector<32x512xf32>
    %71 = tpu.matmul %68, %70, %cst_30 {dimension_numbers = #tpu.dot_dimension_numbers<[1], [0], [0], [1], [0, 0, 1, 1], [], []>} : vector<32x256xbf16>, vector<256x512xbf16>, vector<32x512xf32> -> vector<32x512xf32>
    %72 = arith.addf %67, %71 : vector<32x512xf32>
    %c31_i32_31 = arith.constant 31 : i32
    %73 = tpu.dynamic_rotate %58 by %c31_i32_31 dim 0 : vector<32x256xf32>, i32 -> vector<32x256xf32>
    %cst_32 = arith.constant 0.000000e+00 : f32
    %74 = vector.shape_cast %20 : vector<32x1xi1> to vector<32x1xi1>
    %75 = vector.broadcast %74 : vector<32x1xi1> to vector<32x256xi1>
    %76 = vector.broadcast %cst_32 : f32 to vector<32x256xf32>
    %77 = arith.select %75, %76, %73 : vector<32x256xi1>, vector<32x256xf32>
    %78 = arith.truncf %77 : vector<32x256xf32> to vector<32x256xbf16>
    %c2_33 = arith.constant 2 : index
    %c0_34 = arith.constant 0 : index
    %c0_35 = arith.constant 0 : index
    %79 = vector.load %arg3[%c2_33, %c0_34, %c0_35] : memref<3x256x512xbf16, #tpu.memory_space<vmem>>, vector<1x256x512xbf16>
    %80 = vector.shape_cast %79 : vector<1x256x512xbf16> to vector<256x512xbf16>
    %cst_36 = arith.constant dense<0.000000e+00> : vector<32x512xf32>
    %81 = tpu.matmul %78, %80, %cst_36 {dimension_numbers = #tpu.dot_dimension_numbers<[1], [0], [0], [1], [0, 0, 1, 1], [], []>} : vector<32x256xbf16>, vector<256x512xbf16>, vector<32x512xf32> -> vector<32x512xf32>
    %82 = arith.addf %72, %81 : vector<32x512xf32>
    %c0_37 = arith.constant 0 : index
    %c0_38 = arith.constant 0 : index
    %83 = vector.load %arg6[%c0_37, %c0_38] : memref<3x512xf32, #tpu.memory_space<vmem>>, vector<3x512xf32>
    %84 = vector.extract_strided_slice %83 {offsets = [0, 0], sizes = [1, 512], strides = [1, 1]} : vector<3x512xf32> to vector<1x512xf32>
    %85 = vector.broadcast %84 : vector<1x512xf32> to vector<32x512xf32>
    %86 = arith.addf %82, %85 : vector<32x512xf32>
    %cst_39 = arith.constant 0.000000e+00 : f32
    %87 = vector.broadcast %cst_39 : f32 to vector<32x512xf32>
    %88 = arith.maximumf %86, %87 : vector<32x512xf32>
    %89 = vector.extract_strided_slice %83 {offsets = [1, 0], sizes = [1, 512], strides = [1, 1]} : vector<3x512xf32> to vector<1x512xf32>
    %90 = vector.broadcast %89 : vector<1x512xf32> to vector<32x512xf32>
    %91 = arith.mulf %88, %90 : vector<32x512xf32>
    %92 = vector.extract_strided_slice %83 {offsets = [2, 0], sizes = [1, 512], strides = [1, 1]} : vector<3x512xf32> to vector<1x512xf32>
    %93 = vector.broadcast %92 : vector<1x512xf32> to vector<32x512xf32>
    %94 = arith.addf %91, %93 : vector<32x512xf32>
    %95 = arith.truncf %94 : vector<32x512xf32> to vector<32x512xbf16>
    %c0_40 = arith.constant 0 : index
    %c0_41 = arith.constant 0 : index
    %c0_42 = arith.constant 0 : index
    %96 = vector.load %arg4[%c0_40, %c0_41, %c0_42] : memref<3x512x32xbf16, #tpu.memory_space<vmem>>, vector<1x512x32xbf16>
    %97 = vector.shape_cast %96 : vector<1x512x32xbf16> to vector<512x32xbf16>
    %cst_43 = arith.constant dense<0.000000e+00> : vector<32x32xf32>
    %98 = tpu.matmul %95, %97, %cst_43 {dimension_numbers = #tpu.dot_dimension_numbers<[1], [0], [0], [1], [0, 0, 1, 1], [], []>} : vector<32x512xbf16>, vector<512x32xbf16>, vector<32x32xf32> -> vector<32x32xf32>
    %c1_44 = arith.constant 1 : index
    %c0_45 = arith.constant 0 : index
    %c0_46 = arith.constant 0 : index
    %99 = vector.load %arg4[%c1_44, %c0_45, %c0_46] : memref<3x512x32xbf16, #tpu.memory_space<vmem>>, vector<1x512x32xbf16>
    %100 = vector.shape_cast %99 : vector<1x512x32xbf16> to vector<512x32xbf16>
    %cst_47 = arith.constant dense<0.000000e+00> : vector<32x32xf32>
    %101 = tpu.matmul %95, %100, %cst_47 {dimension_numbers = #tpu.dot_dimension_numbers<[1], [0], [0], [1], [0, 0, 1, 1], [], []>} : vector<32x512xbf16>, vector<512x32xbf16>, vector<32x32xf32> -> vector<32x32xf32>
    %c2_48 = arith.constant 2 : index
    %c0_49 = arith.constant 0 : index
    %c0_50 = arith.constant 0 : index
    %102 = vector.load %arg4[%c2_48, %c0_49, %c0_50] : memref<3x512x32xbf16, #tpu.memory_space<vmem>>, vector<1x512x32xbf16>
    %103 = vector.shape_cast %102 : vector<1x512x32xbf16> to vector<512x32xbf16>
    %cst_51 = arith.constant dense<0.000000e+00> : vector<32x32xf32>
    %104 = tpu.matmul %95, %103, %cst_51 {dimension_numbers = #tpu.dot_dimension_numbers<[1], [0], [0], [1], [0, 0, 1, 1], [], []>} : vector<32x512xbf16>, vector<512x32xbf16>, vector<32x32xf32> -> vector<32x32xf32>
    %c1_i32_52 = arith.constant 1 : i32
    %105 = tpu.dynamic_rotate %98 by %c1_i32_52 dim 0 : vector<32x32xf32>, i32 -> vector<32x32xf32>
    %cst_53 = arith.constant 0.000000e+00 : f32
    %106 = vector.shape_cast %18 : vector<32x1xi1> to vector<32x1xi1>
    %107 = vector.broadcast %106 : vector<32x1xi1> to vector<32x32xi1>
    %108 = vector.broadcast %cst_53 : f32 to vector<32x32xf32>
    %109 = arith.select %107, %108, %105 : vector<32x32xi1>, vector<32x32xf32>
    %110 = arith.addf %109, %101 : vector<32x32xf32>
    %c31_i32_54 = arith.constant 31 : i32
    %111 = tpu.dynamic_rotate %104 by %c31_i32_54 dim 0 : vector<32x32xf32>, i32 -> vector<32x32xf32>
    %cst_55 = arith.constant 0.000000e+00 : f32
    %112 = vector.shape_cast %20 : vector<32x1xi1> to vector<32x1xi1>
    %113 = vector.broadcast %112 : vector<32x1xi1> to vector<32x32xi1>
    %114 = vector.broadcast %cst_55 : f32 to vector<32x32xf32>
    %115 = arith.select %113, %114, %111 : vector<32x32xi1>, vector<32x32xf32>
    %116 = arith.addf %110, %115 : vector<32x32xf32>
    %c0_56 = arith.constant 0 : index
    %c0_57 = arith.constant 0 : index
    %117 = vector.load %arg7[%c0_56, %c0_57] : memref<3x32xf32, #tpu.memory_space<vmem>>, vector<3x32xf32>
    %118 = vector.extract_strided_slice %117 {offsets = [0, 0], sizes = [1, 32], strides = [1, 1]} : vector<3x32xf32> to vector<1x32xf32>
    %119 = vector.broadcast %118 : vector<1x32xf32> to vector<32x32xf32>
    %120 = arith.addf %116, %119 : vector<32x32xf32>
    %cst_58 = arith.constant 0.000000e+00 : f32
    %121 = vector.broadcast %cst_58 : f32 to vector<32x32xf32>
    %122 = arith.maximumf %120, %121 : vector<32x32xf32>
    %123 = vector.shape_cast %122 : vector<32x32xf32> to vector<2x16x32xf32>
    %cst_59 = arith.constant dense<0.000000e+00> : vector<2x32xf32>
    %124 = vector.multi_reduction <add>, %123, %cst_59 [1] : vector<2x16x32xf32> to vector<2x32xf32>
    %125 = vector.extract_strided_slice %117 {offsets = [1, 0], sizes = [1, 32], strides = [1, 1]} : vector<3x32xf32> to vector<1x32xf32>
    %cst_60 = arith.constant 6.250000e-02 : f32
    %126 = vector.broadcast %cst_60 : f32 to vector<1x32xf32>
    %127 = arith.mulf %125, %126 : vector<1x32xf32>
    %128 = vector.broadcast %127 : vector<1x32xf32> to vector<2x32xf32>
    %129 = arith.mulf %124, %128 : vector<2x32xf32>
    %130 = vector.extract_strided_slice %117 {offsets = [2, 0], sizes = [1, 32], strides = [1, 1]} : vector<3x32xf32> to vector<1x32xf32>
    %131 = vector.broadcast %130 : vector<1x32xf32> to vector<2x32xf32>
    %132 = arith.addf %129, %131 : vector<2x32xf32>
    %c0_61 = arith.constant 0 : index
    %c0_62 = arith.constant 0 : index
    %133 = vector.load %arg8[%c0_61, %c0_62] : memref<2x32xf32, #tpu.memory_space<vmem>>, vector<2x32xf32>
    tpu.vector_store %arg8[%c0_61, %c0_62], %132 {strides = array<i32>} : memref<2x32xf32, #tpu.memory_space<vmem>>, vector<2x32xf32>,
    return
  }
  func.func @transform_0(%arg0: i32) -> (i32, i32, i32) {
    %c0_i32 = arith.constant 0 : i32
    %c0_i32_0 = arith.constant 0 : i32
    %c0_i32_1 = arith.constant 0 : i32
    return %arg0, %c0_i32, %c0_i32_0 : i32, i32, i32
  }
  func.func @transform_1(%arg0: i32) -> (i32, i32, i32) {
    %c0_i32 = arith.constant 0 : i32
    %c0_i32_0 = arith.constant 0 : i32
    %c0_i32_1 = arith.constant 0 : i32
    %c0_i32_2 = arith.constant 0 : i32
    return %c0_i32, %c0_i32_0, %c0_i32_1 : i32, i32, i32
  }
  func.func @transform_2(%arg0: i32) -> (i32, i32, i32) {
    %c0_i32 = arith.constant 0 : i32
    %c0_i32_0 = arith.constant 0 : i32
    %c0_i32_1 = arith.constant 0 : i32
    %c0_i32_2 = arith.constant 0 : i32
    return %c0_i32, %c0_i32_0, %c0_i32_1 : i32, i32, i32
  }
  func.func @transform_3(%arg0: i32) -> (i32, i32, i32) {
    %c0_i32 = arith.constant 0 : i32
    %c0_i32_0 = arith.constant 0 : i32
    %c0_i32_1 = arith.constant 0 : i32
    %c0_i32_2 = arith.constant 0 : i32
    return %c0_i32, %c0_i32_0, %c0_i32_1 : i32, i32, i32
  }
  func.func @transform_4(%arg0: i32) -> (i32, i32) {
    %c0_i32 = arith.constant 0 : i32
    %c0_i32_0 = arith.constant 0 : i32
    %c0_i32_1 = arith.constant 0 : i32
    return %c0_i32, %c0_i32_0 : i32, i32
  }
  func.func @transform_5(%arg0: i32) -> (i32, i32) {
    %c0_i32 = arith.constant 0 : i32
    %c0_i32_0 = arith.constant 0 : i32
    %c0_i32_1 = arith.constant 0 : i32
    return %c0_i32, %c0_i32_0 : i32, i32
  }
  func.func @transform_6(%arg0: i32) -> (i32, i32) {
    %c0_i32 = arith.constant 0 : i32
    %c0_i32_0 = arith.constant 0 : i32
    %c0_i32_1 = arith.constant 0 : i32
    return %c0_i32, %c0_i32_0 : i32, i32
  }
  func.func @transform_7(%arg0: i32) -> (i32, i32) {
    %c0_i32 = arith.constant 0 : i32
    %c0_i32_0 = arith.constant 0 : i32
    return %arg0, %c0_i32 : i32, i32
  }
}

</mosaic_0001>

<bundles_post_ra>
// kernel: tpu_custom_call.1
= control target key start
LH: loop header
LB: loop body
LE: loop exit
PB: predicated region body
PF: predicated region fallthrough
CT: control target
= control target key end

     0   :  { %12 = vsyncpa [#allocation3], 0  ;;  %s6142_s0 = inlined_call_operand.vmem [shape: f32[2,16,4], index: 0, kind: input, shape index: {}]   ;;  %s6143_s1 = inlined_call_operand.vmem [shape: bf16[3,4,256], index: 1, kind: input, shape index: {}]   ;;  %s6144_s2 = inlined_call_operand.hbm [shape: bf16[3,256,512], index: 2, kind: input, shape index: {}]   ;;  %s6145_s3 = inlined_call_operand.vmem [shape: bf16[3,512,32], index: 3, kind: input, shape index: {}]   ;;  %s6146_s4 = inlined_call_operand.vmem [shape: f32[3,256], index: 4, kind: input, shape index: {}]   ;;  %s6147_s5 = inlined_call_operand.vmem [shape: f32[3,512], index: 5, kind: input, shape index: {}]   ;;  %s6148_s6 = inlined_call_operand.vmem [shape: f32[3,32], index: 6, kind: input, shape index: {}]   ;;  %s6149_s7 = inlined_call_operand.hbm [shape: f32[2,32], index: 7, kind: output, shape index: {}]  }
   0x1   :  { %13 = vsyncpa [#allocation4], 0  ;;  %s22_s26 = sshll.u32 %s6144_s2, 4  ;;  %s5038_s27 = smov [#allocation2]   ;;  %s23_s26 = int_to_ptr.hbm [resolvable:$true] %s22_s26 }
   0x2   :  { %s24_s28 = sshll.u32 %s5038_s27, 4  ;;  %s5039_s29 = smov 256   ;;  %s25_s28 = int_to_ptr.vmem [resolvable:$true] %s24_s28 }
   0x3   :  { %s5040_s30 = smov 16  }
   0x4   :  { %30 = dma.hbm_to_vmem [thread:$0]  %s23_s26, 24576, %s25_s28, [#allocation3], %s5039_s29, %s5039_s29, %s5040_s30  }
   0x5   :  { %5034 = dma.done.wait [#allocation3], 24576  }
   0x6   :  { %5035 = vsyncadd [#allocation3], 4294942720  ;;  %v3269_v0 = vld [vmem:[%s6143_s1 + $0x4] sm:$0xf]  ;;  %v44_v1 = vlaneseq  ;;  %vm148_vm0 = vcmask 1041408   ;;  %v5095_v3 = vld [vmem:[%s6142_s0 + $0x10] sm:$0xff] }
   0x7   :  { %138 = vst [vmem:[#allocation1] ss:$4 sm:$0xff] %v3269_v0  ;;  %v132_v2 = vld [vmem:[%s6143_s1] sm:$0xf]  ;;  %v5100_v4 = vld [vmem:[%s6142_s0 + $0x18] sm:$0xff]  ;;  %v5112_v7 = vld [vmem:[%s6142_s0 + $0x8] sm:$0xff] }
   0x8   :  { %v5102_v5 = vshrl.u32 %v44_v1, 7  ;;  %v5107_v6 = vld [vmem:[%s6142_s0] sm:$0xff]  ;;  %v134_v12 = vpack.c.bf16 %v5100_v4, %v5095_v3  ;;  %vm141_vm1 = vcmask 31744   ;;  %v3278_v15 = vld [vmem:[%s6143_s1 + $0x8] sm:$0xf]  ;;  %v112_v18 = vrot.slane %v5100_v4, 7 }
   0x9   :  { %v133_v13 = vpack.c.bf16 %v5112_v7, %v5107_v6  ;;  %v245_v19 = vrot.slane %v5095_v3, 1  ;;  %v109_v20 = vrot.slane %v5107_v6, 7  ;;  %v244_v21 = vrot.slane %v5112_v7, 1  ;;  %v3397_v58 = vld [vmem:[#allocation2 + $0x2e0] sm:$0xf]  ;;  %s3259_s27 = sshll.u32 %s6149_s7, 4  ;;  %s3260_s27 = int_to_ptr.hbm [resolvable:$true] %s3259_s27 }
   0xa   :  { %v46_v14 = vadd.s32 8, %v5102_v5  ;;  %v53_v16 = vand.u32 15, %v5102_v5  ;;  %vm113_vm2 = vcmp.lt.s32.totalorder %v5102_v5, 1  ;;  %vm247_vm3 = vcmp.lt.s32.totalorder %v5102_v5, 7  ;;  %v4785_v59 = vld [vmem:[#allocation2 + $0x2ec] sm:$0xf0] }
   0xb   :  { %v110_v26 = vrot.slane %v5112_v7, 7  ;;  %v243_v27 = vrot.slane %v5107_v6, 1  ;;  %v117_v29 = vsel %vm113_vm2, %v112_v18, %v109_v20  ;;  %v249_v31 = vsel %vm247_vm3, %v244_v21, %v245_v19  ;;  %v3525_v60 = vld [vmem:[#allocation2 + $0x3e0] sm:$0xf]  ;;  %v4817_v62 = vld [vmem:[#allocation2 + $0x3ec] sm:$0xf0] }
   0xc   :  { %v60_v17 = vand.u32 15, %v46_v14  ;;  %vm5139_vm4 = vcmp.eq.s32.totalorder %v53_v16, 0  ;;  %v47_v42 = vadd.s32 16, %v5102_v5  ;;  %v48_v43 = vadd.s32 24, %v5102_v5  ;;  %v4783_v63 = vld [vmem:[#allocation2 + $0x2e4] sm:$0xf] }
   0xd   :  { %v116_v32 = vsel %vm113_vm2, %v109_v20, %v110_v26  ;;  %v126_v33 = vsel %vm5139_vm4, 0.0, %v117_v29  ;;  %v250_v34 = vsel %vm247_vm3, %v243_v27, %v244_v21  ;;  %v111_v44 = vrot.slane %v5095_v3, 7  ;;  %v3399_v0 = vld [vmem:[#allocation2 + $0x2f0] sm:$0xf0]  ;;  %v4815_v3 = vld [vmem:[#allocation2 + $0x3e4] sm:$0xf]  ;;  %vm3795_vm8 = vmneg %vm5139_vm4 }
   0xe   :  { %v139_v8 = vld.sshfl [vmem:[#allocation1] sm:$0xff pattern:$0x73625140]  ;;  %v140_v9 = vld.sshfl [vmem:[#allocation1 + $0x8] sm:$0xff pattern:$0x73625140]  ;;  %v130_v40 = vpack.c.bf16 %v116_v32, %v126_v33  ;;  %v3398_v61 = vor.u32 %v4785_v59, %v3397_v58  ;;  %v3526_v1 = vor.u32 %v4817_v62, %v3525_v60 }
   0xf   :  { %v149_v10 = vsel %vm148_vm0, %v139_v8, 0  ;;  %v151_v11 = vsel %vm148_vm0, %v140_v9, 0  ;;  %192 = vst [vmem:[#allocation1] ss:$4 sm:$0xff] %v132_v2  ;;  %vm5145_vm5 = vcmp.eq.s32.totalorder %v60_v17, 15  ;;  %v67_v45 = vand.u32 15, %v47_v42 }
  0x10   :  { %4979 = vmatpush.bf16.msra.mxu2 %v149_v10  ;;  %4980 = vmatpush.bf16.msra.mxu3 %v151_v11  ;;  %v261_v35 = vsel %vm5145_vm5, 0.0, %v249_v31  ;;  %v246_v46 = vrot.slane %v5100_v4, 1  ;;  %v74_v47 = vand.u32 15, %v48_v43  ;;  %v115_v49 = vsel %vm113_vm2, %v110_v26, %v111_v44  ;;  %v3527_v4 = vld [vmem:[#allocation2 + $0x3f0] sm:$0xf0]  ;;  %vm4115_vm13 = vmneg %vm5145_vm5 }
  0x11   :  { %160 = vmatpush.bf16.msra.mxu0 %v149_v10  ;;  %179 = vmatpush.bf16.msra.mxu1 %v151_v11  ;;  %v264_v41 = vpack.c.bf16 %v261_v35, %v250_v34  ;;  %vm5169_vm6 = vcmp.eq.s32.totalorder %v67_v45, 0  ;;  %v114_v52 = vsel %vm113_vm2, %v111_v44, %v112_v18  ;;  %v3402_v2 = vor.u32 %v4783_v63, %v3399_v0  ;;  %v3381_v6 = vld [vmem:[#allocation2 + $0x2c0] sm:$0xf]  ;;  %v4781_v8 = vld [vmem:[#allocation2 + $0x2cc] sm:$0xf0] }
  0x12   :  { %vm5175_vm7 = vcmp.eq.s32.totalorder %v74_v47, 15  ;;  %v251_v51 = vsel %vm247_vm3, %v246_v46, %v243_v27  ;;  %v128_v53 = vsel %vm5169_vm6, 0.0, %v115_v49  ;;  %v248_v54 = vsel %vm247_vm3, %v245_v19, %v246_v46  ;;  %v3509_v9 = vld [vmem:[#allocation2 + $0x3c0] sm:$0xf]  ;;  %v4813_v10 = vld [vmem:[#allocation2 + $0x3cc] sm:$0xf0]  ;;  %vm3799_vm11 = vmneg %vm5169_vm6 }
  0x13   :  { %3271 = vmatmul.msk.bf16.vlgmr.msra.gmra.mxu2 %vm141_vm1, %v134_v12  ;;  %3273 = vmatmul.msk.bf16.vlgmr.msra.gmra.mxu3 %vm141_vm1, %v134_v12  ;;  %v263_v55 = vsel %vm5175_vm7, 0.0, %v251_v51  ;;  %v131_v56 = vpack.c.bf16 %v114_v52, %v128_v53  ;;  %v3530_v7 = vor.u32 %v4815_v3, %v3527_v4  ;;  %v3382_v11 = vor.u32 %v4781_v8, %v3381_v6  ;;  %v3383_v14 = vld [vmem:[#allocation2 + $0x2d0] sm:$0xf0]  ;;  %v3365_v19 = vld [vmem:[#allocation2 + $0x2a0] sm:$0xf]  ;;  %vm4119_vm15 = vmneg %vm5175_vm7 }
  0x14   :  { %3270 = vmatmul.msk.bf16.vlgmr.msra.gmra.mxu0 %vm141_vm1, %v133_v13  ;;  %3272 = vmatmul.msk.bf16.vlgmr.msra.gmra.mxu1 %vm141_vm1, %v133_v13  ;;  %v265_v57 = vpack.c.bf16 %v263_v55, %v248_v54  ;;  %v3510_v12 = vor.u32 %v4813_v10, %v3509_v9  ;;  %v4779_v13 = vld [vmem:[#allocation2 + $0x2c4] sm:$0xf]  ;;  %v3511_v17 = vld [vmem:[#allocation2 + $0x3d0] sm:$0xf0]  ;;  %v4777_v20 = vld [vmem:[#allocation2 + $0x2ac] sm:$0xf0] }
  0x15   :  { %v3386_v16 = vor.u32 %v4779_v13, %v3383_v14  ;;  %v3493_v21 = vld [vmem:[#allocation2 + $0x3a0] sm:$0xf]  ;;  %v4807_v29 = vld [vmem:[#allocation2 + $0x3a4] sm:$0xf]  ;;  %v3495_v31 = vld [vmem:[#allocation2 + $0x3b0] sm:$0xf0] }
  0x16   :  { %v193_v22 = vld.sshfl [vmem:[#allocation1] sm:$0xff pattern:$0x73625140]  ;;  %v194_v23 = vld.sshfl [vmem:[#allocation1 + $0x8] sm:$0xff pattern:$0x73625140]  ;;  %v3498_v32 = vor.u32 %v4807_v29, %v3495_v31 }
  0x17   :  { %v201_v24 = vsel %vm148_vm0, %v193_v22, 0  ;;  %v203_v25 = vsel %vm148_vm0, %v194_v23, 0  ;;  %269 = vst [vmem:[#allocation1] ss:$4 sm:$0xff] %v3278_v15  ;;  %v4811_v15 = vld [vmem:[#allocation2 + $0x3c4] sm:$0xf]  ;;  %v3366_v22 = vor.u32 %v4777_v20, %v3365_v19 }
  0x18   :  { %212 = vmatpush.bf16.msrb.mxu2 %v201_v24  ;;  %231 = vmatpush.bf16.msrb.mxu3 %v203_v25  ;;  %v3514_v18 = vor.u32 %v4811_v15, %v3511_v17  ;;  %v4809_v23 = vld [vmem:[#allocation2 + $0x3ac] sm:$0xf0]  ;;  %v4775_v24 = vld [vmem:[#allocation2 + $0x2a4] sm:$0xf]  ;;  %v3367_v25 = vld [vmem:[#allocation2 + $0x2b0] sm:$0xf0] }
  0x19   :  { %v3494_v26 = vor.u32 %v4809_v23, %v3493_v21  ;;  %v3370_v27 = vor.u32 %v4775_v24, %v3367_v25  ;;  %v3349_v33 = vld [vmem:[#allocation2 + $0x280] sm:$0xf]  ;;  %v4773_v34 = vld [vmem:[#allocation2 + $0x28c] sm:$0xf0]  ;;  %v3479_v43 = vld [vmem:[#allocation2 + $0x390] sm:$0xf0] }
  0x1a   :  { %v3350_v35 = vor.u32 %v4773_v34, %v3349_v33  ;;  %v3333_v45 = vld [vmem:[#allocation2 + $0x260] sm:$0xf]  ;;  %v4769_v46 = vld [vmem:[#allocation2 + $0x26c] sm:$0xf0]  ;;  %v4767_v52 = vld [vmem:[#allocation2 + $0x264] sm:$0xf] }
  0x1b   :  { %v3334_v47 = vor.u32 %v4769_v46, %v3333_v45  ;;  %v3461_v49 = vld [vmem:[#allocation2 + $0x360] sm:$0xf]  ;;  %v4801_v51 = vld [vmem:[#allocation2 + $0x36c] sm:$0xf0]  ;;  %v3335_v53 = vld [vmem:[#allocation2 + $0x270] sm:$0xf0] }
  0x1c   :  { %861 = vmatpush.bf16.msra.mxu2 %v3398_v61  ;;  %880 = vmatpush.bf16.msra.mxu3 %v3526_v1  ;;  %v3462_v54 = vor.u32 %v4801_v51, %v3461_v49  ;;  %v3338_v55 = vor.u32 %v4767_v52, %v3335_v53  ;;  %v3317_v59 = vld [vmem:[#allocation2 + $0x240] sm:$0xf]  ;;  %v4765_v60 = vld [vmem:[#allocation2 + $0x24c] sm:$0xf0]  ;;  %v3319_v4 = vld [vmem:[#allocation2 + $0x250] sm:$0xf0] }
  0x1d   :  { %v3318_v63 = vor.u32 %v4765_v60, %v3317_v59  ;;  %v3445_v0 = vld [vmem:[#allocation2 + $0x340] sm:$0xf]  ;;  %v4797_v1 = vld [vmem:[#allocation2 + $0x34c] sm:$0xf0]  ;;  %v4795_v6 = vld [vmem:[#allocation2 + $0x344] sm:$0xf] }
  0x1e   :  { %v270_v36 = vld.sshfl [vmem:[#allocation1] sm:$0xff pattern:$0x73625140]  ;;  %v271_v37 = vld.sshfl [vmem:[#allocation1 + $0x8] sm:$0xff pattern:$0x73625140]  ;;  %v3446_v3 = vor.u32 %v4797_v1, %v3445_v0 }
  0x1f   :  { %v278_v38 = vsel %vm148_vm0, %v270_v36, 0  ;;  %v280_v39 = vsel %vm148_vm0, %v271_v37, 0  ;;  %v3477_v36 = vld [vmem:[#allocation2 + $0x380] sm:$0xf]  ;;  %v4805_v37 = vld [vmem:[#allocation2 + $0x38c] sm:$0xf0] }
  0x20   :  { %289 = vmatpush.bf16.msrb.mxu0 %v278_v38  ;;  %308 = vmatpush.bf16.msrb.mxu1 %v280_v39  ;;  %v4771_v38 = vld [vmem:[#allocation2 + $0x284] sm:$0xf]  ;;  %v3478_v39 = vor.u32 %v4805_v37, %v3477_v36  ;;  %v3301_v10 = vld [vmem:[#allocation2 + $0x220] sm:$0xf]  ;;  %v4793_v14 = vld [vmem:[#allocation2 + $0x32c] sm:$0xf0] }
  0x21   :  { %862 = vmatpush.bf16.msra.mxu2 %v3382_v11  ;;  %881 = vmatpush.bf16.msra.mxu3 %v3510_v12  ;;  %v4761_v11 = vld [vmem:[#allocation2 + $0x22c] sm:$0xf0]  ;;  %v3429_v12 = vld [vmem:[#allocation2 + $0x320] sm:$0xf]  ;;  %v4759_v15 = vld [vmem:[#allocation2 + $0x224] sm:$0xf] }
  0x22   :  { %v3302_v13 = vor.u32 %v4761_v11, %v3301_v10  ;;  %v3430_v19 = vor.u32 %v4793_v14, %v3429_v12  ;;  %v4791_v21 = vld [vmem:[#allocation2 + $0x324] sm:$0xf]  ;;  %v3285_v24 = vld [vmem:[#allocation2 + $0x200] sm:$0xf]  ;;  %v4757_v25 = vld [vmem:[#allocation2 + $0x20c] sm:$0xf0] }
  0x23   :  { %3274 = vmatmul.msk.bf16.vlgmr.msrb.gmra.mxu2 %vm141_vm1, %v130_v40  ;;  %3276 = vmatmul.msk.bf16.vlgmr.msrb.gmra.mxu3 %vm141_vm1, %v130_v40  ;;  %v3351_v40 = vld [vmem:[#allocation2 + $0x290] sm:$0xf0]  ;;  %v3286_v31 = vor.u32 %v4757_v25, %v3285_v24  ;;  %v4755_v33 = vld [vmem:[#allocation2 + $0x204] sm:$0xf]  ;;  %v3533_v45 = vld [vmem:[#allocation2 + $0x3e8] sm:$0xf] }
  0x24   :  { %3279 = vmatmul.msk.bf16.vlgmr.msrb.gmra.mxu0 %vm141_vm1, %v264_v41  ;;  %3281 = vmatmul.msk.bf16.vlgmr.msrb.gmra.mxu1 %vm141_vm1, %v264_v41  ;;  %v4803_v41 = vld [vmem:[#allocation2 + $0x384] sm:$0xf]  ;;  %v3354_v42 = vor.u32 %v4771_v38, %v3351_v40  ;;  %v3287_v34 = vld [vmem:[#allocation2 + $0x210] sm:$0xf0]  ;;  %v5208_v40 = vld [vmem:[%s6146_s4] sm:$0x77] }
  0x25   :  { %899 = vmatpush.bf16.msra.mxu0 %v3402_v2  ;;  %918 = vmatpush.bf16.msra.mxu1 %v3530_v7  ;;  %v3482_v44 = vor.u32 %v4803_v41, %v3479_v43  ;;  %v4763_v2 = vld [vmem:[#allocation2 + $0x244] sm:$0xf]  ;;  %v3447_v7 = vld [vmem:[#allocation2 + $0x350] sm:$0xf0]  ;;  %v3290_v36 = vor.u32 %v4755_v33, %v3287_v34  ;;  %v3405_v43 = vld [vmem:[#allocation2 + $0x2e8] sm:$0xf] }
  0x26   :  { %863 = vmatpush.bf16.msra.mxu2 %v3366_v22  ;;  %882 = vmatpush.bf16.msra.mxu3 %v3494_v26  ;;  %v3322_v8 = vor.u32 %v4763_v2, %v3319_v4  ;;  %v3450_v9 = vor.u32 %v4795_v6, %v3447_v7  ;;  %v3431_v22 = vld [vmem:[#allocation2 + $0x330] sm:$0xf0]  ;;  %v3413_v26 = vld [vmem:[#allocation2 + $0x300] sm:$0xf]  ;;  %v4787_v37 = vld [vmem:[#allocation2 + $0x304] sm:$0xf] }
  0x27   :  { %v3434_v23 = vor.u32 %v4791_v21, %v3431_v22  ;;  %v3415_v38 = vld [vmem:[#allocation2 + $0x310] sm:$0xf0]  ;;  %v4784_v49 = vld [vmem:[#allocation2 + $0x2ec] sm:$0xf]  ;;  %v3407_v51 = vld [vmem:[#allocation2 + $0x2f8] sm:$0xf0] }
  0x28   :  { %v3410_v53 = vor.u32 %v4784_v49, %v3407_v51  ;;  %v3389_v59 = vld [vmem:[#allocation2 + $0x2c8] sm:$0xf]  ;;  %v4782_v60 = vld [vmem:[#allocation2 + $0x2d4] sm:$0xf0]  ;;  %v3391_v4 = vld [vmem:[#allocation2 + $0x2d8] sm:$0xf0] }
  0x29   :  { %900 = vmatpush.bf16.msra.mxu0 %v3386_v16  ;;  %919 = vmatpush.bf16.msra.mxu1 %v3514_v18  ;;  %v3303_v16 = vld [vmem:[#allocation2 + $0x230] sm:$0xf0]  ;;  %v3390_v1 = vor.u32 %v4782_v60, %v3389_v59  ;;  %v4814_v2 = vld [vmem:[#allocation2 + $0x3d4] sm:$0xf0]  ;;  %v331_v11 = vperm.slane %v5208_v40, 4  ;;  %v367_v60 = vperm.slane %v5208_v40, 6 }
  0x2a   :  { %864 = vmatpush.bf16.msra.mxu2 %v3350_v35  ;;  %883 = vmatpush.bf16.msra.mxu3 %v3478_v39  ;;  %v3306_v20 = vor.u32 %v4759_v15, %v3303_v16  ;;  %v3418_v39 = vor.u32 %v4787_v37, %v3415_v38  ;;  %v3373_v15 = vld [vmem:[#allocation2 + $0x2a8] sm:$0xf]  ;;  %v4778_v16 = vld [vmem:[#allocation2 + $0x2b4] sm:$0xf0]  ;;  %v4776_v24 = vld [vmem:[#allocation2 + $0x2ac] sm:$0xf] }
  0x2b   :  { %v3374_v22 = vor.u32 %v4778_v16, %v3373_v15  ;;  %v3375_v25 = vld [vmem:[#allocation2 + $0x2b8] sm:$0xf0]  ;;  %v4808_v33 = vld [vmem:[#allocation2 + $0x3ac] sm:$0xf]  ;;  %v353_v37 = vperm.slane %v5208_v40, 5  ;;  %vm5041_vm9 = vmmov 1  }
  0x2c   :  { %v3503_v34 = vld [vmem:[#allocation2 + $0x3b8] sm:$0xf0]  ;;  %v4774_v38 = vld [vmem:[#allocation2 + $0x294] sm:$0xf0]  ;;  %v4772_v49 = vld [vmem:[#allocation2 + $0x28c] sm:$0xf] }
  0x2d   :  { %901 = vmatpush.bf16.msra.mxu0 %v3370_v27  ;;  %920 = vmatpush.bf16.msra.mxu1 %v3498_v32  ;;  %v4789_v32 = vld [vmem:[#allocation2 + $0x30c] sm:$0xf0]  ;;  %v3359_v51 = vld [vmem:[#allocation2 + $0x298] sm:$0xf0]  ;;  %v5228_v59 = vperm.slane %v353_v37, 1  ;;  %vm5395_vm10 = vmpackc.low %vm5041_vm9, %vm3795_vm8 }
  0x2e   :  { %865 = vmatpush.bf16.msra.mxu2 %v3334_v47  ;;  %884 = vmatpush.bf16.msra.mxu3 %v3462_v54  ;;  %v3414_v35 = vor.u32 %v4789_v32, %v3413_v26  ;;  %v4818_v47 = vld [vmem:[#allocation2 + $0x3f4] sm:$0xf0]  ;;  %v4816_v54 = vld [vmem:[#allocation2 + $0x3ec] sm:$0xf]  ;;  %v352_v26 = vperm.slane %v5208_v40, 1  ;;  %v3378_v32 = vor.u32 %v4776_v24, %v3375_v25  ;;  %vm5432_vm12 = vmpackc.low %vm5041_vm9, %vm3799_vm11 }
  0x2f   :  { %v3534_v52 = vor.u32 %v4818_v47, %v3533_v45  ;;  %v4806_v47 = vld [vmem:[#allocation2 + $0x394] sm:$0xf0]  ;;  %v4800_v16 = vld [vmem:[#allocation2 + $0x36c] sm:$0xf]  ;;  %v3453_v24 = vld [vmem:[#allocation2 + $0x348] sm:$0xf] }
  0x30   :  { %v4798_v25 = vld [vmem:[#allocation2 + $0x354] sm:$0xf0]  ;;  %vm5490_vm14 = vmpackc.low %vm4115_vm13, %vm5041_vm9 }
  0x31   :  { %902 = vmatpush.bf16.msra.mxu0 %v3354_v42  ;;  %921 = vmatpush.bf16.msra.mxu1 %v3482_v44  ;;  %v4786_v44 = vld [vmem:[#allocation2 + $0x2f4] sm:$0xf0]  ;;  %vm5519_vm0 = vmpackc.low %vm4119_vm15, %vm5041_vm9 }
  0x32   :  { %866 = vmatpush.bf16.msra.mxu2 %v3318_v63  ;;  %885 = vmatpush.bf16.msra.mxu3 %v3446_v3  ;;  %v3406_v46 = vor.u32 %v4786_v44, %v3405_v43  ;;  %v3517_v63 = vld [vmem:[#allocation2 + $0x3c8] sm:$0xf]  ;;  %v4780_v3 = vld [vmem:[#allocation2 + $0x2cc] sm:$0xf] }
  0x33   :  { %3275 = vmatmul.msk.bf16.gmra.mxu2 %vm141_vm1, %v131_v56  ;;  %3277 = vmatmul.msk.bf16.gmra.mxu3 %vm141_vm1, %v131_v56  ;;  %v4799_v56 = vld [vmem:[#allocation2 + $0x364] sm:$0xf]  ;;  %v3518_v6 = vor.u32 %v4814_v2, %v3517_v63  ;;  %v3394_v7 = vor.u32 %v4780_v3, %v3391_v4  ;;  %v3341_v3 = vld [vmem:[#allocation2 + $0x268] sm:$0xf]  ;;  %v4770_v4 = vld [vmem:[#allocation2 + $0x274] sm:$0xf0] }
  0x34   :  { %3280 = vmatmul.msk.bf16.gmra.mxu0 %vm141_vm1, %v265_v57  ;;  %3282 = vmatmul.msk.bf16.gmra.mxu1 %vm141_vm1, %v265_v57  ;;  %v3463_v57 = vld [vmem:[#allocation2 + $0x370] sm:$0xf0]  ;;  %vm3218_vm1 = vcmask 261120  }
  0x35   :  { %v3466_v58 = vor.u32 %v4799_v56, %v3463_v57  ;;  %903 = vmatpush.bf16.msra.mxu0 %v3338_v55  ;;  %v3535_v55 = vld [vmem:[#allocation2 + $0x3f8] sm:$0xf0]  ;;  %v330_v57 = vperm.slane %v5208_v40, 0 }
  0x36   :  { %867 = vmatpush.bf16.msra.mxu2 %v3302_v13  ;;  %886 = vmatpush.bf16.msra.mxu3 %v3430_v19  ;;  %v3501_v19 = vld [vmem:[#allocation2 + $0x3a8] sm:$0xf] }
  0x37   :  { %922 = vmatpush.bf16.msra.mxu1 %v3466_v58  ;;  %v3538_v58 = vor.u32 %v4816_v54, %v3535_v55  ;;  %v5215_v10 = vperm.slane %v330_v57, 0  ;;  %v3362_v55 = vor.u32 %v4772_v49, %v3359_v51  ;;  %v3487_v57 = vld [vmem:[#allocation2 + $0x398] sm:$0xf0]  ;;  %v4794_v51 = vld [vmem:[#allocation2 + $0x334] sm:$0xf0] }
  0x39   :  { %904 = vmatpush.bf16.msra.mxu0 %v3322_v8  ;;  %v4812_v8 = vld [vmem:[#allocation2 + $0x3cc] sm:$0xf] }
  0x3a   :  { %868 = vmatpush.bf16.msra.mxu2 %v3286_v31  ;;  %887 = vmatpush.bf16.msra.mxu3 %v3414_v35 }
  0x3b   :  { %923 = vmatpush.bf16.msra.mxu1 %v3450_v9  ;;  %v3519_v9 = vld [vmem:[#allocation2 + $0x3d8] sm:$0xf0] }
  0x3c   :  { %v3522_v12 = vor.u32 %v4812_v8, %v3519_v9 }
  0x3d   :  { %905 = vmatpush.bf16.msra.mxu0 %v3306_v20 }
  0x3e   :  { %937 = vmatpush.bf16.msrb.mxu2 %v3406_v46  ;;  %956 = vmatpush.bf16.msrb.mxu3 %v3534_v52  ;;  %v5225_v52 = vperm.slane %v352_v26, 1 }
  0x3f   :  { %924 = vmatpush.bf16.msra.mxu1 %v3434_v23  ;;  %v4810_v23 = vld [vmem:[#allocation2 + $0x3b4] sm:$0xf0] }
  0x40   :  { %v3502_v31 = vor.u32 %v4810_v23, %v3501_v19  ;;  %v3471_v19 = vld [vmem:[#allocation2 + $0x378] sm:$0xf0]  ;;  %v4766_v23 = vld [vmem:[#allocation2 + $0x254] sm:$0xf0] }
  0x41   :  { %906 = vmatpush.bf16.msra.mxu0 %v3290_v36  ;;  %v5221_v36 = vperm.slane %v331_v11, 0  ;;  %v4802_v11 = vld [vmem:[#allocation2 + $0x374] sm:$0xf0] }
  0x42   :  { %938 = vmatpush.bf16.msrb.mxu2 %v3390_v1  ;;  %957 = vmatpush.bf16.msrb.mxu3 %v3518_v6  ;;  %v3469_v6 = vld [vmem:[#allocation2 + $0x368] sm:$0xf] }
  0x43   :  { %925 = vmatpush.bf16.msra.mxu1 %v3418_v39  ;;  %v3485_v39 = vld [vmem:[#allocation2 + $0x388] sm:$0xf] }
  0x44   :  { %v3486_v54 = vor.u32 %v4806_v47, %v3485_v39  ;;  %v3437_v47 = vld [vmem:[#allocation2 + $0x328] sm:$0xf] }
  0x45   :  { %975 = vmatpush.bf16.msrb.mxu0 %v3410_v53  ;;  %v366_v53 = vperm.slane %v5208_v40, 2  ;;  %v3343_v40 = vld [vmem:[#allocation2 + $0x278] sm:$0xf0] }
  0x46   :  { %939 = vmatpush.bf16.msrb.mxu2 %v3374_v22  ;;  %958 = vmatpush.bf16.msrb.mxu3 %v3502_v31  ;;  %v4764_v31 = vld [vmem:[#allocation2 + $0x24c] sm:$0xf] }
  0x47   :  { %994 = vmatpush.bf16.msrb.mxu1 %v3538_v58 }
  0x49   :  { %976 = vmatpush.bf16.msrb.mxu0 %v3394_v7 }
  0x4a   :  { %959 = vmatpush.bf16.msrb.mxu3 %v3486_v54  ;;  %v4760_v54 = vld [vmem:[#allocation2 + $0x22c] sm:$0xf] }
  0x4b   :  { %995 = vmatpush.bf16.msrb.mxu1 %v3522_v12  ;;  %v4768_v12 = vld [vmem:[#allocation2 + $0x26c] sm:$0xf] }
  0x4c   :  { %v3346_v15 = vor.u32 %v4768_v12, %v3343_v40 }
  0x4d   :  { %977 = vmatpush.bf16.msrb.mxu0 %v3378_v32  ;;  %v3327_v32 = vld [vmem:[#allocation2 + $0x258] sm:$0xf0] }
  0x51   :  { %978 = vmatpush.bf16.msrb.mxu0 %v3362_v55 }
  0x55   :  { %979 = vmatpush.bf16.msrb.mxu0 %v3346_v15  ;;  %v4790_v15 = vld [vmem:[#allocation2 + $0x314] sm:$0xf0] }
  0x91   :  { %v5193_v61 = vpop.f32.mrf.mxu0  ;;  %v5195_v62 = vpop.f32.mrf.mxu1 }
  0x96   :  { %v5197_v17 = vpop.f32.mrf.mxu2  ;;  %v5199_v18 = vpop.f32.mrf.mxu3 }
  0x99   :  { %v5201_v27 = vpop.f32.mrf.mxu0  ;;  %v5203_v29 = vpop.f32.mrf.mxu1 }
  0x9e   :  { %v5210_v41 = vpop.f32.mrf.mxu2  ;;  %v5212_v42 = vpop.f32.mrf.mxu3 }
  0xa1   :  { %v291_v56 = vpop.f32.mrf.mxu0  ;;  %v310_v0 = vpop.f32.mrf.mxu1 }
  0xa6   :  { %v214_v13 = vpop.f32.mrf.mxu2  ;;  %v233_v14 = vpop.f32.mrf.mxu3 }
  0xa7   :  { %v215_v20 = vadd.f32 %v214_v13, %v5193_v61  ;;  %v234_v21 = vadd.f32 %v233_v14, %v5195_v62  ;;  %v3506_v61 = vor.u32 %v4808_v33, %v3503_v34  ;;  %v3357_v62 = vld [vmem:[#allocation2 + $0x288] sm:$0xf]  ;;  %v3342_v13 = vor.u32 %v4770_v4, %v3341_v3  ;;  %v4796_v33 = vld [vmem:[#allocation2 + $0x34c] sm:$0xf] }
  0xa8   :  { %v3358_v46 = vor.u32 %v4774_v38, %v3357_v62  ;;  %v3470_v14 = vor.u32 %v4802_v11, %v3469_v6  ;;  %v3455_v62 = vld [vmem:[#allocation2 + $0x358] sm:$0xf0]  ;;  %v3421_v11 = vld [vmem:[#allocation2 + $0x308] sm:$0xf] }
  0xa9   :  { %v320_v35 = vadd.f32 %v291_v56, %v215_v20  ;;  %v321_v44 = vadd.f32 %v310_v0, %v234_v21  ;;  %v293_v45 = vpop.f32.mrf.mxu0  ;;  %996 = vmatpush.bf16.msrb.mxu1 %v3506_v61  ;;  %v4804_v56 = vld [vmem:[#allocation2 + $0x38c] sm:$0xf]  ;;  %v312_v63 = vpop.f32.mrf.mxu1  ;;  %v3325_v20 = vld [vmem:[#allocation2 + $0x248] sm:$0xf]  ;;  %v5237_v61 = vperm.slane %v367_v60, 2 }
  0xaa   :  { %940 = vmatpush.bf16.msrb.mxu2 %v3358_v46  ;;  %v3490_v0 = vor.u32 %v4804_v56, %v3487_v57  ;;  %960 = vmatpush.bf16.msrb.mxu3 %v3470_v14  ;;  %v3326_v26 = vor.u32 %v4766_v23, %v3325_v20  ;;  %v4762_v46 = vld [vmem:[#allocation2 + $0x234] sm:$0xf0] }
  0xab   :  { %v336_v43 = vadd.f32 %v5215_v10, %v320_v35  ;;  %v337_v7 = vadd.f32 %v5221_v36, %v321_v44  ;;  %v5235_v35 = vperm.slane %v366_v53, 2  ;;  %v3458_v44 = vor.u32 %v4796_v33, %v3455_v62  ;;  %v3311_v53 = vld [vmem:[#allocation2 + $0x238] sm:$0xf0] }
  0xad   :  { %v344_v58 = vmax.f32 %v336_v43, 0.0  ;;  %997 = vmatpush.bf16.msrb.mxu1 %v3490_v0  ;;  %v345_v37 = vmax.f32 %v337_v7, 0.0  ;;  %v3330_v43 = vor.u32 %v4764_v31, %v3327_v32  ;;  %v4792_v0 = vld [vmem:[#allocation2 + $0x32c] sm:$0xf]  ;;  %v3314_v7 = vor.u32 %v4760_v54, %v3311_v53 }
  0xae   :  { %v216_v1 = vpop.f32.mrf.mxu2  ;;  %v235_v2 = vpop.f32.mrf.mxu3  ;;  %941 = vmatpush.bf16.msrb.mxu2 %v3342_v13 }
  0xaf   :  { %v217_v8 = vadd.f32 %v216_v1, %v5201_v27  ;;  %v236_v9 = vadd.f32 %v235_v2, %v5203_v29  ;;  %v3474_v27 = vor.u32 %v4800_v16, %v3471_v19  ;;  %v3454_v29 = vor.u32 %v4798_v25, %v3453_v24  ;;  %v3439_v1 = vld [vmem:[#allocation2 + $0x338] sm:$0xf0]  ;;  %980 = vmatpush.bf16.msrb.mxu0 %v3330_v43  ;;  %v4756_v16 = vld [vmem:[#allocation2 + $0x20c] sm:$0xf] }
  0xb0   :  { %v358_v34 = vmul.f32 %v5225_v52, %v344_v58  ;;  %v359_v2 = vmul.f32 %v5228_v59, %v345_v37  ;;  %v3442_v14 = vor.u32 %v4792_v0, %v3439_v1  ;;  %v3422_v25 = vor.u32 %v4790_v15, %v3421_v11  ;;  %v4751_v1 = vld [vmem:[#allocation2 + $0x1e4] sm:$0xf]  ;;  %v4749_v11 = vld [vmem:[#allocation2 + $0x1cc] sm:$0xf0]  ;;  %v3639_v15 = vld [vmem:[#allocation2 + $0xd0] sm:$0xf0] }
  0xb1   :  { %v322_v21 = vadd.f32 %v293_v45, %v217_v8  ;;  %v323_v22 = vadd.f32 %v312_v63, %v236_v9  ;;  %998 = vmatpush.bf16.msrb.mxu1 %v3474_v27  ;;  %v3309_v45 = vld [vmem:[#allocation2 + $0x228] sm:$0xf]  ;;  %v296_v49 = vpop.f32.mrf.mxu0  ;;  %961 = vmatpush.bf16.msrb.mxu3 %v3454_v29  ;;  %v3438_v63 = vor.u32 %v4794_v51, %v3437_v47  ;;  %v315_v3 = vpop.f32.mrf.mxu1  ;;  %v4758_v9 = vld [vmem:[#allocation2 + $0x214] sm:$0xf0]  ;;  %v3781_v47 = vld [vmem:[#allocation2 + $0x1e0] sm:$0xf] }
  0xb2   :  { %942 = vmatpush.bf16.msrb.mxu2 %v3326_v26  ;;  %v3310_v60 = vor.u32 %v4762_v46, %v3309_v45  ;;  %v3293_v8 = vld [vmem:[#allocation2 + $0x208] sm:$0xf]  ;;  %v5245_v12 = vadd.f32 %v5235_v35, %v358_v34  ;;  %v5256_v27 = vadd.f32 %v5237_v61, %v359_v2  ;;  %v3653_v45 = vld [vmem:[#allocation2 + $0xe0] sm:$0xf]  ;;  %v4721_v46 = vld [vmem:[#allocation2 + $0xec] sm:$0xf0] }
  0xb3   :  { %v338_v38 = vadd.f32 %v5215_v10, %v322_v21  ;;  %v339_v39 = vadd.f32 %v5221_v36, %v323_v22  ;;  %v3294_v20 = vor.u32 %v4758_v9, %v3293_v8  ;;  %v4788_v21 = vld [vmem:[#allocation2 + $0x30c] sm:$0xf]  ;;  %v3423_v22 = vld [vmem:[#allocation2 + $0x318] sm:$0xf0]  ;;  %981 = vmatpush.bf16.msrb.mxu0 %v3314_v7  ;;  %v3783_v2 = vld [vmem:[#allocation2 + $0x1f0] sm:$0xf0] }
  0xb4   :  { %v1485_v31 = vrot.slane %v5245_v12, 1  ;;  %v3426_v34 = vor.u32 %v4788_v21, %v3423_v22  ;;  %v4717_v8 = vld [vmem:[#allocation2 + $0xcc] sm:$0xf0]  ;;  %v3765_v9 = vld [vmem:[#allocation2 + $0x1c0] sm:$0xf] }
  0xb5   :  { %v346_v55 = vmax.f32 %v338_v38, 0.0  ;;  %v347_v56 = vmax.f32 %v339_v39, 0.0  ;;  %999 = vmatpush.bf16.msrb.mxu1 %v3458_v44  ;;  %962 = vmatpush.bf16.msrb.mxu3 %v3438_v63  ;;  %v3654_v63 = vor.u32 %v4721_v46, %v3653_v45  ;;  %v3767_v21 = vld [vmem:[#allocation2 + $0x1d0] sm:$0xf0]  ;;  %v3621_v22 = vld [vmem:[#allocation2 + $0xa0] sm:$0xf] }
  0xb6   :  { %v219_v57 = vpop.f32.mrf.mxu2  ;;  %v238_v58 = vpop.f32.mrf.mxu3  ;;  %943 = vmatpush.bf16.msrb.mxu2 %v3310_v60  ;;  %v4711_v45 = vld [vmem:[#allocation2 + $0xa4] sm:$0xf]  ;;  %v3623_v46 = vld [vmem:[#allocation2 + $0xb0] sm:$0xf0] }
  0xb7   :  { %v220_v4 = vadd.f32 %v219_v57, %v5197_v17  ;;  %v239_v6 = vadd.f32 %v238_v58, %v5199_v18  ;;  %v360_v40 = vmul.f32 %v5225_v52, %v346_v55  ;;  %v361_v13 = vmul.f32 %v5228_v59, %v347_v56  ;;  %v3295_v18 = vld [vmem:[#allocation2 + $0x218] sm:$0xf0]  ;;  %v4753_v55 = vld [vmem:[#allocation2 + $0x1ec] sm:$0xf0]  ;;  %v4719_v56 = vld [vmem:[#allocation2 + $0xe4] sm:$0xf] }
  0xb8   :  { %v3298_v33 = vor.u32 %v4756_v16, %v3295_v18  ;;  %v3655_v57 = vld [vmem:[#allocation2 + $0xf0] sm:$0xf0]  ;;  %v3782_v0 = vor.u32 %v4753_v55, %v3781_v47  ;;  %v4747_v16 = vld [vmem:[#allocation2 + $0x1c4] sm:$0xf] }
  0xb9   :  { %v324_v19 = vadd.f32 %v296_v49, %v220_v4  ;;  %v325_v17 = vadd.f32 %v315_v3, %v239_v6  ;;  %v5250_v23 = vadd.f32 %v5235_v35, %v360_v40  ;;  %v5253_v24 = vadd.f32 %v5237_v61, %v361_v13  ;;  %1000 = vmatpush.bf16.msrb.mxu1 %v3442_v14  ;;  %v298_v58 = vpop.f32.mrf.mxu0  ;;  %v3637_v3 = vld [vmem:[#allocation2 + $0xc0] sm:$0xf]  ;;  %v317_v6 = vpop.f32.mrf.mxu1  ;;  %v4715_v14 = vld [vmem:[#allocation2 + $0xc4] sm:$0xf] }
  0xba   :  { %944 = vmatpush.bf16.msrb.mxu2 %v3294_v20  ;;  %963 = vmatpush.bf16.msrb.mxu3 %v3422_v25  ;;  %v3786_v13 = vor.u32 %v4751_v1, %v3783_v2  ;;  %v3638_v18 = vor.u32 %v4717_v8, %v3637_v3 }
  0xbb   :  { %v340_v26 = vadd.f32 %v5215_v10, %v324_v19  ;;  %v341_v29 = vadd.f32 %v5221_v36, %v325_v17  ;;  %v1487_v32 = vrot.slane %v5250_v23, 1  ;;  %v5264_v38 = vpack.c.bf16 %v5250_v23, %v5245_v12  ;;  %982 = vmatpush.bf16.msrb.mxu0 %v3298_v33  ;;  %v4713_v33 = vld [vmem:[#allocation2 + $0xac] sm:$0xf0] }
  0xbc   :  { %v5268_v39 = vpack.c.bf16 %v5253_v24, %v5256_v27 }
  0xbd   :  { %v348_v37 = vmax.f32 %v340_v26, 0.0  ;;  %v349_v62 = vmax.f32 %v341_v29, 0.0  ;;  %v5276_v49 = vsel %vm247_vm3, %v1485_v31, %v1487_v32  ;;  %869 = vmatmul.bf16.vlgmr.msra.gmra.mxu2 %v5264_v38  ;;  %907 = vmatmul.bf16.vlgmr.msra.gmra.mxu0 %v5264_v38  ;;  %v3766_v26 = vor.u32 %v4749_v11, %v3765_v9  ;;  %v3607_v9 = vld [vmem:[#allocation2 + $0x90] sm:$0xf0]  ;;  %v4739_v11 = vld [vmem:[#allocation2 + $0x184] sm:$0xf] }
  0xbe   :  { %v221_v43 = vpop.f32.mrf.mxu2  ;;  %v240_v44 = vpop.f32.mrf.mxu3  ;;  %888 = vmatmul.bf16.vlgmr.msra.gmra.mxu3 %v5268_v39  ;;  %926 = vmatmul.bf16.vlgmr.msra.gmra.mxu1 %v5268_v39  ;;  %v3642_v29 = vor.u32 %v4715_v14, %v3639_v15 }
  0xbf   :  { %v362_v51 = vmul.f32 %v5225_v52, %v348_v37  ;;  %v363_v54 = vmul.f32 %v5228_v59, %v349_v62  ;;  %v222_v53 = vadd.f32 %v221_v43, %v5210_v41  ;;  %v241_v60 = vadd.f32 %v240_v44, %v5212_v42  ;;  %1001 = vmatpush.bf16.msrb.mxu1 %v3426_v34  ;;  %v3749_v34 = vld [vmem:[#allocation2 + $0x1a0] sm:$0xf]  ;;  %v4745_v37 = vld [vmem:[#allocation2 + $0x1ac] sm:$0xf0] }
  0xc0   :  { %1333 = vmatpush.bf16.msra.mxu2 %v3654_v63  ;;  %1352 = vmatpush.bf16.msra.mxu3 %v3782_v0  ;;  %v3658_v42 = vor.u32 %v4719_v56, %v3655_v57  ;;  %v1488_v62 = vrot.slane %v5253_v24, 1  ;;  %v3770_v44 = vor.u32 %v4747_v16, %v3767_v21  ;;  %v3605_v56 = vld [vmem:[#allocation2 + $0x80] sm:$0xf]  ;;  %v4709_v57 = vld [vmem:[#allocation2 + $0x8c] sm:$0xf0]  ;;  %v1486_v0 = vrot.slane %v5256_v27, 1 }
  0xc1   :  { %v5287_v4 = vadd.f32 %v5235_v35, %v362_v51  ;;  %v5290_v41 = vadd.f32 %v5237_v61, %v363_v54  ;;  %v326_v7 = vadd.f32 %v298_v58, %v222_v53  ;;  %v327_v40 = vadd.f32 %v317_v6, %v241_v60  ;;  %v4743_v54 = vld [vmem:[#allocation2 + $0x1a4] sm:$0xf]  ;;  %v3733_v58 = vld [vmem:[#allocation2 + $0x180] sm:$0xf] }
  0xc2   :  { %1371 = vmatpush.bf16.msra.mxu0 %v3658_v42  ;;  %v3750_v51 = vor.u32 %v4745_v37, %v3749_v34  ;;  %v3606_v6 = vor.u32 %v4709_v57, %v3605_v56  ;;  %v3717_v21 = vld [vmem:[#allocation2 + $0x160] sm:$0xf]  ;;  %v4735_v37 = vld [vmem:[#allocation2 + $0x164] sm:$0xf] }
  0xc3   :  { %v1489_v19 = vrot.slane %v5287_v4, 1  ;;  %v1490_v17 = vrot.slane %v5290_v41, 1  ;;  %v342_v20 = vadd.f32 %v5215_v10, %v326_v7  ;;  %v343_v25 = vadd.f32 %v5221_v36, %v327_v40  ;;  %1390 = vmatpush.bf16.msra.mxu1 %v3786_v13  ;;  %v3751_v36 = vld [vmem:[#allocation2 + $0x1b0] sm:$0xf0]  ;;  %v4731_v56 = vld [vmem:[#allocation2 + $0x144] sm:$0xf] }
  0xc4   :  { %1334 = vmatpush.bf16.msra.mxu2 %v3638_v18  ;;  %1353 = vmatpush.bf16.msra.mxu3 %v3766_v26  ;;  %v3622_v10 = vor.u32 %v4713_v33, %v3621_v22  ;;  %v3754_v2 = vor.u32 %v4743_v54, %v3751_v36  ;;  %v3735_v40 = vld [vmem:[#allocation2 + $0x190] sm:$0xf0]  ;;  %v4705_v18 = vld [vmem:[#allocation2 + $0x6c] sm:$0xf0]  ;;  %v4703_v26 = vld [vmem:[#allocation2 + $0x64] sm:$0xf] }
  0xc5   :  { %v350_v43 = vmax.f32 %v342_v20, 0.0  ;;  %v351_v47 = vmax.f32 %v343_v25, 0.0  ;;  %v1495_v53 = vsel %vm247_vm3, %v1487_v32, %v1489_v19  ;;  %v1496_v63 = vsel %vm247_vm3, %v1488_v62, %v1490_v17  ;;  %v3589_v20 = vld [vmem:[#allocation2 + $0x60] sm:$0xf]  ;;  %v4737_v25 = vld [vmem:[#allocation2 + $0x16c] sm:$0xf0] }
  0xc6   :  { %v5305_v60 = vpack.c.bf16 %v1495_v53, %v5276_v49  ;;  %1372 = vmatpush.bf16.msra.mxu0 %v3642_v29  ;;  %v3626_v32 = vor.u32 %v4711_v45, %v3623_v46  ;;  %v4707_v49 = vld [vmem:[#allocation2 + $0x84] sm:$0xf]  ;;  %v3738_v14 = vor.u32 %v4739_v11, %v3735_v40  ;;  %v3590_v22 = vor.u32 %v4705_v18, %v3589_v20  ;;  %v3591_v29 = vld [vmem:[#allocation2 + $0x70] sm:$0xf0]  ;;  %v4701_v45 = vld [vmem:[#allocation2 + $0x4c] sm:$0xf0] }
  0xc7   :  { %v364_v55 = vmul.f32 %v5225_v52, %v350_v43  ;;  %v365_v1 = vmul.f32 %v5228_v59, %v351_v47  ;;  %1391 = vmatpush.bf16.msra.mxu1 %v3770_v44  ;;  %v4741_v52 = vld [vmem:[#allocation2 + $0x18c] sm:$0xf0]  ;;  %v1498_v59 = vsel %vm247_vm3, %v1486_v0, %v1488_v62  ;;  %v3610_v13 = vor.u32 %v4707_v49, %v3607_v9  ;;  %v3719_v62 = vld [vmem:[#allocation2 + $0x170] sm:$0xf0]  ;;  %v3573_v43 = vld [vmem:[#allocation2 + $0x40] sm:$0xf] }
  0xc8   :  { %1335 = vmatpush.bf16.msra.mxu2 %v3622_v10  ;;  %1354 = vmatpush.bf16.msra.mxu3 %v3750_v51  ;;  %v3734_v8 = vor.u32 %v4741_v52, %v3733_v58  ;;  %v5327_v42 = vpack.c.bf16 %v1496_v63, %v1498_v59  ;;  %v3718_v33 = vor.u32 %v4737_v25, %v3717_v21  ;;  %v3701_v46 = vld [vmem:[#allocation2 + $0x140] sm:$0xf]  ;;  %v4733_v47 = vld [vmem:[#allocation2 + $0x14c] sm:$0xf0]  ;;  %v4699_v53 = vld [vmem:[#allocation2 + $0x44] sm:$0xf] }
  0xc9   :  { %v5314_v3 = vadd.f32 %v5235_v35, %v364_v55  ;;  %v5317_v7 = vadd.f32 %v5237_v61, %v365_v1  ;;  %v3594_v34 = vor.u32 %v4703_v26, %v3591_v29  ;;  %v3722_v44 = vor.u32 %v4735_v37, %v3719_v62  ;;  %v3575_v55 = vld [vmem:[#allocation2 + $0x50] sm:$0xf0]  ;;  %v3557_v63 = vld [vmem:[#allocation2 + $0x20] sm:$0xf]  ;;  %v4697_v1 = vld [vmem:[#allocation2 + $0x2c] sm:$0xf0] }
  0xca   :  { %1373 = vmatpush.bf16.msra.mxu0 %v3626_v32  ;;  %v3574_v54 = vor.u32 %v4701_v45, %v3573_v43  ;;  %v3702_v36 = vor.u32 %v4733_v47, %v3701_v46  ;;  %v3703_v58 = vld [vmem:[#allocation2 + $0x150] sm:$0xf0]  ;;  %v3685_v32 = vld [vmem:[#allocation2 + $0x120] sm:$0xf]  ;;  %v3558_v11 = vor.u32 %v4697_v1, %v3557_v63  ;;  %v4691_v18 = vld [vmem:[#allocation2 + $0x4] sm:$0xf] }
  0xcb   :  { %v5325_v35 = vpack.c.bf16 %v5314_v3, %v5287_v4  ;;  %v5331_v61 = vpack.c.bf16 %v5317_v7, %v5290_v41  ;;  %1392 = vmatpush.bf16.msra.mxu1 %v3754_v2  ;;  %v1491_v15 = vrot.slane %v5314_v3, 1  ;;  %v1492_v16 = vrot.slane %v5317_v7, 1  ;;  %v4729_v2 = vld [vmem:[#allocation2 + $0x12c] sm:$0xf0]  ;;  %v3559_v9 = vld [vmem:[#allocation2 + $0x30] sm:$0xf0] }
  0xcc   :  { %1336 = vmatpush.bf16.msra.mxu2 %v3606_v6  ;;  %1355 = vmatpush.bf16.msra.mxu3 %v3734_v8  ;;  %v3578_v6 = vor.u32 %v4699_v53, %v3575_v55  ;;  %v3706_v49 = vor.u32 %v4731_v56, %v3703_v58  ;;  %v4695_v8 = vld [vmem:[#allocation2 + $0x24] sm:$0xf]  ;;  %v3686_v40 = vor.u32 %v4729_v2, %v3685_v32  ;;  %v3687_v59 = vld [vmem:[#allocation2 + $0x130] sm:$0xf0]  ;;  %v3661_v37 = vld [vmem:[#allocation2 + $0xe8] sm:$0xf] }
  0xcd   :  { %874 = vmatmul.bf16.gmra.mxu2 %v5325_v35  ;;  %912 = vmatmul.bf16.gmra.mxu0 %v5325_v35  ;;  %v1493_v10 = vsel %vm247_vm3, %v1489_v19, %v1491_v15  ;;  %v1499_v51 = vsel %vm247_vm3, %v1491_v15, %v1485_v31  ;;  %v1494_v19 = vsel %vm247_vm3, %v1490_v17, %v1492_v16  ;;  %v4727_v17 = vld [vmem:[#allocation2 + $0x124] sm:$0xf]  ;;  %v3669_v15 = vld [vmem:[#allocation2 + $0x100] sm:$0xf]  ;;  %v3543_v25 = vld [vmem:[#allocation2 + $0x10] sm:$0xf0] }
  0xce   :  { %893 = vmatmul.bf16.gmra.mxu3 %v5331_v61  ;;  %931 = vmatmul.bf16.gmra.mxu1 %v5331_v61  ;;  %v5347_v57 = vpack.c.bf16 %v1499_v51, %v1493_v10  ;;  %v1500_v31 = vsel %vm247_vm3, %v1492_v16, %v1486_v0  ;;  %v4725_v0 = vld [vmem:[#allocation2 + $0x10c] sm:$0xf0]  ;;  %v3562_v16 = vor.u32 %v4695_v8, %v3559_v9  ;;  %v4723_v26 = vld [vmem:[#allocation2 + $0x104] sm:$0xf]  ;;  %v3671_v29 = vld [vmem:[#allocation2 + $0x110] sm:$0xf0] }
  0xcf   :  { %1374 = vmatpush.bf16.msra.mxu0 %v3610_v13  ;;  %1393 = vmatpush.bf16.msra.mxu1 %v3738_v14  ;;  %v5357_v52 = vpack.c.bf16 %v1500_v31, %v1494_v19  ;;  %v3541_v13 = vld [vmem:[#allocation2] sm:$0xf]  ;;  %v4693_v14 = vld [vmem:[#allocation2 + $0xc] sm:$0xf0]  ;;  %v3690_v20 = vor.u32 %v4727_v17, %v3687_v59  ;;  %v4722_v62 = vld [vmem:[#allocation2 + $0xf4] sm:$0xf0] }
  0xd0   :  { %1337 = vmatpush.bf16.msra.mxu2 %v3590_v22  ;;  %1356 = vmatpush.bf16.msra.mxu3 %v3718_v33  ;;  %v3542_v21 = vor.u32 %v4693_v14, %v3541_v13  ;;  %v3670_v22 = vor.u32 %v4725_v0, %v3669_v15  ;;  %v3546_v33 = vor.u32 %v4691_v18, %v3543_v25  ;;  %v3789_v43 = vld [vmem:[#allocation2 + $0x1e8] sm:$0xf]  ;;  %v4754_v45 = vld [vmem:[#allocation2 + $0x1f4] sm:$0xf0]  ;;  %v4720_v46 = vld [vmem:[#allocation2 + $0xec] sm:$0xf] }
  0xd1   :  { %v3663_v47 = vld [vmem:[#allocation2 + $0xf8] sm:$0xf0]  ;;  %v3790_v10 = vor.u32 %v4754_v45, %v3789_v43  ;;  %v3645_v53 = vld [vmem:[#allocation2 + $0xc8] sm:$0xf]  ;;  %v4718_v56 = vld [vmem:[#allocation2 + $0xd4] sm:$0xf0] }
  0xd2   :  { %v3666_v51 = vor.u32 %v4720_v46, %v3663_v47  ;;  %v3773_v58 = vld [vmem:[#allocation2 + $0x1c8] sm:$0xf]  ;;  %v4750_v63 = vld [vmem:[#allocation2 + $0x1d4] sm:$0xf0]  ;;  %v3646_v1 = vor.u32 %v4718_v56, %v3645_v53  ;;  %v4716_v31 = vld [vmem:[#allocation2 + $0xcc] sm:$0xf] }
  0xd3   :  { %1375 = vmatpush.bf16.msra.mxu0 %v3594_v34  ;;  %1394 = vmatpush.bf16.msra.mxu1 %v3722_v44  ;;  %v3674_v34 = vor.u32 %v4723_v26, %v3671_v29  ;;  %v3662_v44 = vor.u32 %v4722_v62, %v3661_v37  ;;  %v3774_v19 = vor.u32 %v4750_v63, %v3773_v58  ;;  %v3647_v32 = vld [vmem:[#allocation2 + $0xd8] sm:$0xf0]  ;;  %v3757_v9 = vld [vmem:[#allocation2 + $0x1a8] sm:$0xf]  ;;  %v4744_v59 = vld [vmem:[#allocation2 + $0x1ac] sm:$0xf] }
  0xd4   :  { %1338 = vmatpush.bf16.msra.mxu2 %v3574_v54  ;;  %1357 = vmatpush.bf16.msra.mxu3 %v3702_v36  ;;  %v4752_v54 = vld [vmem:[#allocation2 + $0x1ec] sm:$0xf]  ;;  %v3791_v36 = vld [vmem:[#allocation2 + $0x1f8] sm:$0xf0]  ;;  %v3613_v0 = vld [vmem:[#allocation2 + $0x88] sm:$0xf] }
  0xd5   :  { %v3794_v55 = vor.u32 %v4752_v54, %v3791_v36  ;;  %v3775_v2 = vld [vmem:[#allocation2 + $0x1d8] sm:$0xf0]  ;;  %v4710_v18 = vld [vmem:[#allocation2 + $0x94] sm:$0xf0]  ;;  %v4708_v25 = vld [vmem:[#allocation2 + $0x8c] sm:$0xf] }
  0xd6   :  { %v3631_v17 = vld [vmem:[#allocation2 + $0xb8] sm:$0xf0]  ;;  %v3614_v26 = vor.u32 %v4710_v18, %v3613_v0  ;;  %v382_v45 = vrot.slane %v5250_v23, 7  ;;  %v386_v46 = vrot.slane %v5314_v3, 7  ;;  %v387_v47 = vrot.slane %v5317_v7, 7 }
  0xd7   :  { %1376 = vmatpush.bf16.msra.mxu0 %v3578_v6  ;;  %1395 = vmatpush.bf16.msra.mxu1 %v3706_v49  ;;  %v3629_v6 = vld [vmem:[#allocation2 + $0xa8] sm:$0xf]  ;;  %v4714_v49 = vld [vmem:[#allocation2 + $0xb4] sm:$0xf0]  ;;  %v3759_v13 = vld [vmem:[#allocation2 + $0x1b8] sm:$0xf0] }
  0xd8   :  { %1339 = vmatpush.bf16.msra.mxu2 %v3558_v11  ;;  %1358 = vmatpush.bf16.msra.mxu3 %v3686_v40  ;;  %v4746_v11 = vld [vmem:[#allocation2 + $0x1b4] sm:$0xf0]  ;;  %v4712_v40 = vld [vmem:[#allocation2 + $0xac] sm:$0xf]  ;;  %v3630_v14 = vor.u32 %v4714_v49, %v3629_v6  ;;  %v3743_v37 = vld [vmem:[#allocation2 + $0x198] sm:$0xf0] }
  0xd9   :  { %v3758_v15 = vor.u32 %v4746_v11, %v3757_v9  ;;  %v3725_v54 = vld [vmem:[#allocation2 + $0x168] sm:$0xf]  ;;  %v4738_v53 = vld [vmem:[#allocation2 + $0x174] sm:$0xf0]  ;;  %v3599_v56 = vld [vmem:[#allocation2 + $0x78] sm:$0xf0] }
  0xda   :  { %v3726_v58 = vor.u32 %v4738_v53, %v3725_v54  ;;  %v4700_v6 = vld [vmem:[#allocation2 + $0x4c] sm:$0xf]  ;;  %v3583_v49 = vld [vmem:[#allocation2 + $0x58] sm:$0xf0]  ;;  %v3909_v23 = vld [vmem:[#allocation2 + $0x460] sm:$0xf] }
  0xdb   :  { %1377 = vmatpush.bf16.msra.mxu0 %v3562_v16  ;;  %1396 = vmatpush.bf16.msra.mxu1 %v3690_v20  ;;  %v3634_v16 = vor.u32 %v4712_v40, %v3631_v17  ;;  %v3762_v20 = vor.u32 %v4744_v59, %v3759_v13  ;;  %v3586_v9 = vor.u32 %v4700_v6, %v3583_v49  ;;  %v3711_v11 = vld [vmem:[#allocation2 + $0x158] sm:$0xf0]  ;;  %v3565_v40 = vld [vmem:[#allocation2 + $0x28] sm:$0xf]  ;;  %v4698_v17 = vld [vmem:[#allocation2 + $0x34] sm:$0xf0] }
  0xdc   :  { %1340 = vmatpush.bf16.msra.mxu2 %v3542_v21  ;;  %1359 = vmatpush.bf16.msra.mxu3 %v3670_v22  ;;  %v3741_v21 = vld [vmem:[#allocation2 + $0x188] sm:$0xf]  ;;  %v4742_v22 = vld [vmem:[#allocation2 + $0x194] sm:$0xf0]  ;;  %v3566_v0 = vor.u32 %v4698_v17, %v3565_v40  ;;  %v3695_v18 = vld [vmem:[#allocation2 + $0x138] sm:$0xf0] }
  0xdd   :  { %945 = vmatmul.bf16.vlgmr.msrb.gmra.mxu2 %v5264_v38  ;;  %983 = vmatmul.bf16.vlgmr.msrb.gmra.mxu0 %v5264_v38  ;;  %v4748_v38 = vld [vmem:[#allocation2 + $0x1cc] sm:$0xf]  ;;  %v3742_v29 = vor.u32 %v4742_v22, %v3741_v21  ;;  %v3693_v13 = vld [vmem:[#allocation2 + $0x128] sm:$0xf]  ;;  %v381_v21 = vrot.slane %v5256_v27, 7  ;;  %v383_v22 = vrot.slane %v5253_v24, 7 }
  0xde   :  { %964 = vmatmul.bf16.vlgmr.msrb.gmra.mxu3 %v5268_v39  ;;  %1002 = vmatmul.bf16.vlgmr.msrb.gmra.mxu1 %v5268_v39  ;;  %v3650_v39 = vor.u32 %v4716_v31, %v3647_v32  ;;  %v3778_v8 = vor.u32 %v4748_v38, %v3775_v2  ;;  %v3581_v31 = vld [vmem:[#allocation2 + $0x48] sm:$0xf]  ;;  %v4702_v38 = vld [vmem:[#allocation2 + $0x54] sm:$0xf0]  ;;  %v3551_v54 = vld [vmem:[#allocation2 + $0x18] sm:$0xf0] }
  0xdf   :  { %1378 = vmatpush.bf16.msra.mxu0 %v3546_v33  ;;  %1397 = vmatpush.bf16.msra.mxu1 %v3674_v34  ;;  %v3615_v33 = vld [vmem:[#allocation2 + $0x98] sm:$0xf0]  ;;  %v4740_v34 = vld [vmem:[#allocation2 + $0x18c] sm:$0xf]  ;;  %v4694_v27 = vld [vmem:[#allocation2 + $0x14] sm:$0xf0] }
  0xe0   :  { %1409 = vmatpush.bf16.msrb.mxu2 %v3662_v44  ;;  %1428 = vmatpush.bf16.msrb.mxu3 %v3790_v10  ;;  %v3618_v62 = vor.u32 %v4708_v25, %v3615_v33  ;;  %v3746_v43 = vor.u32 %v4740_v34, %v3743_v37  ;;  %v380_v44 = vrot.slane %v5245_v12, 7  ;;  %v3597_v10 = vld [vmem:[#allocation2 + $0x68] sm:$0xf]  ;;  %v395_v37 = vsel %vm113_vm2, %v387_v47, %v381_v21  ;;  %v3679_v53 = vld [vmem:[#allocation2 + $0x118] sm:$0xf0] }
  0xe1   :  { %v3549_v34 = vld [vmem:[#allocation2 + $0x8] sm:$0xf]  ;;  %v393_v12 = vsel %vm113_vm2, %v381_v21, %v383_v22  ;;  %v4845_v17 = vld [vmem:[#allocation2 + $0x4cc] sm:$0xf0]  ;;  %v4087_v21 = vld [vmem:[#allocation2 + $0x5d0] sm:$0xf0] }
  0xe2   :  { %v4833_v24 = vld [vmem:[#allocation2 + $0x46c] sm:$0xf0] }
  0xe3   :  { %1447 = vmatpush.bf16.msrb.mxu0 %v3666_v51  ;;  %1466 = vmatpush.bf16.msrb.mxu1 %v3794_v55  ;;  %v4706_v51 = vld [vmem:[#allocation2 + $0x74] sm:$0xf0]  ;;  %v4704_v55 = vld [vmem:[#allocation2 + $0x6c] sm:$0xf] }
  0xe4   :  { %1410 = vmatpush.bf16.msrb.mxu2 %v3646_v1  ;;  %1429 = vmatpush.bf16.msrb.mxu3 %v3774_v19  ;;  %v3598_v36 = vor.u32 %v4706_v51, %v3597_v10  ;;  %v3602_v63 = vor.u32 %v4704_v55, %v3599_v56  ;;  %v4736_v1 = vld [vmem:[#allocation2 + $0x16c] sm:$0xf]  ;;  %v3727_v19 = vld [vmem:[#allocation2 + $0x178] sm:$0xf0]  ;;  %v392_v51 = vsel %vm113_vm2, %v380_v44, %v382_v45  ;;  %v3965_v55 = vld [vmem:[#allocation2 + $0x4c8] sm:$0xf] }
  0xe5   :  { %v3730_v32 = vor.u32 %v4736_v1, %v3727_v19  ;;  %v4692_v10 = vld [vmem:[#allocation2 + $0xc] sm:$0xf] }
  0xe6   :  { %v3554_v1 = vor.u32 %v4692_v10, %v3551_v54  ;;  %v4071_v10 = vld [vmem:[#allocation2 + $0x5b0] sm:$0xf0]  ;;  %v385_v54 = vrot.slane %v5290_v41, 7  ;;  %v4053_v41 = vld [vmem:[#allocation2 + $0x580] sm:$0xf] }
  0xe7   :  { %1448 = vmatpush.bf16.msrb.mxu0 %v3650_v39  ;;  %1467 = vmatpush.bf16.msrb.mxu1 %v3778_v8  ;;  %v4734_v39 = vld [vmem:[#allocation2 + $0x154] sm:$0xf0]  ;;  %v4732_v8 = vld [vmem:[#allocation2 + $0x14c] sm:$0xf] }
  0xe8   :  { %1411 = vmatpush.bf16.msrb.mxu2 %v3630_v14  ;;  %1430 = vmatpush.bf16.msrb.mxu3 %v3758_v15  ;;  %v3714_v59 = vor.u32 %v4732_v8, %v3711_v11  ;;  %v4730_v14 = vld [vmem:[#allocation2 + $0x134] sm:$0xf0]  ;;  %v4696_v15 = vld [vmem:[#allocation2 + $0x2c] sm:$0xf]  ;;  %v4879_v8 = vld [vmem:[#allocation2 + $0x5e4] sm:$0xf]  ;;  %v391_v7 = vsel %vm113_vm2, %v383_v22, %v385_v54  ;;  %v3910_v22 = vor.u32 %v4833_v24, %v3909_v23 }
  0xe9   :  { %v3694_v25 = vor.u32 %v4730_v14, %v3693_v13  ;;  %v3957_v11 = vld [vmem:[#allocation2 + $0x4c0] sm:$0xf]  ;;  %v4877_v13 = vld [vmem:[#allocation2 + $0x5cc] sm:$0xf0]  ;;  %v4850_v23 = vld [vmem:[#allocation2 + $0x4f4] sm:$0xf0] }
  0xea   :  { %v3958_v14 = vor.u32 %v4845_v17, %v3957_v11  ;;  %v3911_v11 = vld [vmem:[#allocation2 + $0x470] sm:$0xf0]  ;;  %v4109_v24 = vld [vmem:[#allocation2 + $0x5e8] sm:$0xf] }
  0xeb   :  { %1449 = vmatpush.bf16.msrb.mxu0 %v3634_v16  ;;  %1468 = vmatpush.bf16.msrb.mxu1 %v3762_v20  ;;  %v3567_v16 = vld [vmem:[#allocation2 + $0x38] sm:$0xf0]  ;;  %v4728_v20 = vld [vmem:[#allocation2 + $0x12c] sm:$0xf] }
  0xec   :  { %1412 = vmatpush.bf16.msrb.mxu2 %v3614_v26  ;;  %1431 = vmatpush.bf16.msrb.mxu3 %v3742_v29  ;;  %v394_v26 = vsel %vm113_vm2, %v386_v46, %v380_v44  ;;  %v3570_v29 = vor.u32 %v4696_v15, %v3567_v16  ;;  %v3698_v33 = vor.u32 %v4728_v20, %v3695_v18  ;;  %v3959_v16 = vld [vmem:[#allocation2 + $0x4d0] sm:$0xf0]  ;;  %v4875_v20 = vld [vmem:[#allocation2 + $0x5c4] sm:$0xf] }
  0xed   :  { %950 = vmatmul.bf16.gmra.mxu2 %v5325_v35  ;;  %988 = vmatmul.bf16.gmra.mxu0 %v5325_v35  ;;  %v3709_v35 = vld [vmem:[#allocation2 + $0x148] sm:$0xf]  ;;  %v5399_v56 = vpack.c.bf16 %v392_v51, %v394_v26  ;;  %v5405_v44 = vpack.c.bf16 %v393_v12, %v395_v37  ;;  %v4841_v26 = vld [vmem:[#allocation2 + $0x4ac] sm:$0xf0]  ;;  %v384_v51 = vrot.slane %v5287_v4, 7  ;;  %v389_v4 = vsel %vm113_vm2, %v385_v54, %v387_v47 }
  0xee   :  { %969 = vmatmul.bf16.gmra.mxu3 %v5331_v61  ;;  %1007 = vmatmul.bf16.gmra.mxu1 %v5331_v61  ;;  %v3582_v61 = vor.u32 %v4702_v38, %v3581_v31  ;;  %v3710_v2 = vor.u32 %v4734_v39, %v3709_v35  ;;  %v3973_v31 = vld [vmem:[#allocation2 + $0x4e0] sm:$0xf]  ;;  %v4881_v39 = vld [vmem:[#allocation2 + $0x5ec] sm:$0xf0]  ;;  %v5446_v47 = vpack.c.bf16 %v389_v4, %v391_v7  ;;  %v3879_v54 = vld [vmem:[#allocation2 + $0x430] sm:$0xf0] }
  0xef   :  { %1450 = vmatpush.bf16.msrb.mxu0 %v3618_v62  ;;  %1469 = vmatpush.bf16.msrb.mxu1 %v3746_v43  ;;  %v3677_v62 = vld [vmem:[#allocation2 + $0x108] sm:$0xf]  ;;  %v4726_v43 = vld [vmem:[#allocation2 + $0x114] sm:$0xf0]  ;;  %v4101_v38 = vld [vmem:[#allocation2 + $0x5e0] sm:$0xf]  ;;  %v390_v3 = vsel %vm113_vm2, %v382_v45, %v384_v51 }
  0xf0   :  { %1413 = vmatpush.bf16.msrb.mxu2 %v3598_v36  ;;  %1432 = vmatpush.bf16.msrb.mxu3 %v3726_v58  ;;  %v4724_v36 = vld [vmem:[#allocation2 + $0x10c] sm:$0xf]  ;;  %v3550_v58 = vor.u32 %v4694_v27, %v3549_v34  ;;  %v4102_v6 = vor.u32 %v4881_v39, %v4101_v38  ;;  %v4873_v34 = vld [vmem:[#allocation2 + $0x5ac] sm:$0xf0]  ;;  %v4839_v27 = vld [vmem:[#allocation2 + $0x4a4] sm:$0xf] }
  0xf1   :  { %v3682_v19 = vor.u32 %v4724_v36, %v3679_v53  ;;  %v4867_v38 = vld [vmem:[#allocation2 + $0x584] sm:$0xf]  ;;  %v4037_v45 = vld [vmem:[#allocation2 + $0x560] sm:$0xf] }
  0xf2   :  { %v3861_v4 = vld [vmem:[#allocation2 + $0x400] sm:$0xf] }
  0xf3   :  { %1451 = vmatpush.bf16.msrb.mxu0 %v3602_v63  ;;  %1470 = vmatpush.bf16.msrb.mxu1 %v3730_v32  ;;  %v3678_v63 = vor.u32 %v4726_v43, %v3677_v62  ;;  %v4849_v32 = vld [vmem:[#allocation2 + $0x4ec] sm:$0xf0]  ;;  %v3943_v62 = vld [vmem:[#allocation2 + $0x4b0] sm:$0xf0]  ;;  %v4871_v43 = vld [vmem:[#allocation2 + $0x5a4] sm:$0xf] }
  0xf4   :  { %1414 = vmatpush.bf16.msrb.mxu2 %v3582_v61  ;;  %1433 = vmatpush.bf16.msrb.mxu3 %v3710_v2  ;;  %v3974_v35 = vor.u32 %v4849_v32, %v3973_v31  ;;  %v4847_v61 = vld [vmem:[#allocation2 + $0x4e4] sm:$0xf]  ;;  %v3975_v2 = vld [vmem:[#allocation2 + $0x4f0] sm:$0xf0]  ;;  %v3946_v53 = vor.u32 %v4839_v27, %v3943_v62  ;;  %v4074_v12 = vor.u32 %v4871_v43, %v4071_v10  ;;  %v4825_v27 = vld [vmem:[#allocation2 + $0x42c] sm:$0xf0] }
  0xf5   :  { %v3978_v49 = vor.u32 %v4847_v61, %v3975_v2  ;;  %v4835_v31 = vld [vmem:[#allocation2 + $0x484] sm:$0xf]  ;;  %v3927_v32 = vld [vmem:[#allocation2 + $0x490] sm:$0xf0]  ;;  %v4005_v43 = vld [vmem:[#allocation2 + $0x520] sm:$0xf] }
  0xf6   :  { %v4857_v10 = vld [vmem:[#allocation2 + $0x52c] sm:$0xf0] }
  0xf7   :  { %1452 = vmatpush.bf16.msrb.mxu0 %v3586_v9  ;;  %1471 = vmatpush.bf16.msrb.mxu1 %v3714_v59  ;;  %v4103_v9 = vld [vmem:[#allocation2 + $0x5f0] sm:$0xf0]  ;;  %v4085_v59 = vld [vmem:[#allocation2 + $0x5c0] sm:$0xf] }
  0xf8   :  { %1415 = vmatpush.bf16.msrb.mxu2 %v3566_v0  ;;  %1434 = vmatpush.bf16.msrb.mxu3 %v3694_v25  ;;  %v4106_v40 = vor.u32 %v4879_v8, %v4103_v9  ;;  %v4086_v15 = vor.u32 %v4877_v13, %v4085_v59  ;;  %v4843_v0 = vld [vmem:[#allocation2 + $0x4c4] sm:$0xf]  ;;  %v3941_v25 = vld [vmem:[#allocation2 + $0x4a0] sm:$0xf]  ;;  %v4865_v8 = vld [vmem:[#allocation2 + $0x56c] sm:$0xf0] }
  0xf9   :  { %v3962_v18 = vor.u32 %v4843_v0, %v3959_v16  ;;  %v3942_v37 = vor.u32 %v4841_v26, %v3941_v25  ;;  %v4831_v9 = vld [vmem:[#allocation2 + $0x464] sm:$0xf]  ;;  %v4039_v13 = vld [vmem:[#allocation2 + $0x570] sm:$0xf0]  ;;  %v4829_v0 = vld [vmem:[#allocation2 + $0x44c] sm:$0xf0] }
  0xfa   :  { %v3914_v17 = vor.u32 %v4831_v9, %v3911_v11  ;;  %v4863_v59 = vld [vmem:[#allocation2 + $0x564] sm:$0xf]  ;;  %v4021_v16 = vld [vmem:[#allocation2 + $0x540] sm:$0xf]  ;;  %v3983_v9 = vld [vmem:[#allocation2 + $0x4f8] sm:$0xf0] }
  0xfb   :  { %1453 = vmatpush.bf16.msrb.mxu0 %v3570_v29  ;;  %1472 = vmatpush.bf16.msrb.mxu1 %v3698_v33  ;;  %v4090_v29 = vor.u32 %v4875_v20, %v4087_v21  ;;  %v4069_v33 = vld [vmem:[#allocation2 + $0x5a0] sm:$0xf]  ;;  %v4861_v20 = vld [vmem:[#allocation2 + $0x54c] sm:$0xf0]  ;;  %v3895_v21 = vld [vmem:[#allocation2 + $0x450] sm:$0xf0] }
  0xfc   :  { %1416 = vmatpush.bf16.msrb.mxu2 %v3550_v58  ;;  %1435 = vmatpush.bf16.msrb.mxu3 %v3678_v63  ;;  %v4070_v36 = vor.u32 %v4873_v34, %v4069_v33  ;;  %v3925_v58 = vld [vmem:[#allocation2 + $0x480] sm:$0xf]  ;;  %v4837_v63 = vld [vmem:[#allocation2 + $0x48c] sm:$0xf0]  ;;  %v4859_v25 = vld [vmem:[#allocation2 + $0x544] sm:$0xf] }
  0xfd   :  { %3798 = vmatmul.msk.bf16.vlgmr.msra.gmra.mxu2 %vm5395_vm10, %v5399_v56  ;;  %3814 = vmatmul.msk.bf16.vlgmr.msra.gmra.mxu0 %vm5395_vm10, %v5399_v56  ;;  %v3926_v61 = vor.u32 %v4837_v63, %v3925_v58  ;;  %v4023_v33 = vld [vmem:[#allocation2 + $0x550] sm:$0xf0]  ;;  %v3877_v34 = vld [vmem:[#allocation2 + $0x420] sm:$0xf]  ;;  %v4006_v58 = vor.u32 %v4857_v10, %v4005_v43  ;;  %v4840_v43 = vld [vmem:[#allocation2 + $0x4ac] sm:$0xf] }
  0xfe   :  { %3806 = vmatmul.msk.bf16.vlgmr.msra.gmra.mxu3 %vm5395_vm10, %v5405_v44  ;;  %3822 = vmatmul.msk.bf16.vlgmr.msra.gmra.mxu1 %vm5395_vm10, %v5405_v44  ;;  %v4026_v62 = vor.u32 %v4859_v25, %v4023_v33  ;;  %v4095_v25 = vld [vmem:[#allocation2 + $0x5d8] sm:$0xf0]  ;;  %v4842_v33 = vld [vmem:[#allocation2 + $0x4b4] sm:$0xf0] }
  0xff   :  { %1454 = vmatpush.bf16.msrb.mxu0 %v3554_v1  ;;  %1473 = vmatpush.bf16.msrb.mxu1 %v3682_v19  ;;  %v388_v1 = vsel %vm113_vm2, %v384_v51, %v386_v46  ;;  %v4869_v19 = vld [vmem:[#allocation2 + $0x58c] sm:$0xf0]  ;;  %v4823_v51 = vld [vmem:[#allocation2 + $0x424] sm:$0xf]  ;;  %v3951_v10 = vld [vmem:[#allocation2 + $0x4b8] sm:$0xf0] }
 0x100   :  { %1898 = vmatpush.bf16.msra.mxu2 %v3974_v35  ;;  %1917 = vmatpush.bf16.msra.mxu3 %v4102_v6  ;;  %v4055_v35 = vld [vmem:[#allocation2 + $0x590] sm:$0xf0]  ;;  %v5444_v46 = vpack.c.bf16 %v388_v1, %v390_v3  ;;  %v4054_v2 = vor.u32 %v4869_v19, %v4053_v41  ;;  %v3930_v6 = vor.u32 %v4835_v31, %v3927_v32  ;;  %v4821_v41 = vld [vmem:[#allocation2 + $0x40c] sm:$0xf0]  ;;  %v3989_v19 = vld [vmem:[#allocation2 + $0x500] sm:$0xf] }
 0x101   :  { %v3882_v63 = vor.u32 %v4823_v51, %v3879_v54  ;;  %v3862_v31 = vor.u32 %v4821_v41, %v3861_v4  ;;  %v4853_v32 = vld [vmem:[#allocation2 + $0x50c] sm:$0xf0]  ;;  %v4872_v51 = vld [vmem:[#allocation2 + $0x5ac] sm:$0xf]  ;;  %v3954_v54 = vor.u32 %v4840_v43, %v3951_v10  ;;  %v4870_v4 = vld [vmem:[#allocation2 + $0x594] sm:$0xf0] }
 0x102   :  { %v3990_v3 = vor.u32 %v4853_v32, %v3989_v19  ;;  %v4836_v41 = vld [vmem:[#allocation2 + $0x48c] sm:$0xf]  ;;  %v3935_v19 = vld [vmem:[#allocation2 + $0x498] sm:$0xf0] }
 0x103   :  { %1936 = vmatpush.bf16.msra.mxu0 %v3978_v49  ;;  %1955 = vmatpush.bf16.msra.mxu1 %v4106_v40  ;;  %v4058_v49 = vor.u32 %v4867_v38, %v4055_v35  ;;  %v4038_v40 = vor.u32 %v4865_v8, %v4037_v45  ;;  %v4819_v38 = vld [vmem:[#allocation2 + $0x404] sm:$0xf]  ;;  %v3863_v35 = vld [vmem:[#allocation2 + $0x410] sm:$0xf0]  ;;  %v4848_v8 = vld [vmem:[#allocation2 + $0x4ec] sm:$0xf]  ;;  %v3938_v32 = vor.u32 %v4836_v41, %v3935_v19 }
 0x104   :  { %1899 = vmatpush.bf16.msra.mxu2 %v3958_v14  ;;  %1918 = vmatpush.bf16.msra.mxu3 %v4086_v15  ;;  %v3893_v14 = vld [vmem:[#allocation2 + $0x440] sm:$0xf]  ;;  %v4042_v15 = vor.u32 %v4863_v59, %v4039_v13  ;;  %v3866_v7 = vor.u32 %v4819_v38, %v3863_v35  ;;  %v4093_v13 = vld [vmem:[#allocation2 + $0x5c8] sm:$0xf]  ;;  %v4868_v38 = vld [vmem:[#allocation2 + $0x58c] sm:$0xf] }
 0x105   :  { %v3894_v26 = vor.u32 %v4829_v0, %v3893_v14  ;;  %v4844_v0 = vld [vmem:[#allocation2 + $0x4cc] sm:$0xf]  ;;  %v4063_v35 = vld [vmem:[#allocation2 + $0x598] sm:$0xf0] }
 0x106   :  { %v4852_v19 = vld [vmem:[#allocation2 + $0x50c] sm:$0xf] }
 0x107   :  { %1937 = vmatpush.bf16.msra.mxu0 %v3962_v18  ;;  %1956 = vmatpush.bf16.msra.mxu1 %v4090_v29  ;;  %v4827_v18 = vld [vmem:[#allocation2 + $0x444] sm:$0xf]  ;;  %v4022_v29 = vor.u32 %v4861_v20, %v4021_v16  ;;  %v3967_v16 = vld [vmem:[#allocation2 + $0x4d8] sm:$0xf0] }
 0x108   :  { %1900 = vmatpush.bf16.msra.mxu2 %v3942_v37  ;;  %1919 = vmatpush.bf16.msra.mxu3 %v4070_v36  ;;  %v3898_v37 = vor.u32 %v4827_v18, %v3895_v21  ;;  %v4855_v36 = vld [vmem:[#allocation2 + $0x524] sm:$0xf]  ;;  %v3970_v18 = vor.u32 %v4844_v0, %v3967_v16  ;;  %v4876_v21 = vld [vmem:[#allocation2 + $0x5cc] sm:$0xf]  ;;  %v4826_v16 = vld [vmem:[#allocation2 + $0x434] sm:$0xf0] }
 0x10b   :  { %1938 = vmatpush.bf16.msra.mxu0 %v3946_v53  ;;  %1957 = vmatpush.bf16.msra.mxu1 %v4074_v12  ;;  %v4007_v53 = vld [vmem:[#allocation2 + $0x530] sm:$0xf0]  ;;  %v3878_v12 = vor.u32 %v4825_v27, %v3877_v34  ;;  %v4077_v34 = vld [vmem:[#allocation2 + $0x5a8] sm:$0xf]  ;;  %v4874_v27 = vld [vmem:[#allocation2 + $0x5b4] sm:$0xf0] }
 0x10c   :  { %1901 = vmatpush.bf16.msra.mxu2 %v3926_v61  ;;  %1920 = vmatpush.bf16.msra.mxu3 %v4054_v2  ;;  %v4010_v1 = vor.u32 %v4855_v36, %v4007_v53  ;;  %v4851_v61 = vld [vmem:[#allocation2 + $0x504] sm:$0xf]  ;;  %v3991_v2 = vld [vmem:[#allocation2 + $0x510] sm:$0xf0]  ;;  %v4079_v36 = vld [vmem:[#allocation2 + $0x5b8] sm:$0xf0] }
 0x10d   :  { %3802 = vmatmul.msk.bf16.gmra.mxu2 %vm5432_vm12, %v5444_v46  ;;  %3818 = vmatmul.msk.bf16.gmra.mxu0 %vm5432_vm12, %v5444_v46  ;;  %v4082_v53 = vor.u32 %v4872_v51, %v4079_v36  ;;  %v4822_v36 = vld [vmem:[#allocation2 + $0x414] sm:$0xf0] }
 0x10e   :  { %3810 = vmatmul.msk.bf16.gmra.mxu3 %vm5432_vm12, %v5446_v47  ;;  %3826 = vmatmul.msk.bf16.gmra.mxu1 %vm5432_vm12, %v5446_v47 }
 0x10f   :  { %1939 = vmatpush.bf16.msra.mxu0 %v3930_v6  ;;  %1958 = vmatpush.bf16.msra.mxu1 %v4058_v49  ;;  %v3994_v6 = vor.u32 %v4851_v61, %v3991_v2  ;;  %v3981_v49 = vld [vmem:[#allocation2 + $0x4e8] sm:$0xf]  ;;  %v4834_v61 = vld [vmem:[#allocation2 + $0x474] sm:$0xf0] }
 0x110   :  { %1902 = vmatpush.bf16.msra.mxu2 %v3910_v22  ;;  %1921 = vmatpush.bf16.msra.mxu3 %v4038_v40  ;;  %v3982_v45 = vor.u32 %v4850_v23, %v3981_v49  ;;  %v4882_v22 = vld [vmem:[#allocation2 + $0x5f4] sm:$0xf0]  ;;  %v3986_v40 = vor.u32 %v4848_v8, %v3983_v9  ;;  %v4045_v2 = vld [vmem:[#allocation2 + $0x568] sm:$0xf] }
 0x111   :  { %v4110_v11 = vor.u32 %v4882_v22, %v4109_v24  ;;  %v3919_v24 = vld [vmem:[#allocation2 + $0x478] sm:$0xf0]  ;;  %v3901_v8 = vld [vmem:[#allocation2 + $0x448] sm:$0xf]  ;;  %v4830_v9 = vld [vmem:[#allocation2 + $0x454] sm:$0xf0] }
 0x113   :  { %1940 = vmatpush.bf16.msra.mxu0 %v3914_v17  ;;  %1959 = vmatpush.bf16.msra.mxu1 %v4042_v15  ;;  %v4880_v17 = vld [vmem:[#allocation2 + $0x5ec] sm:$0xf]  ;;  %v4878_v15 = vld [vmem:[#allocation2 + $0x5d4] sm:$0xf0] }
 0x114   :  { %1903 = vmatpush.bf16.msra.mxu2 %v3894_v26  ;;  %1922 = vmatpush.bf16.msra.mxu3 %v4022_v29  ;;  %v4094_v20 = vor.u32 %v4878_v15, %v4093_v13  ;;  %v3949_v26 = vld [vmem:[#allocation2 + $0x4a8] sm:$0xf]  ;;  %v4098_v29 = vor.u32 %v4876_v21, %v4095_v25  ;;  %v4860_v13 = vld [vmem:[#allocation2 + $0x54c] sm:$0xf] }
 0x115   :  { %v3885_v15 = vld [vmem:[#allocation2 + $0x428] sm:$0xf] }
 0x116   :  { %v3886_v21 = vor.u32 %v4826_v16, %v3885_v15 }
 0x117   :  { %1941 = vmatpush.bf16.msra.mxu0 %v3898_v37  ;;  %1960 = vmatpush.bf16.msra.mxu1 %v4026_v62  ;;  %v3950_v37 = vor.u32 %v4842_v33, %v3949_v26  ;;  %v4078_v62 = vor.u32 %v4874_v27, %v4077_v34  ;;  %v4824_v26 = vld [vmem:[#allocation2 + $0x42c] sm:$0xf]  ;;  %v4015_v27 = vld [vmem:[#allocation2 + $0x538] sm:$0xf0] }
 0x118   :  { %1904 = vmatpush.bf16.msra.mxu2 %v3878_v12  ;;  %1923 = vmatpush.bf16.msra.mxu3 %v4006_v58  ;;  %v3933_v12 = vld [vmem:[#allocation2 + $0x488] sm:$0xf]  ;;  %v4838_v58 = vld [vmem:[#allocation2 + $0x494] sm:$0xf0]  ;;  %v4856_v33 = vld [vmem:[#allocation2 + $0x52c] sm:$0xf] }
 0x119   :  { %v4018_v10 = vor.u32 %v4856_v33, %v4015_v27 }
 0x11b   :  { %1942 = vmatpush.bf16.msra.mxu0 %v3882_v63  ;;  %1961 = vmatpush.bf16.msra.mxu1 %v4010_v1  ;;  %v4061_v63 = vld [vmem:[#allocation2 + $0x588] sm:$0xf]  ;;  %v3934_v1 = vor.u32 %v4838_v58, %v3933_v12  ;;  %v4854_v58 = vld [vmem:[#allocation2 + $0x514] sm:$0xf0] }
 0x11c   :  { %1905 = vmatpush.bf16.msra.mxu2 %v3862_v31  ;;  %1924 = vmatpush.bf16.msra.mxu3 %v3990_v3  ;;  %v4062_v31 = vor.u32 %v4870_v4, %v4061_v63  ;;  %v3917_v3 = vld [vmem:[#allocation2 + $0x468] sm:$0xf]  ;;  %v4820_v63 = vld [vmem:[#allocation2 + $0x40c] sm:$0xf] }
 0x11d   :  { %3830 = vmatmul.msk.bf16.vlgmr.msrb.gmra.mxu2 %vm5395_vm10, %v5399_v56  ;;  %3846 = vmatmul.msk.bf16.vlgmr.msrb.gmra.mxu0 %vm5395_vm10, %v5399_v56  ;;  %v4111_v56 = vld [vmem:[#allocation2 + $0x5f8] sm:$0xf0]  ;;  %v3918_v49 = vor.u32 %v4834_v61, %v3917_v3 }
 0x11e   :  { %3838 = vmatmul.msk.bf16.vlgmr.msrb.gmra.mxu3 %vm5395_vm10, %v5405_v44  ;;  %3854 = vmatmul.msk.bf16.vlgmr.msrb.gmra.mxu1 %vm5395_vm10, %v5405_v44  ;;  %v4114_v59 = vor.u32 %v4880_v17, %v4111_v56  ;;  %v4846_v44 = vld [vmem:[#allocation2 + $0x4d4] sm:$0xf0]  ;;  %v4828_v56 = vld [vmem:[#allocation2 + $0x44c] sm:$0xf] }
 0x11f   :  { %1943 = vmatpush.bf16.msra.mxu0 %v3866_v7  ;;  %1962 = vmatpush.bf16.msra.mxu1 %v3994_v6  ;;  %v3966_v14 = vor.u32 %v4846_v44, %v3965_v55  ;;  %v4066_v7 = vor.u32 %v4868_v38, %v4063_v35  ;;  %v4866_v6 = vld [vmem:[#allocation2 + $0x574] sm:$0xf0] }
 0x120   :  { %1974 = vmatpush.bf16.msrb.mxu2 %v3982_v45  ;;  %1993 = vmatpush.bf16.msrb.mxu3 %v4110_v11  ;;  %v4046_v23 = vor.u32 %v4866_v6, %v4045_v2  ;;  %v4864_v45 = vld [vmem:[#allocation2 + $0x56c] sm:$0xf]  ;;  %v4029_v11 = vld [vmem:[#allocation2 + $0x548] sm:$0xf]  ;;  %v4862_v17 = vld [vmem:[#allocation2 + $0x554] sm:$0xf0] }
 0x121   :  { %v4030_v55 = vor.u32 %v4862_v17, %v4029_v11 }
 0x123   :  { %2012 = vmatpush.bf16.msrb.mxu0 %v3986_v40  ;;  %2031 = vmatpush.bf16.msrb.mxu1 %v4114_v59  ;;  %v3902_v40 = vor.u32 %v4830_v9, %v3901_v8  ;;  %v3903_v59 = vld [vmem:[#allocation2 + $0x458] sm:$0xf0] }
 0x124   :  { %1975 = vmatpush.bf16.msrb.mxu2 %v3966_v14  ;;  %1994 = vmatpush.bf16.msrb.mxu3 %v4094_v20  ;;  %v3906_v44 = vor.u32 %v4828_v56, %v3903_v59  ;;  %v4031_v14 = vld [vmem:[#allocation2 + $0x558] sm:$0xf0]  ;;  %v4013_v20 = vld [vmem:[#allocation2 + $0x528] sm:$0xf] }
 0x125   :  { %v4034_v0 = vor.u32 %v4860_v13, %v4031_v14 }
 0x127   :  { %2013 = vmatpush.bf16.msrb.mxu0 %v3970_v18  ;;  %2032 = vmatpush.bf16.msrb.mxu1 %v4098_v29  ;;  %v4858_v18 = vld [vmem:[#allocation2 + $0x534] sm:$0xf0]  ;;  %v3887_v29 = vld [vmem:[#allocation2 + $0x438] sm:$0xf0] }
 0x128   :  { %1976 = vmatpush.bf16.msrb.mxu2 %v3950_v37  ;;  %1995 = vmatpush.bf16.msrb.mxu3 %v4078_v62  ;;  %v4014_v25 = vor.u32 %v4858_v18, %v4013_v20  ;;  %v3890_v34 = vor.u32 %v4824_v26, %v3887_v29 }
 0x12b   :  { %2014 = vmatpush.bf16.msrb.mxu0 %v3954_v54  ;;  %2033 = vmatpush.bf16.msrb.mxu1 %v4082_v53  ;;  %v3869_v54 = vld [vmem:[#allocation2 + $0x408] sm:$0xf] }
 0x12c   :  { %1977 = vmatpush.bf16.msrb.mxu2 %v3934_v1  ;;  %1996 = vmatpush.bf16.msrb.mxu3 %v4062_v31  ;;  %v3997_v53 = vld [vmem:[#allocation2 + $0x508] sm:$0xf]  ;;  %v3870_v12 = vor.u32 %v4822_v36, %v3869_v54  ;;  %v3871_v1 = vld [vmem:[#allocation2 + $0x418] sm:$0xf0] }
 0x12d   :  { %3834 = vmatmul.msk.bf16.gmra.mxu2 %vm5432_vm12, %v5444_v46  ;;  %3850 = vmatmul.msk.bf16.gmra.mxu0 %vm5432_vm12, %v5444_v46  ;;  %v4832_v46 = vld [vmem:[#allocation2 + $0x46c] sm:$0xf]  ;;  %v3998_v4 = vor.u32 %v4854_v58, %v3997_v53  ;;  %v3874_v41 = vor.u32 %v4820_v63, %v3871_v1  ;;  %v3999_v31 = vld [vmem:[#allocation2 + $0x518] sm:$0xf0] }
 0x12e   :  { %3842 = vmatmul.msk.bf16.gmra.mxu3 %vm5432_vm12, %v5446_v47  ;;  %3858 = vmatmul.msk.bf16.gmra.mxu1 %vm5432_vm12, %v5446_v47  ;;  %v3922_v39 = vor.u32 %v4832_v46, %v3919_v24  ;;  %v4047_v47 = vld [vmem:[#allocation2 + $0x578] sm:$0xf0] }
 0x12f   :  { %2015 = vmatpush.bf16.msrb.mxu0 %v3938_v32  ;;  %2034 = vmatpush.bf16.msrb.mxu1 %v4066_v7  ;;  %v4050_v22 = vor.u32 %v4864_v45, %v4047_v47  ;;  %v4002_v32 = vor.u32 %v4852_v19, %v3999_v31 }
 0x130   :  { %1978 = vmatpush.bf16.msrb.mxu2 %v3918_v49  ;;  %1997 = vmatpush.bf16.msrb.mxu3 %v4046_v23 }
 0x133   :  { %2016 = vmatpush.bf16.msrb.mxu0 %v3922_v39  ;;  %2035 = vmatpush.bf16.msrb.mxu1 %v4050_v22 }
 0x134   :  { %1979 = vmatpush.bf16.msrb.mxu2 %v3902_v40  ;;  %1998 = vmatpush.bf16.msrb.mxu3 %v4030_v55 }
 0x137   :  { %2017 = vmatpush.bf16.msrb.mxu0 %v3906_v44  ;;  %2036 = vmatpush.bf16.msrb.mxu1 %v4034_v0 }
 0x138   :  { %1980 = vmatpush.bf16.msrb.mxu2 %v3886_v21  ;;  %1999 = vmatpush.bf16.msrb.mxu3 %v4014_v25 }
 0x13a   :  { %v908_v62 = vpop.f32.mrf.mxu0 }
 0x13b   :  { %v927_v43 = vpop.f32.mrf.mxu1  ;;  %2018 = vmatpush.bf16.msrb.mxu0 %v3890_v34  ;;  %2037 = vmatpush.bf16.msrb.mxu1 %v4018_v10 }
 0x13c   :  { %v5494_v51 = vadd.f32 %v927_v43, %v908_v62  ;;  %1981 = vmatpush.bf16.msrb.mxu2 %v3870_v12  ;;  %2000 = vmatpush.bf16.msrb.mxu3 %v3998_v4 }
 0x13d   :  { %4118 = vmatmul.msk.bf16.vlgmr.msra.gmra.mxu2 %vm5490_vm14, %v5305_v60  ;;  %4134 = vmatmul.msk.bf16.vlgmr.msra.gmra.mxu0 %vm5490_vm14, %v5305_v60 }
 0x13e   :  { %4126 = vmatmul.msk.bf16.vlgmr.msra.gmra.mxu3 %vm5490_vm14, %v5327_v42  ;;  %4142 = vmatmul.msk.bf16.vlgmr.msra.gmra.mxu1 %vm5490_vm14, %v5327_v42 }
 0x13f   :  { %2019 = vmatpush.bf16.msrb.mxu0 %v3874_v41  ;;  %2038 = vmatpush.bf16.msrb.mxu1 %v4002_v32 }
 0x140   :  { %v870_v38 = vpop.f32.mrf.mxu2 }
 0x141   :  { %v889_v35 = vpop.f32.mrf.mxu3 }
 0x142   :  { %v890_v3 = vadd.f32 %v889_v35, %v870_v38  ;;  %v5508_v7 = vpop.f32.mrf.mxu0  ;;  %v4898_v35 = vld [vmem:[%s6145_s3 + $0x78] sm:$0xff] }
 0x143   :  { %v5510_v61 = vpop.f32.mrf.mxu1  ;;  %2453 = vmatpush.bf16.msra.mxu3 %v4898_v35 }
 0x148   :  { %v5514_v2 = vpop.f32.mrf.mxu2 }
 0x149   :  { %v5516_v6 = vpop.f32.mrf.mxu3 }
 0x14a   :  { %v913_v23 = vpop.f32.mrf.mxu0 }
 0x14b   :  { %v932_v46 = vpop.f32.mrf.mxu1 }
 0x14c   :  { %v933_v24 = vadd.f32 %v932_v46, %v913_v23  ;;  %v4897_v23 = vld [vmem:[%s6145_s3 + $0x70] sm:$0xff] }
 0x14d   :  { %4122 = vmatmul.msk.bf16.gmra.mxu2 %vm5519_vm0, %v5347_v57  ;;  %4138 = vmatmul.msk.bf16.gmra.mxu0 %vm5519_vm0, %v5347_v57 }
 0x14e   :  { %4130 = vmatmul.msk.bf16.gmra.mxu3 %vm5519_vm0, %v5357_v52  ;;  %4146 = vmatmul.msk.bf16.gmra.mxu1 %vm5519_vm0, %v5357_v52 }
 0x14f   :  { %2454 = vmatpush.bf16.msra.mxu3 %v4897_v23 }
 0x150   :  { %v875_v45 = vpop.f32.mrf.mxu2 }
 0x151   :  { %v894_v39 = vpop.f32.mrf.mxu3 }
 0x152   :  { %v895_v47 = vadd.f32 %v894_v39, %v875_v45  ;;  %v5535_v22 = vpop.f32.mrf.mxu0  ;;  %v4890_v45 = vld [vmem:[%s6145_s3 + $0x38] sm:$0xff] }
 0x153   :  { %v5537_v8 = vpop.f32.mrf.mxu1  ;;  %2434 = vmatpush.bf16.msra.mxu2 %v4890_v45  ;;  %v4891_v45 = vld [vmem:[%s6145_s3 + $0x40] sm:$0xff] }
 0x158   :  { %v5539_v9 = vpop.f32.mrf.mxu2 }
 0x159   :  { %v5541_v11 = vpop.f32.mrf.mxu3 }
 0x15a   :  { %v984_v40 = vpop.f32.mrf.mxu0 }
 0x15b   :  { %v1003_v17 = vpop.f32.mrf.mxu1 }
 0x15c   :  { %v1004_v56 = vadd.f32 %v1003_v17, %v984_v40 }
 0x15d   :  { %4150 = vmatmul.msk.bf16.vlgmr.msrb.gmra.mxu2 %vm5490_vm14, %v5305_v60  ;;  %4166 = vmatmul.msk.bf16.vlgmr.msrb.gmra.mxu0 %vm5490_vm14, %v5305_v60 }
 0x15e   :  { %4158 = vmatmul.msk.bf16.vlgmr.msrb.gmra.mxu3 %vm5490_vm14, %v5327_v42  ;;  %4174 = vmatmul.msk.bf16.vlgmr.msrb.gmra.mxu1 %vm5490_vm14, %v5327_v42 }
 0x160   :  { %v946_v59 = vpop.f32.mrf.mxu2 }
 0x161   :  { %v965_v55 = vpop.f32.mrf.mxu3 }
 0x162   :  { %v966_v44 = vadd.f32 %v965_v55, %v946_v59  ;;  %v5555_v13 = vpop.f32.mrf.mxu0 }
 0x163   :  { %v5557_v14 = vpop.f32.mrf.mxu1 }
 0x168   :  { %v5559_v15 = vpop.f32.mrf.mxu2 }
 0x169   :  { %v5561_v0 = vpop.f32.mrf.mxu3 }
 0x16a   :  { %v989_v16 = vpop.f32.mrf.mxu0 }
 0x16b   :  { %v1008_v20 = vpop.f32.mrf.mxu1 }
 0x16c   :  { %v5563_v18 = vadd.f32 %v1008_v20, %v989_v16 }
 0x16d   :  { %4154 = vmatmul.msk.bf16.gmra.mxu2 %vm5519_vm0, %v5347_v57  ;;  %4170 = vmatmul.msk.bf16.gmra.mxu0 %vm5519_vm0, %v5347_v57 }
 0x16e   :  { %4162 = vmatmul.msk.bf16.gmra.mxu3 %vm5519_vm0, %v5357_v52  ;;  %4178 = vmatmul.msk.bf16.gmra.mxu1 %vm5519_vm0, %v5357_v52 }
 0x170   :  { %v951_v60 = vpop.f32.mrf.mxu2 }
 0x171   :  { %v970_v42 = vpop.f32.mrf.mxu3 }
 0x172   :  { %v5577_v21 = vadd.f32 %v970_v42, %v951_v60  ;;  %v5579_v25 = vpop.f32.mrf.mxu0  ;;  %v4896_v60 = vld [vmem:[%s6145_s3 + $0x68] sm:$0xff]  ;;  %v4895_v42 = vld [vmem:[%s6145_s3 + $0x60] sm:$0xff] }
 0x173   :  { %v5581_v26 = vpop.f32.mrf.mxu1  ;;  %2455 = vmatpush.bf16.msra.mxu3 %v4896_v60 }
 0x177   :  { %2456 = vmatpush.bf16.msra.mxu3 %v4895_v42 }
 0x178   :  { %v5583_v29 = vpop.f32.mrf.mxu2 }
 0x179   :  { %v5585_v33 = vpop.f32.mrf.mxu3 }
 0x17a   :  { %v1380_v34 = vpop.f32.mrf.mxu0 }
 0x17b   :  { %v1399_v27 = vpop.f32.mrf.mxu1  ;;  %v1381_v57 = vadd.f32 %v1380_v34, %v5494_v51 }
 0x17d   :  { %v5588_v37 = vadd.f32 %v1399_v27, %v1381_v57  ;;  %v4888_v27 = vld [vmem:[%s6145_s3 + $0x28] sm:$0xff] }
 0x180   :  { %v1342_v62 = vpop.f32.mrf.mxu2 }
 0x181   :  { %v1361_v52 = vpop.f32.mrf.mxu3  ;;  %v1343_v43 = vadd.f32 %v1342_v62, %v890_v3 }
 0x182   :  { %v5592_v54 = vpop.f32.mrf.mxu0 }
 0x183   :  { %v5590_v10 = vadd.f32 %v1361_v52, %v1343_v43  ;;  %v5594_v36 = vpop.f32.mrf.mxu1  ;;  %v4894_v52 = vld [vmem:[%s6145_s3 + $0x58] sm:$0xff] }
 0x184   :  { %2457 = vmatpush.bf16.msra.mxu3 %v4894_v52  ;;  %v4883_v52 = vld [vmem:[%s6145_s3] sm:$0xff] }
 0x188   :  { %v5596_v53 = vpop.f32.mrf.mxu2 }
 0x189   :  { %v5598_v12 = vpop.f32.mrf.mxu3 }
 0x18a   :  { %v1385_v58 = vpop.f32.mrf.mxu0 }
 0x18b   :  { %v1404_v63 = vpop.f32.mrf.mxu1  ;;  %v1386_v1 = vadd.f32 %v1385_v58, %v933_v24  ;;  %v4887_v58 = vld [vmem:[%s6145_s3 + $0x20] sm:$0xff] }
 0x18d   :  { %v5600_v4 = vadd.f32 %v1404_v63, %v1386_v1  ;;  %v4893_v1 = vld [vmem:[%s6145_s3 + $0x50] sm:$0xff] }
 0x18e   :  { %2458 = vmatpush.bf16.msra.mxu3 %v4893_v1  ;;  %v930_v1 = vadd.f32 %v5510_v61, %v5508_v7  ;;  %v4922_v7 = vld [vmem:[%s6145_s3 + $0x138] sm:$0xff] }
 0x190   :  { %v1347_v51 = vpop.f32.mrf.mxu2 }
 0x191   :  { %v1366_v41 = vpop.f32.mrf.mxu3  ;;  %v1348_v19 = vadd.f32 %v1347_v51, %v895_v47 }
 0x192   :  { %v5604_v32 = vpop.f32.mrf.mxu0 }
 0x193   :  { %v5602_v31 = vadd.f32 %v1366_v41, %v1348_v19  ;;  %v5606_v38 = vpop.f32.mrf.mxu1 }
 0x198   :  { %v5611_v3 = vpop.f32.mrf.mxu2 }
 0x199   :  { %v5613_v49 = vpop.f32.mrf.mxu3 }
 0x19a   :  { %v1456_v46 = vpop.f32.mrf.mxu0 }
 0x19b   :  { %v1475_v24 = vpop.f32.mrf.mxu1  ;;  %v1457_v39 = vadd.f32 %v1456_v46, %v1004_v56  ;;  %v4889_v56 = vld [vmem:[%s6145_s3 + $0x30] sm:$0xff] }
 0x19c   :  { %2435 = vmatpush.bf16.msra.mxu2 %v4889_v56 }
 0x19d   :  { %v5621_v47 = vadd.f32 %v1475_v24, %v1457_v39  ;;  %v4892_v24 = vld [vmem:[%s6145_s3 + $0x48] sm:$0xff]  ;;  %v5679_v39 = vld [vmem:[%s6147_s5] sm:$0x77] }
 0x19e   :  { %2459 = vmatpush.bf16.msra.mxu3 %v4892_v24  ;;  %v2071_v60 = vperm.slane %v5679_v39, 4 }
 0x1a0   :  { %v1418_v40 = vpop.f32.mrf.mxu2  ;;  %2436 = vmatpush.bf16.msra.mxu2 %v4888_v27  ;;  %v4914_v27 = vld [vmem:[%s6145_s3 + $0xf8] sm:$0xff] }
 0x1a1   :  { %v1437_v17 = vpop.f32.mrf.mxu3  ;;  %v1419_v59 = vadd.f32 %v1418_v40, %v966_v44  ;;  %2491 = vmatpush.bf16.msra.mxu1 %v4914_v27 }
 0x1a2   :  { %v5625_v16 = vpop.f32.mrf.mxu0  ;;  %2460 = vmatpush.bf16.msra.mxu3 %v4891_v45 }
 0x1a3   :  { %v5623_v55 = vadd.f32 %v1437_v17, %v1419_v59  ;;  %v5627_v20 = vpop.f32.mrf.mxu1  ;;  %v4884_v59 = vld [vmem:[%s6145_s3 + $0x8] sm:$0xff] }
 0x1a4   :  { %2437 = vmatpush.bf16.msra.mxu2 %v4887_v58  ;;  %v4929_v58 = vld [vmem:[%s6145_s3 + $0x170] sm:$0xff] }
 0x1a8   :  { %v5638_v44 = vpop.f32.mrf.mxu2 }
 0x1a9   :  { %v5640_v34 = vpop.f32.mrf.mxu3 }
 0x1aa   :  { %v1461_v57 = vpop.f32.mrf.mxu0 }
 0x1ab   :  { %v1480_v62 = vpop.f32.mrf.mxu1  ;;  %v1462_v43 = vadd.f32 %v1461_v57, %v5563_v18  ;;  %v4886_v18 = vld [vmem:[%s6145_s3 + $0x18] sm:$0xff] }
 0x1ac   :  { %2438 = vmatpush.bf16.msra.mxu2 %v4886_v18  ;;  %v4930_v57 = vld [vmem:[%s6145_s3 + $0x178] sm:$0xff]  ;;  %v1383_v18 = vadd.f32 %v5592_v54, %v930_v1  ;;  %v892_v54 = vadd.f32 %v5516_v6, %v5514_v2  ;;  %v4905_v6 = vld [vmem:[%s6145_s3 + $0xb0] sm:$0xff] }
 0x1ad   :  { %v5652_v63 = vadd.f32 %v1480_v62, %v1462_v43  ;;  %2786 = vmatpush.bf16.msrb.mxu3 %v4930_v57  ;;  %v4913_v43 = vld [vmem:[%s6145_s3 + $0xf0] sm:$0xff]  ;;  %v4912_v57 = vld [vmem:[%s6145_s3 + $0xe8] sm:$0xff] }
 0x1ae   :  { %2492 = vmatpush.bf16.msra.mxu1 %v4913_v43  ;;  %v1345_v2 = vadd.f32 %v5596_v53, %v892_v54  ;;  %v4927_v53 = vld [vmem:[%s6145_s3 + $0x160] sm:$0xff]  ;;  %v4920_v54 = vld [vmem:[%s6145_s3 + $0x128] sm:$0xff] }
 0x1b0   :  { %v1423_v51 = vpop.f32.mrf.mxu2 }
 0x1b1   :  { %v1442_v41 = vpop.f32.mrf.mxu3  ;;  %v1424_v19 = vadd.f32 %v1423_v51, %v5577_v21  ;;  %v4885_v21 = vld [vmem:[%s6145_s3 + $0x10] sm:$0xff]  ;;  %2787 = vmatpush.bf16.msrb.mxu3 %v4929_v58 }
 0x1b2   :  { %v5663_v23 = vpop.f32.mrf.mxu0  ;;  %2439 = vmatpush.bf16.msra.mxu2 %v4885_v21  ;;  %2493 = vmatpush.bf16.msra.mxu1 %v4912_v57 }
 0x1b3   :  { %v5661_v35 = vadd.f32 %v1442_v41, %v1424_v19  ;;  %v5665_v46 = vpop.f32.mrf.mxu1  ;;  %v5707_v41 = vperm.slane %v2071_v60, 0  ;;  %v2070_v19 = vperm.slane %v5679_v39, 0 }
 0x1b6   :  { %2440 = vmatpush.bf16.msra.mxu2 %v4884_v59  ;;  %v4906_v59 = vld [vmem:[%s6145_s3 + $0xb8] sm:$0xff] }
 0x1b7   :  { %2472 = vmatpush.bf16.msra.mxu0 %v4906_v59 }
 0x1b8   :  { %v5681_v40 = vpop.f32.mrf.mxu2 }
 0x1b9   :  { %v5683_v17 = vpop.f32.mrf.mxu3 }
 0x1ba   :  { %v1945_v56 = vpop.f32.mrf.mxu0  ;;  %2441 = vmatpush.bf16.msra.mxu2 %v4883_v52  ;;  %v1402_v52 = vadd.f32 %v5594_v36, %v1383_v18  ;;  %v4911_v36 = vld [vmem:[%s6145_s3 + $0xe0] sm:$0xff] }
 0x1bb   :  { %v1964_v42 = vpop.f32.mrf.mxu1  ;;  %2473 = vmatpush.bf16.msra.mxu0 %v4905_v6  ;;  %2494 = vmatpush.bf16.msra.mxu1 %v4911_v36  ;;  %v4910_v6 = vld [vmem:[%s6145_s3 + $0xd8] sm:$0xff]  ;;  %v4919_v36 = vld [vmem:[%s6145_s3 + $0x120] sm:$0xff] }
 0x1bc   :  { %v1965_v62 = vadd.f32 %v1964_v42, %v1945_v56  ;;  %v5722_v56 = vperm.slane %v2070_v19, 0 }
 0x1be   :  { %v2051_v51 = vadd.f32 %v1965_v62, %v5588_v37  ;;  %v2115_v37 = vperm.slane %v5679_v39, 5  ;;  %2767 = vmatpush.bf16.msrb.mxu2 %v4922_v7  ;;  %v4928_v62 = vld [vmem:[%s6145_s3 + $0x168] sm:$0xff]  ;;  %v1364_v7 = vadd.f32 %v5598_v12, %v1345_v2  ;;  %v2142_v12 = vperm.slane %v5679_v39, 2 }
 0x1bf   :  { %2788 = vmatpush.bf16.msrb.mxu3 %v4928_v62  ;;  %2495 = vmatpush.bf16.msra.mxu1 %v4910_v6 }
 0x1c0   :  { %v1907_v24 = vpop.f32.mrf.mxu2  ;;  %v2083_v61 = vadd.f32 %v5707_v41, %v2051_v51  ;;  %v5738_v1 = vperm.slane %v2115_v37, 1  ;;  %v2143_v51 = vperm.slane %v5679_v39, 6  ;;  %v4904_v37 = vld [vmem:[%s6145_s3 + $0xa8] sm:$0xff] }
 0x1c1   :  { %v1926_v21 = vpop.f32.mrf.mxu3  ;;  %2474 = vmatpush.bf16.msra.mxu0 %v4904_v37 }
 0x1c2   :  { %v1927_v45 = vadd.f32 %v1926_v21, %v1907_v24  ;;  %v1947_v42 = vpop.f32.mrf.mxu0  ;;  %v2099_v58 = vmax.f32 %v2083_v61, 0.0  ;;  %v2114_v24 = vperm.slane %v5679_v39, 1  ;;  %v4903_v39 = vld [vmem:[%s6145_s3 + $0xa0] sm:$0xff] }
 0x1c3   :  { %v1966_v27 = vpop.f32.mrf.mxu1  ;;  %2789 = vmatpush.bf16.msrb.mxu3 %v4927_v53  ;;  %v935_v53 = vadd.f32 %v5537_v8, %v5535_v22  ;;  %v4925_v22 = vld [vmem:[%s6145_s3 + $0x150] sm:$0xff] }
 0x1c4   :  { %v2050_v60 = vadd.f32 %v1927_v45, %v5590_v10  ;;  %v1967_v43 = vadd.f32 %v1966_v27, %v1947_v42  ;;  %v4921_v10 = vld [vmem:[%s6145_s3 + $0x130] sm:$0xff]  ;;  %v5758_v42 = vperm.slane %v2143_v51, 2  ;;  %v5760_v62 = vperm.slane %v2114_v24, 1 }
 0x1c5   :  { %2768 = vmatpush.bf16.msrb.mxu2 %v4921_v10  ;;  %v4926_v10 = vld [vmem:[%s6145_s3 + $0x158] sm:$0xff]  ;;  %2475 = vmatpush.bf16.msra.mxu0 %v4903_v39  ;;  %v1388_v8 = vadd.f32 %v5604_v32, %v935_v53  ;;  %v897_v32 = vadd.f32 %v5541_v11, %v5539_v9  ;;  %v4924_v9 = vld [vmem:[%s6145_s3 + $0x148] sm:$0xff]  ;;  %v4917_v53 = vld [vmem:[%s6145_s3 + $0x110] sm:$0xff] }
 0x1c6   :  { %v2055_v19 = vadd.f32 %v1967_v43, %v1402_v52  ;;  %v2082_v18 = vadd.f32 %v5722_v56, %v2050_v60  ;;  %v2127_v60 = vmul.f32 %v5738_v1, %v2099_v58 }
 0x1c7   :  { %2790 = vmatpush.bf16.msrb.mxu3 %v4926_v10  ;;  %v1407_v11 = vadd.f32 %v5606_v38, %v1388_v8  ;;  %v1350_v39 = vadd.f32 %v5611_v3, %v897_v32  ;;  %v4923_v3 = vld [vmem:[%s6145_s3 + $0x140] sm:$0xff] }
 0x1c8   :  { %v2087_v21 = vadd.f32 %v5707_v41, %v2055_v19  ;;  %v1909_v45 = vpop.f32.mrf.mxu2  ;;  %v2098_v57 = vmax.f32 %v2082_v18, 0.0  ;;  %v2155_v18 = vadd.f32 %v5758_v42, %v2127_v60 }
 0x1c9   :  { %v1928_v59 = vpop.f32.mrf.mxu3  ;;  %2769 = vmatpush.bf16.msrb.mxu2 %v4920_v54  ;;  %v1369_v8 = vadd.f32 %v5613_v49, %v1350_v39 }
 0x1ca   :  { %v1929_v61 = vadd.f32 %v1928_v59, %v1909_v45  ;;  %v2103_v27 = vmax.f32 %v2087_v21, 0.0  ;;  %v1950_v43 = vpop.f32.mrf.mxu0  ;;  %v2126_v45 = vmul.f32 %v5760_v62, %v2098_v57  ;;  %v5783_v59 = vperm.slane %v2142_v12, 2  ;;  %v4902_v57 = vld [vmem:[%s6145_s3 + $0x98] sm:$0xff] }
 0x1cb   :  { %v1969_v2 = vpop.f32.mrf.mxu1  ;;  %2791 = vmatpush.bf16.msrb.mxu3 %v4925_v22  ;;  %v4918_v12 = vld [vmem:[%s6145_s3 + $0x118] sm:$0xff]  ;;  %2476 = vmatpush.bf16.msra.mxu0 %v4902_v57 }
 0x1cc   :  { %v2054_v52 = vadd.f32 %v1929_v61, %v1364_v7  ;;  %v2131_v58 = vmul.f32 %v5738_v1, %v2103_v27  ;;  %v1970_v51 = vadd.f32 %v1969_v2, %v1950_v43  ;;  %v4909_v61 = vld [vmem:[%s6145_s3 + $0xd0] sm:$0xff]  ;;  %v2154_v43 = vadd.f32 %v5783_v59, %v2126_v45  ;;  %v5835_v45 = vld [vmem:[%s6147_s5 + $0x8] sm:$0x77] }
 0x1cd   :  { %2770 = vmatpush.bf16.msrb.mxu2 %v4919_v36  ;;  %2496 = vmatpush.bf16.msra.mxu1 %v4909_v61 }
 0x1ce   :  { %v2086_v19 = vadd.f32 %v5722_v56, %v2054_v52  ;;  %v2159_v24 = vadd.f32 %v5758_v42, %v2131_v58  ;;  %v2059_v21 = vadd.f32 %v1970_v51, %v5600_v4  ;;  %v4908_v51 = vld [vmem:[%s6145_s3 + $0xc8] sm:$0xff] }
 0x1cf   :  { %2792 = vmatpush.bf16.msrb.mxu3 %v4924_v9  ;;  %v1006_v9 = vadd.f32 %v5557_v14, %v5555_v13 }
 0x1d0   :  { %v2102_v7 = vmax.f32 %v2086_v19, 0.0  ;;  %v5792_v37 = vpack.c.bf16 %v2159_v24, %v2155_v18  ;;  %v1912_v4 = vpop.f32.mrf.mxu2  ;;  %v2091_v52 = vadd.f32 %v5707_v41, %v2059_v21  ;;  %v4907_v18 = vld [vmem:[%s6145_s3 + $0xc0] sm:$0xff] }
 0x1d1   :  { %v1931_v54 = vpop.f32.mrf.mxu3  ;;  %2771 = vmatpush.bf16.msrb.mxu2 %v4918_v12  ;;  %2497 = vmatpush.bf16.msra.mxu1 %v4908_v51  ;;  %v4915_v51 = vld [vmem:[%s6145_s3 + $0x100] sm:$0xff] }
 0x1d2   :  { %v2130_v60 = vmul.f32 %v5760_v62, %v2102_v7  ;;  %v1932_v27 = vadd.f32 %v1931_v54, %v1912_v4  ;;  %2461 = vmatmul.bf16.vlgmr.msra.gmra.mxu3 %v5792_v37  ;;  %v1952_v10 = vpop.f32.mrf.mxu0  ;;  %v2107_v38 = vmax.f32 %v2091_v52, 0.0  ;;  %v4900_v54 = vld [vmem:[%s6145_s3 + $0x88] sm:$0xff] }
 0x1d3   :  { %v1971_v58 = vpop.f32.mrf.mxu1  ;;  %2793 = vmatpush.bf16.msrb.mxu3 %v4923_v3 }
 0x1d4   :  { %v2158_v2 = vadd.f32 %v5783_v59, %v2130_v60  ;;  %v2058_v6 = vadd.f32 %v1932_v27, %v5602_v31  ;;  %v1972_v19 = vadd.f32 %v1971_v58, %v1952_v10  ;;  %v4901_v31 = vld [vmem:[%s6145_s3 + $0x90] sm:$0xff]  ;;  %v4916_v60 = vld [vmem:[%s6145_s3 + $0x108] sm:$0xff]  ;;  %v2135_v27 = vmul.f32 %v5738_v1, %v2107_v38  ;;  %v4899_v58 = vld [vmem:[%s6145_s3 + $0x80] sm:$0xff] }
 0x1d5   :  { %2477 = vmatpush.bf16.msra.mxu0 %v4901_v31  ;;  %2772 = vmatpush.bf16.msrb.mxu2 %v4917_v53  ;;  %v1459_v38 = vadd.f32 %v5625_v16, %v1006_v9  ;;  %v4944_v16 = vld [vmem:[%s6145_s3 + $0x1e8] sm:$0xff] }
 0x1d6   :  { %v5816_v36 = vpack.c.bf16 %v2158_v2, %v2154_v43  ;;  %v2063_v24 = vadd.f32 %v1972_v19, %v1407_v11  ;;  %v2090_v21 = vadd.f32 %v5722_v56, %v2058_v6  ;;  %2498 = vmatpush.bf16.msra.mxu1 %v4907_v18  ;;  %v4946_v43 = vld [vmem:[%s6145_s3 + $0x1f8] sm:$0xff]  ;;  %v4961_v19 = vld [vmem:[%s6145_s3 + $0x270] sm:$0xff]  ;;  %v2163_v53 = vadd.f32 %v5758_v42, %v2135_v27 }
 0x1d7   :  { %v4962_v2 = vld [vmem:[%s6145_s3 + $0x278] sm:$0xff]  ;;  %v2072_v18 = vperm.slane %v5835_v45, 0 }
 0x1d8   :  { %2442 = vmatmul.bf16.vlgmr.msra.gmra.mxu2 %v5816_v36  ;;  %v2095_v7 = vadd.f32 %v5707_v41, %v2063_v24  ;;  %v1914_v61 = vpop.f32.mrf.mxu2  ;;  %v2073_v41 = vperm.slane %v5835_v45, 4  ;;  %v2106_v12 = vmax.f32 %v2090_v21, 0.0  ;;  %3119 = vmatpush.bf16.msra.mxu3 %v4962_v2 }
 0x1d9   :  { %v1933_v22 = vpop.f32.mrf.mxu3  ;;  %2478 = vmatpush.bf16.msra.mxu0 %v4900_v54  ;;  %2773 = vmatpush.bf16.msrb.mxu2 %v4916_v60  ;;  %v5898_v60 = vperm.slane %v2072_v18, 0 }
 0x1da   :  { %v1934_v4 = vadd.f32 %v1933_v22, %v1914_v61  ;;  %v2111_v57 = vmax.f32 %v2095_v7, 0.0  ;;  %v2021_v52 = vpop.f32.mrf.mxu0  ;;  %2824 = vmatpush.bf16.msrb.mxu1 %v4946_v43  ;;  %v5870_v31 = vperm.slane %v2073_v41, 0  ;;  %v2134_v14 = vmul.f32 %v5760_v62, %v2106_v12  ;;  %v4954_v61 = vld [vmem:[%s6145_s3 + $0x238] sm:$0xff]  ;;  %v4959_v43 = vld [vmem:[%s6145_s3 + $0x260] sm:$0xff] }
 0x1db   :  { %v2040_v49 = vpop.f32.mrf.mxu1  ;;  %v968_v22 = vadd.f32 %v5561_v0, %v5559_v15  ;;  %v4937_v0 = vld [vmem:[%s6145_s3 + $0x1b0] sm:$0xff]  ;;  %v1478_v12 = vadd.f32 %v5627_v20, %v1459_v38 }
 0x1dc   :  { %v2062_v32 = vadd.f32 %v1934_v4, %v1369_v8  ;;  %v2139_v6 = vmul.f32 %v5738_v1, %v2111_v57  ;;  %v2041_v10 = vadd.f32 %v2040_v49, %v2021_v52  ;;  %v4945_v1 = vld [vmem:[%s6145_s3 + $0x1f0] sm:$0xff]  ;;  %3120 = vmatpush.bf16.msra.mxu3 %v4961_v19  ;;  %v2117_v8 = vperm.slane %v5835_v45, 5  ;;  %v4960_v4 = vld [vmem:[%s6145_s3 + $0x268] sm:$0xff] }
 0x1dd   :  { %2479 = vmatpush.bf16.msra.mxu0 %v4899_v58  ;;  %2774 = vmatpush.bf16.msrb.mxu2 %v4915_v51  ;;  %v2162_v41 = vadd.f32 %v5783_v59, %v2134_v14  ;;  %v1421_v52 = vadd.f32 %v5638_v44, %v968_v22  ;;  %v2116_v58 = vperm.slane %v5835_v45, 1  ;;  %v4936_v51 = vld [vmem:[%s6145_s3 + $0x1a8] sm:$0xff]  ;;  %v4958_v14 = vld [vmem:[%s6145_s3 + $0x258] sm:$0xff] }
 0x1de   :  { %v2094_v11 = vadd.f32 %v5722_v56, %v2062_v32  ;;  %v2053_v39 = vadd.f32 %v2041_v10, %v5621_v47  ;;  %v2167_v13 = vadd.f32 %v5758_v42, %v2139_v6  ;;  %2825 = vmatpush.bf16.msrb.mxu1 %v4945_v1  ;;  %v4938_v42 = vld [vmem:[%s6145_s3 + $0x1b8] sm:$0xff]  ;;  %v5918_v2 = vperm.slane %v2117_v8, 1  ;;  %v4952_v19 = vld [vmem:[%s6145_s3 + $0x228] sm:$0xff] }
 0x1df   :  { %v2145_v6 = vperm.slane %v5835_v45, 6 }
 0x1e0   :  { %v2110_v56 = vmax.f32 %v2094_v11, 0.0  ;;  %v1983_v24 = vpop.f32.mrf.mxu2  ;;  %v5877_v21 = vpack.c.bf16 %v2167_v13, %v2163_v53  ;;  %3121 = vmatpush.bf16.msra.mxu3 %v4960_v4  ;;  %v4942_v13 = vld [vmem:[%s6145_s3 + $0x1d8] sm:$0xff]  ;;  %v4957_v4 = vld [vmem:[%s6145_s3 + $0x250] sm:$0xff] }
 0x1e1   :  { %v2002_v3 = vpop.f32.mrf.mxu3  ;;  %2805 = vmatpush.bf16.msrb.mxu0 %v4938_v42  ;;  %3100 = vmatpush.bf16.msra.mxu2 %v4954_v61  ;;  %v5939_v18 = vperm.slane %v2145_v6, 2  ;;  %v4935_v61 = vld [vmem:[%s6145_s3 + $0x1a0] sm:$0xff] }
 0x1e2   :  { %v2138_v47 = vmul.f32 %v5760_v62, %v2110_v56  ;;  %v2003_v7 = vadd.f32 %v2002_v3, %v1983_v24  ;;  %v2085_v62 = vadd.f32 %v5870_v31, %v2053_v39  ;;  %2466 = vmatmul.bf16.gmra.mxu3 %v5877_v21  ;;  %v2023_v27 = vpop.f32.mrf.mxu0  ;;  %2826 = vmatpush.bf16.msrb.mxu1 %v4944_v16  ;;  %v5941_v3 = vperm.slane %v2116_v58, 1 }
 0x1e3   :  { %v2042_v57 = vpop.f32.mrf.mxu1  ;;  %v1440_v39 = vadd.f32 %v5640_v34, %v1421_v52  ;;  %v2144_v34 = vperm.slane %v5835_v45, 2  ;;  %v4941_v45 = vld [vmem:[%s6145_s3 + $0x1d0] sm:$0xff] }
 0x1e4   :  { %v2052_v54 = vadd.f32 %v2003_v7, %v5623_v55  ;;  %v2166_v15 = vadd.f32 %v5783_v59, %v2138_v47  ;;  %v2043_v32 = vadd.f32 %v2042_v57, %v2023_v27  ;;  %v4953_v55 = vld [vmem:[%s6145_s3 + $0x230] sm:$0xff]  ;;  %v4943_v59 = vld [vmem:[%s6145_s3 + $0x1e0] sm:$0xff]  ;;  %v2101_v20 = vmax.f32 %v2085_v62, 0.0  ;;  %3122 = vmatpush.bf16.msra.mxu3 %v4959_v43 }
 0x1e5   :  { %2806 = vmatpush.bf16.msrb.mxu0 %v4937_v0  ;;  %3101 = vmatpush.bf16.msra.mxu2 %v4953_v55  ;;  %v4951_v62 = vld [vmem:[%s6145_s3 + $0x220] sm:$0xff]  ;;  %v5964_v0 = vperm.slane %v2144_v34, 2 }
 0x1e6   :  { %v5910_v49 = vpack.c.bf16 %v2166_v15, %v2162_v41  ;;  %v2057_v10 = vadd.f32 %v2043_v32, %v1478_v12  ;;  %v2084_v44 = vadd.f32 %v5898_v60, %v2052_v54  ;;  %2827 = vmatpush.bf16.msrb.mxu1 %v4943_v59  ;;  %v2129_v56 = vmul.f32 %v5918_v2, %v2101_v20  ;;  %v4934_v32 = vld [vmem:[%s6145_s3 + $0x198] sm:$0xff]  ;;  %v4940_v20 = vld [vmem:[%s6145_s3 + $0x1c8] sm:$0xff] }
 0x1e7   :  { %v1011_v54 = vadd.f32 %v5581_v26, %v5579_v25 }
 0x1e8   :  { %2447 = vmatmul.bf16.gmra.mxu2 %v5910_v49  ;;  %v2089_v9 = vadd.f32 %v5870_v31, %v2057_v10  ;;  %v1985_v11 = vpop.f32.mrf.mxu2  ;;  %v2100_v24 = vmax.f32 %v2084_v44, 0.0  ;;  %3123 = vmatpush.bf16.msra.mxu3 %v4958_v14  ;;  %v2157_v27 = vadd.f32 %v5939_v18, %v2129_v56  ;;  %v973_v10 = vadd.f32 %v5585_v33, %v5583_v29  ;;  %v4949_v29 = vld [vmem:[%s6145_s3 + $0x210] sm:$0xff]  ;;  %v4978_v56 = vld [vmem:[%s6145_s3 + $0x2f8] sm:$0xff] }
 0x1e9   :  { %v2004_v1 = vpop.f32.mrf.mxu3  ;;  %2807 = vmatpush.bf16.msrb.mxu0 %v4936_v51  ;;  %3102 = vmatpush.bf16.msra.mxu2 %v4952_v19  ;;  %v1464_v55 = vadd.f32 %v5663_v23, %v1011_v54  ;;  %v4956_v23 = vld [vmem:[%s6145_s3 + $0x248] sm:$0xff] }
 0x1ea   :  { %v2005_v53 = vadd.f32 %v2004_v1, %v1985_v11  ;;  %v2105_v38 = vmax.f32 %v2089_v9, 0.0  ;;  %v2026_v7 = vpop.f32.mrf.mxu0  ;;  %2828 = vmatpush.bf16.msrb.mxu1 %v4942_v13  ;;  %v2128_v15 = vmul.f32 %v5941_v3, %v2100_v24  ;;  %v1426_v33 = vadd.f32 %v5681_v40, %v973_v10  ;;  %v4971_v10 = vld [vmem:[%s6145_s3 + $0x2c0] sm:$0xff] }
 0x1eb   :  { %v2045_v42 = vpop.f32.mrf.mxu1  ;;  %v1483_v1 = vadd.f32 %v5665_v46, %v1464_v55  ;;  %v4955_v46 = vld [vmem:[%s6145_s3 + $0x240] sm:$0xff]  ;;  %v4969_v55 = vld [vmem:[%s6145_s3 + $0x2b0] sm:$0xff] }
 0x1ec   :  { %v2056_v47 = vadd.f32 %v2005_v53, %v1440_v39  ;;  %v2133_v16 = vmul.f32 %v5918_v2, %v2105_v38  ;;  %v2046_v22 = vadd.f32 %v2045_v42, %v2026_v7  ;;  %3124 = vmatpush.bf16.msra.mxu3 %v4957_v4  ;;  %v2156_v44 = vadd.f32 %v5964_v0, %v2128_v15  ;;  %v4933_v39 = vld [vmem:[%s6145_s3 + $0x190] sm:$0xff]  ;;  %v4948_v7 = vld [vmem:[%s6145_s3 + $0x208] sm:$0xff]  ;;  %v4947_v4 = vld [vmem:[%s6145_s3 + $0x200] sm:$0xff] }
 0x1ed   :  { %2808 = vmatpush.bf16.msrb.mxu0 %v4935_v61  ;;  %3103 = vmatpush.bf16.msra.mxu2 %v4951_v62  ;;  %v1445_v42 = vadd.f32 %v5683_v17, %v1426_v33  ;;  %v4931_v17 = vld [vmem:[%s6145_s3 + $0x180] sm:$0xff] }
 0x1ee   :  { %v2088_v8 = vadd.f32 %v5898_v60, %v2056_v47  ;;  %v2161_v57 = vadd.f32 %v5939_v18, %v2133_v16  ;;  %v2061_v41 = vadd.f32 %v2046_v22, %v5652_v63  ;;  %v4950_v63 = vld [vmem:[%s6145_s3 + $0x218] sm:$0xff]  ;;  %2829 = vmatpush.bf16.msrb.mxu1 %v4941_v45  ;;  %v4932_v47 = vld [vmem:[%s6145_s3 + $0x188] sm:$0xff]  ;;  %v4977_v22 = vld [vmem:[%s6145_s3 + $0x2f0] sm:$0xff] }
 0x1f0   :  { %v2104_v12 = vmax.f32 %v2088_v8, 0.0  ;;  %v5970_v52 = vpack.c.bf16 %v2161_v57, %v2157_v27  ;;  %v1988_v25 = vpop.f32.mrf.mxu2  ;;  %v2093_v6 = vadd.f32 %v5870_v31, %v2061_v41  ;;  %3125 = vmatpush.bf16.msra.mxu3 %v4956_v23  ;;  %v4970_v27 = vld [vmem:[%s6145_s3 + $0x2b8] sm:$0xff]  ;;  %v4972_v23 = vld [vmem:[%s6145_s3 + $0x2c8] sm:$0xff] }
 0x1f1   :  { %v2007_v26 = vpop.f32.mrf.mxu3  ;;  %2809 = vmatpush.bf16.msrb.mxu0 %v4934_v32  ;;  %3104 = vmatpush.bf16.msra.mxu2 %v4950_v63 }
 0x1f2   :  { %v2132_v59 = vmul.f32 %v5941_v3, %v2104_v12  ;;  %v2008_v43 = vadd.f32 %v2007_v26, %v1988_v25  ;;  %2499 = vmatmul.bf16.vlgmr.msra.gmra.mxu1 %v5970_v52  ;;  %2794 = vmatmul.bf16.vlgmr.msrb.gmra.mxu3 %v5792_v37  ;;  %v2028_v9 = vpop.f32.mrf.mxu0  ;;  %v2109_v13 = vmax.f32 %v2093_v6, 0.0  ;;  %v4976_v12 = vld [vmem:[%s6145_s3 + $0x2e8] sm:$0xff]  ;;  %v4975_v26 = vld [vmem:[%s6145_s3 + $0x2e0] sm:$0xff]  ;;  %v4965_v6 = vld [vmem:[%s6145_s3 + $0x290] sm:$0xff] }
 0x1f3   :  { %v2047_v11 = vpop.f32.mrf.mxu1  ;;  %2830 = vmatpush.bf16.msrb.mxu1 %v4940_v20  ;;  %v4966_v20 = vld [vmem:[%s6145_s3 + $0x298] sm:$0xff] }
 0x1f4   :  { %v2160_v58 = vadd.f32 %v5964_v0, %v2132_v59  ;;  %v2060_v51 = vadd.f32 %v2008_v43, %v5661_v35  ;;  %v2048_v19 = vadd.f32 %v2047_v11, %v2028_v9  ;;  %v4939_v35 = vld [vmem:[%s6145_s3 + $0x1c0] sm:$0xff]  ;;  %3126 = vmatpush.bf16.msra.mxu3 %v4955_v46  ;;  %v2137_v16 = vmul.f32 %v5918_v2, %v2109_v13  ;;  %v4974_v59 = vld [vmem:[%s6145_s3 + $0x2d8] sm:$0xff]  ;;  %v4973_v43 = vld [vmem:[%s6145_s3 + $0x2d0] sm:$0xff] }
 0x1f5   :  { %2810 = vmatpush.bf16.msrb.mxu0 %v4933_v39  ;;  %3105 = vmatpush.bf16.msra.mxu2 %v4949_v29 }
 0x1f6   :  { %v5998_v53 = vpack.c.bf16 %v2160_v58, %v2156_v44  ;;  %v2065_v14 = vadd.f32 %v2048_v19, %v1483_v1  ;;  %v2092_v40 = vadd.f32 %v5898_v60, %v2060_v51  ;;  %v2165_v57 = vadd.f32 %v5939_v18, %v2137_v16  ;;  %v4964_v44 = vld [vmem:[%s6145_s3 + $0x288] sm:$0xff] }
 0x1f7   :  { %2831 = vmatpush.bf16.msrb.mxu1 %v4939_v35 }
 0x1f8   :  { %2480 = vmatmul.bf16.vlgmr.msra.gmra.mxu0 %v5998_v53  ;;  %2775 = vmatmul.bf16.vlgmr.msrb.gmra.mxu2 %v5816_v36  ;;  %v2097_v38 = vadd.f32 %v5870_v31, %v2065_v14  ;;  %v1990_v24 = vpop.f32.mrf.mxu2  ;;  %v2108_v62 = vmax.f32 %v2092_v40, 0.0 }
 0x1f9   :  { %v2009_v34 = vpop.f32.mrf.mxu3  ;;  %2811 = vmatpush.bf16.msrb.mxu0 %v4932_v47  ;;  %3106 = vmatpush.bf16.msra.mxu2 %v4948_v7 }
 0x1fa   :  { %v2010_v61 = vadd.f32 %v2009_v34, %v1990_v24  ;;  %v2113_v31 = vmax.f32 %v2097_v38, 0.0  ;;  %v2136_v41 = vmul.f32 %v5941_v3, %v2108_v62 }
 0x1fb   :  { %3157 = vmatpush.bf16.msra.mxu1 %v4978_v56 }
 0x1fc   :  { %v2064_v8 = vadd.f32 %v2010_v61, %v1445_v42  ;;  %v2141_v45 = vmul.f32 %v5918_v2, %v2113_v31 }
 0x1fd   :  { %2812 = vmatpush.bf16.msrb.mxu0 %v4931_v17  ;;  %3107 = vmatpush.bf16.msra.mxu2 %v4947_v4 }
 0x1fe   :  { %v2096_v54 = vadd.f32 %v5898_v60, %v2064_v8  ;;  %v2169_v2 = vadd.f32 %v5939_v18, %v2141_v45  ;;  %v2164_v18 = vadd.f32 %v5964_v0, %v2136_v41 }
 0x1ff   :  { %3158 = vmatpush.bf16.msra.mxu1 %v4977_v22 }
 0x200   :  { %v2112_v15 = vmax.f32 %v2096_v54, 0.0  ;;  %v2177_v32 = vpack.c.bf16 %v2169_v2, %v2165_v57 }
 0x201   :  { %3138 = vmatpush.bf16.msra.mxu0 %v4970_v27 }
 0x202   :  { %v2140_v60 = vmul.f32 %v5941_v3, %v2112_v15  ;;  %2504 = vmatmul.bf16.gmra.mxu1 %v2177_v32  ;;  %2799 = vmatmul.bf16.gmra.mxu3 %v5877_v21  ;;  %v4968_v3 = vld [vmem:[%s6145_s3 + $0x2a8] sm:$0xff] }
 0x203   :  { %3159 = vmatpush.bf16.msra.mxu1 %v4976_v12 }
 0x204   :  { %v2168_v25 = vadd.f32 %v5964_v0, %v2140_v60  ;;  %v4967_v0 = vld [vmem:[%s6145_s3 + $0x2a0] sm:$0xff] }
 0x205   :  { %3139 = vmatpush.bf16.msra.mxu0 %v4969_v55 }
 0x206   :  { %v2176_v63 = vpack.c.bf16 %v2168_v25, %v2164_v18 }
 0x207   :  { %3160 = vmatpush.bf16.msra.mxu1 %v4975_v26 }
 0x208   :  { %2485 = vmatmul.bf16.gmra.mxu0 %v2176_v63  ;;  %2780 = vmatmul.bf16.gmra.mxu2 %v5910_v49 }
 0x209   :  { %3140 = vmatpush.bf16.msra.mxu0 %v4968_v3 }
 0x20b   :  { %3161 = vmatpush.bf16.msra.mxu1 %v4974_v59 }
 0x20d   :  { %3141 = vmatpush.bf16.msra.mxu0 %v4967_v0 }
 0x20f   :  { %3162 = vmatpush.bf16.msra.mxu1 %v4973_v43 }
 0x211   :  { %3142 = vmatpush.bf16.msra.mxu0 %v4966_v20 }
 0x212   :  { %2832 = vmatmul.bf16.vlgmr.msrb.gmra.mxu1 %v5970_v52  ;;  %3127 = vmatmul.bf16.vlgmr.msra.gmra.mxu3 %v5792_v37  ;;  %v4963_v37 = vld [vmem:[%s6145_s3 + $0x280] sm:$0xff] }
 0x213   :  { %3163 = vmatpush.bf16.msra.mxu1 %v4972_v23 }
 0x215   :  { %3143 = vmatpush.bf16.msra.mxu0 %v4965_v6 }
 0x217   :  { %3164 = vmatpush.bf16.msra.mxu1 %v4971_v10 }
 0x218   :  { %2813 = vmatmul.bf16.vlgmr.msrb.gmra.mxu0 %v5998_v53  ;;  %3108 = vmatmul.bf16.vlgmr.msra.gmra.mxu2 %v5816_v36 }
 0x219   :  { %3144 = vmatpush.bf16.msra.mxu0 %v4964_v44 }
 0x21d   :  { %3145 = vmatpush.bf16.msra.mxu0 %v4963_v37 }
 0x222   :  { %2837 = vmatmul.bf16.gmra.mxu1 %v2177_v32  ;;  %3132 = vmatmul.bf16.gmra.mxu3 %v5877_v21 }
 0x228   :  { %2818 = vmatmul.bf16.gmra.mxu0 %v2176_v63  ;;  %3113 = vmatmul.bf16.gmra.mxu2 %v5910_v49 }
 0x232   :  { %3165 = vmatmul.bf16.vlgmr.msra.gmra.mxu1 %v5970_v52 }
 0x238   :  { %3146 = vmatmul.bf16.vlgmr.msra.gmra.mxu0 %v5998_v53 }
 0x242   :  { %3170 = vmatmul.bf16.gmra.mxu1 %v2177_v32 }
 0x248   :  { %3151 = vmatmul.bf16.gmra.mxu0 %v2176_v63 }
 0x255   :  { %v2462_v36 = vpop.f32.mrf.mxu3 }
 0x25b   :  { %v2443_v58 = vpop.f32.mrf.mxu2 }
 0x25c   :  { %v2463_v51 = vadd.f32 %v2462_v36, %v2443_v58 }
 0x25d   :  { %v2464_v9 = vpop.f32.mrf.mxu3 }
 0x263   :  { %v2445_v11 = vpop.f32.mrf.mxu2 }
 0x264   :  { %v2465_v1 = vadd.f32 %v2464_v9, %v2445_v11 }
 0x265   :  { %v2467_v19 = vpop.f32.mrf.mxu3 }
 0x26b   :  { %v2448_v39 = vpop.f32.mrf.mxu2 }
 0x26c   :  { %v2468_v29 = vadd.f32 %v2467_v19, %v2448_v39 }
 0x26d   :  { %v2469_v52 = vpop.f32.mrf.mxu3 }
 0x26f   :  { %v2500_v33 = vpop.f32.mrf.mxu1 }
 0x273   :  { %v2450_v13 = vpop.f32.mrf.mxu2 }
 0x274   :  { %v2470_v3 = vadd.f32 %v2469_v52, %v2450_v13 }
 0x275   :  { %v2481_v21 = vpop.f32.mrf.mxu0  ;;  %v2795_v7 = vpop.f32.mrf.mxu3 }
 0x276   :  { %v2482_v35 = vadd.f32 %v2481_v21, %v2463_v51 }
 0x277   :  { %v2502_v49 = vpop.f32.mrf.mxu1 }
 0x278   :  { %v2501_v46 = vadd.f32 %v2500_v33, %v2482_v35 }
 0x27a   :  { %v3176_v38 = vrot.slane %v2501_v46, 7 }
 0x27b   :  { %v2776_v34 = vpop.f32.mrf.mxu2 }
 0x27c   :  { %v2796_v37 = vadd.f32 %v2795_v7, %v2776_v34 }
 0x27d   :  { %v2483_v14 = vpop.f32.mrf.mxu0  ;;  %v2797_v17 = vpop.f32.mrf.mxu3 }
 0x27e   :  { %v2484_v53 = vadd.f32 %v2483_v14, %v2465_v1 }
 0x27f   :  { %v2505_v40 = vpop.f32.mrf.mxu1 }
 0x280   :  { %v2503_v56 = vadd.f32 %v2502_v49, %v2484_v53 }
 0x282   :  { %v3177_v24 = vrot.slane %v2503_v56, 7  ;;  %v6112_v56 = vld [vmem:[%s6148_s6] sm:$0x7]  ;;  %s5042_s6 = smov [#allocation5]  }
 0x283   :  { %v2778_v8 = vpop.f32.mrf.mxu2  ;;  %s3257_s24 = sshll.u32 %s5042_s6, 4  ;;  %s3258_s24 = int_to_ptr.vmem [resolvable:$true] %s3257_s24 }
 0x284   :  { %v6092_v47 = vsel %vm113_vm2, %v3176_v38, %v3177_v24  ;;  %v2798_v33 = vadd.f32 %v2797_v17, %v2778_v8 }
 0x285   :  { %v2486_v42 = vpop.f32.mrf.mxu0  ;;  %v2800_v2 = vpop.f32.mrf.mxu3 }
 0x286   :  { %v2487_v61 = vadd.f32 %v2486_v42, %v2468_v29 }
 0x287   :  { %v2507_v31 = vpop.f32.mrf.mxu1 }
 0x288   :  { %v6094_v16 = vadd.f32 %v2505_v40, %v2487_v61  ;;  %v3209_v61 = vperm.slane %v6112_v56, 0 }
 0x28a   :  { %v3178_v22 = vrot.slane %v6094_v16, 7 }
 0x28b   :  { %v2781_v27 = vpop.f32.mrf.mxu2 }
 0x28c   :  { %v6101_v62 = vsel %vm113_vm2, %v3177_v24, %v3178_v22  ;;  %v2801_v8 = vadd.f32 %v2800_v2, %v2781_v27 }
 0x28d   :  { %v2488_v45 = vpop.f32.mrf.mxu0  ;;  %v2802_v32 = vpop.f32.mrf.mxu3 }
 0x28e   :  { %v2489_v43 = vadd.f32 %v2488_v45, %v2470_v3 }
 0x28f   :  { %v2833_v4 = vpop.f32.mrf.mxu1 }
 0x290   :  { %v2508_v6 = vadd.f32 %v2507_v31, %v2489_v43 }
 0x292   :  { %v3179_v51 = vrot.slane %v2508_v6, 7 }
 0x293   :  { %v2783_v12 = vpop.f32.mrf.mxu2 }
 0x294   :  { %v3183_v35 = vsel %vm113_vm2, %v3179_v51, %v3176_v38  ;;  %v2803_v28 = vadd.f32 %v2802_v32, %v2783_v12  ;;  %v3180_v30 = vsel %vm113_vm2, %v3178_v22, %v3179_v51  ;;  %vm3247_vm2 = vcmask 1041409  }
 0x295   :  { %v2814_v54 = vpop.f32.mrf.mxu0  ;;  %v3128_v25 = vpop.f32.mrf.mxu3  ;;  %v3184_v14 = vsel %vm5139_vm4, 0.0, %v3183_v35 }
 0x296   :  { %v2815_v9 = vadd.f32 %v2814_v54, %v2796_v37 }
 0x297   :  { %v2835_v57 = vpop.f32.mrf.mxu1 }
 0x298   :  { %v2834_v21 = vadd.f32 %v2833_v4, %v2815_v9 }
 0x29a   :  { %v3188_v34 = vadd.f32 %v3184_v14, %v2834_v21 }
 0x29b   :  { %v3109_v18 = vpop.f32.mrf.mxu2 }
 0x29c   :  { %v3129_v23 = vadd.f32 %v3128_v25, %v3109_v18 }
 0x29d   :  { %v2816_v41 = vpop.f32.mrf.mxu0  ;;  %v3130_v20 = vpop.f32.mrf.mxu3 }
 0x29e   :  { %v2817_v13 = vadd.f32 %v2816_v41, %v2798_v33 }
 0x29f   :  { %v2838_v15 = vpop.f32.mrf.mxu1 }
 0x2a0   :  { %v2836_v38 = vadd.f32 %v2835_v57, %v2817_v13 }
 0x2a2   :  { %v3189_v18 = vadd.f32 %v6092_v47, %v2836_v38  ;;  %v3186_v47 = vsel %vm5169_vm6, 0.0, %v6101_v62 }
 0x2a3   :  { %v3111_v59 = vpop.f32.mrf.mxu2 }
 0x2a4   :  { %v3131_v36 = vadd.f32 %v3130_v20, %v3111_v59 }
 0x2a5   :  { %v2819_v60 = vpop.f32.mrf.mxu0  ;;  %v3133_v29 = vpop.f32.mrf.mxu3 }
 0x2a6   :  { %v2820_v4 = vadd.f32 %v2819_v60, %v2801_v8 }
 0x2a7   :  { %v2840_v55 = vpop.f32.mrf.mxu1 }
 0x2a8   :  { %v2839_v27 = vadd.f32 %v2838_v15, %v2820_v4 }
 0x2aa   :  { %v3190_v6 = vadd.f32 %v3186_v47, %v2839_v27 }
 0x2ab   :  { %v3114_v1 = vpop.f32.mrf.mxu2 }
 0x2ac   :  { %v3134_v52 = vadd.f32 %v3133_v29, %v3114_v1 }
 0x2ad   :  { %v2821_v26 = vpop.f32.mrf.mxu0  ;;  %v3135_v41 = vpop.f32.mrf.mxu3 }
 0x2ae   :  { %v2822_v54 = vadd.f32 %v2821_v26, %v2803_v28 }
 0x2af   :  { %v3166_v63 = vpop.f32.mrf.mxu1 }
 0x2b0   :  { %v2841_v2 = vadd.f32 %v2840_v55, %v2822_v54 }
 0x2b3   :  { %v3116_v45 = vpop.f32.mrf.mxu2 }
 0x2b4   :  { %v3136_v25 = vadd.f32 %v3135_v41, %v3116_v45 }
 0x2b5   :  { %v3147_v0 = vpop.f32.mrf.mxu0 }
 0x2b6   :  { %v3148_v10 = vadd.f32 %v3147_v0, %v3129_v23 }
 0x2b7   :  { %v3168_v44 = vpop.f32.mrf.mxu1 }
 0x2b8   :  { %v3167_v19 = vadd.f32 %v3166_v63, %v3148_v10  ;;  %v3191_v10 = vadd.f32 %v3180_v30, %v2841_v2 }
 0x2ba   :  { %v3192_v49 = vrot.slane %v3167_v19, 1 }
 0x2bd   :  { %v3149_v58 = vpop.f32.mrf.mxu0 }
 0x2be   :  { %v3150_v11 = vadd.f32 %v3149_v58, %v3131_v36 }
 0x2bf   :  { %v3171_v40 = vpop.f32.mrf.mxu1 }
 0x2c0   :  { %v3169_v39 = vadd.f32 %v3168_v44, %v3150_v11 }
 0x2c2   :  { %v3193_v46 = vrot.slane %v3169_v39, 1 }
 0x2c4   :  { %v3198_v53 = vsel %vm247_vm3, %v3192_v49, %v3193_v46 }
 0x2c5   :  { %v3152_v24 = vpop.f32.mrf.mxu0  ;;  %v3204_v42 = vadd.f32 %v3198_v53, %v3188_v34 }
 0x2c6   :  { %v3153_v7 = vadd.f32 %v3152_v24, %v3134_v52 }
 0x2c7   :  { %v3210_v63 = vadd.f32 %v3209_v61, %v3204_v42  ;;  %v3173_v12 = vpop.f32.mrf.mxu1 }
 0x2c8   :  { %v3172_v31 = vadd.f32 %v3171_v40, %v3153_v7  ;;  %v3241_v7 = vperm.slane %v6112_v56, 2 }
 0x2c9   :  { %v3214_v32 = vmax.f32 %v3210_v63, 0.0 }
 0x2ca   :  { %v3194_v17 = vrot.slane %v3172_v31, 1 }
 0x2cb   :  { %v3219_v15 = vsel %vm3218_vm1, %v3214_v32, 0.0 }
 0x2cc   :  { %v3197_v3 = vsel %vm247_vm3, %v3193_v46, %v3194_v17 }
 0x2cd   :  { %v3201_v57 = vsel %vm5145_vm5, 0.0, %v3197_v3  ;;  %v3154_v59 = vpop.f32.mrf.mxu0 }
 0x2ce   :  { %v3205_v0 = vadd.f32 %v3201_v57, %v3189_v18  ;;  %v3155_v43 = vadd.f32 %v3154_v59, %v3136_v25 }
 0x2d0   :  { %v3211_v60 = vadd.f32 %v3209_v61, %v3205_v0  ;;  %v3174_v26 = vadd.f32 %v3173_v12, %v3155_v43 }
 0x2d2   :  { %v3215_v20 = vmax.f32 %v3211_v60, 0.0  ;;  %v3195_v23 = vrot.slane %v3174_v26, 1 }
 0x2d4   :  { %v3220_v55 = vsel %vm3218_vm1, %v3215_v20, 0.0  ;;  %v3196_v44 = vsel %vm247_vm3, %v3194_v17, %v3195_v23  ;;  %v3199_v48 = vsel %vm247_vm3, %v3195_v23, %v3192_v49  ;;  %v3237_v49 = vmul.f32 0.0625, %v6112_v56 }
 0x2d5   :  { %v3221_v62 = vadd.f32 %v3220_v55, %v3219_v15  ;;  %v3203_v16 = vsel %vm5175_vm7, 0.0, %v3199_v48  ;;  %v3206_v37 = vadd.f32 %v3196_v44, %v3190_v6  ;;  %vm3250_vm3 = vcmask 254976  }
 0x2d6   :  { %v3207_v22 = vadd.f32 %v3203_v16, %v3191_v10  ;;  %v3238_v53 = vperm.slane %v3237_v49, 1 }
 0x2d7   :  { %v3222_v36 = vrot.slane %v3221_v62, 4  ;;  %v3212_v58 = vadd.f32 %v3209_v61, %v3206_v37 }
 0x2d8   :  { %v3213_v51 = vadd.f32 %v3209_v61, %v3207_v22 }
 0x2d9   :  { %v3223_v9 = vadd.f32 %v3222_v36, %v3221_v62  ;;  %v3216_v11 = vmax.f32 %v3212_v58, 0.0 }
 0x2da   :  { %v3217_v1 = vmax.f32 %v3213_v51, 0.0 }
 0x2db   :  { %v3228_v19 = vsel %vm3218_vm1, %v3216_v11, 0.0  ;;  %v3224_v39 = vrot.slane %v3223_v9, 2 }
 0x2dc   :  { %v3229_v29 = vsel %vm3218_vm1, %v3217_v1, 0.0 }
 0x2dd   :  { %v3230_v33 = vadd.f32 %v3229_v29, %v3228_v19  ;;  %v3225_v21 = vadd.f32 %v3224_v39, %v3223_v9 }
 0x2df   :  { %v3231_v5 = vrot.slane %v3230_v33, 4  ;;  %v3226_v50 = vrot.slane %v3225_v21, 1 }
 0x2e1   :  { %v3232_v35 = vadd.f32 %v3231_v5, %v3230_v33  ;;  %v3227_v52 = vadd.f32 %v3226_v50, %v3225_v21 }
 0x2e3   :  { %v3233_v46 = vrot.slane %v3232_v35, 2  ;;  %v3239_v24 = vmul.f32 %v3238_v53, %v3227_v52 }
 0x2e5   :  { %v3234_v13 = vadd.f32 %v3233_v46, %v3232_v35  ;;  %v3242_v42 = vadd.f32 %v3241_v7, %v3239_v24 }
 0x2e7   :  { %v3235_v14 = vrot.slane %v3234_v13, 1 }
 0x2e9   :  { %v3236_v40 = vadd.f32 %v3235_v14, %v3234_v13 }
 0x2eb   :  { %v3240_v34 = vmul.f32 %v3238_v53, %v3236_v40 }
 0x2ed   :  { %v3243_v38 = vadd.f32 %v3241_v7, %v3240_v34 }
 0x2ef   :  { %v3246_v61 = vrot.slane %v3243_v38, 7 }
 0x2f1   :  { %v3248_v31 = vsel %vm3247_vm2, %v3246_v61, %v3242_v42 }
 0x2f2   :  { %3251 = vst.msk [vmem:[#allocation5] sm:$0x3] %vm3250_vm3, %v3248_v31 }
 0x2f3   :  { %3262 = dma.vmem_to_hbm [thread:$0]  %s3258_s24, 32, %s3260_s27, [#allocation4]  }
 0x2f4   :  { %5036 = dma.done.wait [#allocation4], 32  }
 0x2f5   :  { %5037 = vsyncadd [#allocation4], 4294967264 }
 0x2f6   :  { %3267 = vsyncpa [#allocation3], 1 }
 0x2f7   :  { %3268 = vsyncpa [#allocation4], 1 }

</bundles_post_ra>
